<compile_context>
chip_gen: v7x
topology: tpu7x:2x2x1
jax: 0.10.0
libtpu: 0.0.40
codegen_flags: <defaults>
</compile_context>

<pallas_src>
import math

import jax
import jax.numpy as jnp
from jax.experimental import pallas as pl
from jax.experimental.pallas import tpu as pltpu

# ----- model hyper-parameters (small, consistent with __C) ------------------
HIDDEN = 32          # __C.HIDDEN_SIZE
HEADS = 4            # __C.MULTI_HEAD
DH = HIDDEN // HEADS # __C.HIDDEN_SIZE_HEAD
FF = 64              # __C.FF_SIZE
SEQ_X = 8
SEQ_Y = 8
EPS = 1e-6
NEG = -1e9
SCALE = 1.0 / math.sqrt(DH)

MM_DTYPE = jnp.bfloat16     # MXU operand dtype (accumulation stays f32)

# --- packed parameter layout -------------------------------------------------
# w_all : (8*H + 2*FF, H) f32
#   rows [i*H:(i+1)*H), i=0..7 : attention Linears, (out, in) layout
#     0: mhatt1.linear_v 1: mhatt1.linear_k 2: mhatt1.linear_q 3: mhatt1.linear_merge
#     4: mhatt2.linear_v 5: mhatt2.linear_k 6: mhatt2.linear_q 7: mhatt2.linear_merge
#   rows [8H, 8H+FF)      : ffn first Linear  (FF, H)  (out, in)
#   rows [8H+FF, 8H+2FF)  : ffn second Linear transposed (FF, H)  (in, out)
# p_all : (18, FF) f32, H-wide rows zero-padded to FF lanes
ROW_B_ATTN = 0    # 8 rows, cols :H
ROW_W_THR = 8     # cols :H
ROW_B_THR = 9     # col 0
ROW_B_FF1 = 10    # cols :FF
ROW_B_FF2 = 11    # cols :H
ROW_LN_G = 12     # 3 rows, cols :H
ROW_LN_B = 15     # 3 rows, cols :H
P_ROWS = 18


# ----------------------------- kernel helpers -------------------------------
def _mm(a, b, contract):
    """MXU matmul: bf16 operands, f32 accumulation."""
    return jax.lax.dot_general(
        a.astype(MM_DTYPE), b.astype(MM_DTYPE),
        dimension_numbers=(contract, ((), ())),
        preferred_element_type=jnp.float32)


def _softmax_lastdim(s):
    m = jnp.max(s, axis=-1, keepdims=True)
    e = jnp.exp(s - m)
    return e * pl.reciprocal(jnp.sum(e, axis=-1, keepdims=True), approx=True)


def _layernorm(x, gamma, beta):
    # MCAN LayerNorm: unbiased std, eps added to the std.
    mean = jnp.mean(x, axis=-1, keepdims=True)
    d = x - mean
    var = jnp.sum(d * d, axis=-1, keepdims=True) * (1.0 / (x.shape[-1] - 1))
    # full-precision reciprocal here: LN error is not diluted by a residual
    inv = pl.reciprocal(jnp.sqrt(var) + EPS)
    return gamma * (d * inv) + beta


def _mha_heads(q, k, v, neg_bias, bb, sq, sk, w_merge, accumulate_p=True):
    """Multi-head attention, merge-Linear folded per head (no bias, no gate).

    q: (bb*sq, H); k, v: (bb*sk, H); neg_bias: (bb, 1, sk) additive mask bias;
    w_merge: (H, H) merge weight in (out, in) layout.
    Returns (merged (bb*sq, H) f32, p_acc (bb, sq, sk) f32 = sum of attention
    maps over heads, or None).
    """
    merged = jnp.zeros((bb * sq, HIDDEN), jnp.float32)
    p_acc = jnp.zeros((bb, sq, sk), jnp.float32) if accumulate_p else None
    for h in range(HEADS):
        sl = slice(h * DH, (h + 1) * DH)
        qh = q[:, sl].reshape(bb, sq, DH)
        kh = k[:, sl].reshape(bb, sk, DH)
        vh = v[:, sl].reshape(bb, sk, DH)
        s = jnp.einsum('bqd,bkd->bqk', qh.astype(MM_DTYPE), kh.astype(MM_DTYPE),
                       preferred_element_type=jnp.float32) * SCALE + neg_bias
        p = _softmax_lastdim(s)                                   # (bb, sq, sk) f32
        if accumulate_p:
            p_acc = p_acc + p
        o = jnp.einsum('bqk,bkd->bqd', p.astype(MM_DTYPE), vh.astype(MM_DTYPE),
                       preferred_element_type=jnp.float32)        # (bb, sq, DH)
        # concat_h(o_h) @ Wm.T  ==  sum_h o_h @ Wm[:, h*DH:(h+1)*DH].T
        merged = merged + _mm(o.reshape(bb * sq, DH), w_merge[:, sl], ((1,), (1,)))
    return merged, p_acc


# --------------------------------- kernel -----------------------------------
def selres_ga_kernel(x_ref, y_ref, xm_ref, ym_ref, w_ref, p_ref, out_ref):
    bb, sx, H = x_ref.shape
    sy = y_ref.shape[1]
    mx = bb * sx

    def wrows(r0, r1):               # weight rows [r0, r1) -> loaded array
        return w_ref[r0:r1, :]

    def prow(r, width=HIDDEN):       # one packed parameter row -> (1, width)
        return p_ref[r:r + 1, :width]

    x2 = x_ref[...].reshape(mx, H)               # (bb*Sx, H)
    y2 = y_ref[...].reshape(bb * sy, H)          # (bb*Sy, H)

    # hoisted additive mask biases (1.0 = masked key  ->  -1e9 score bias)
    neg_x = xm_ref[...] * NEG                    # (bb, 1, Sx)
    neg_y = ym_ref[...] * NEG                    # (bb, 1, Sy)

    # ---------------- mhatt1: gated self-attention over x -------------------
    vkq = _mm(x2, wrows(0, 3 * H), ((1,), (1,)))               # fused V/K/Q (mx, 3H)
    v1 = vkq[:, 0:H] + prow(ROW_B_ATTN + 0)
    k1 = vkq[:, H:2 * H] + prow(ROW_B_ATTN + 1)
    q1 = vkq[:, 2 * H:3 * H] + prow(ROW_B_ATTN + 2)

    # selection threshold = Linear_{H->1}(q * k), kept in f32 (hard-gate compare)
    thr = jnp.sum((q1 * k1) * prow(ROW_W_THR), axis=-1, keepdims=True) \
        + p_ref[ROW_B_THR:ROW_B_THR + 1, 0:1]                  # (mx, 1)

    merged1, p_acc = _mha_heads(q1, k1, v1, neg_x, bb, sx, sx,
                                wrows(3 * H, 4 * H), accumulate_p=True)
    # attention mass received by each key position, summed over heads+queries
    key_col = jnp.sum(jnp.swapaxes(p_acc, 1, 2), axis=-1, keepdims=True)   # (bb, Sx, 1)
    gate = ((key_col - thr.reshape(bb, sx, 1)) > 0.0).astype(jnp.float32)  # f32 gate
    atted1 = gate * merged1.reshape(bb, sx, H) + prow(ROW_B_ATTN + 3)
    x2 = _layernorm(x2 + atted1.reshape(mx, H),
                    prow(ROW_LN_G + 0), prow(ROW_LN_B + 0))

    # ---------------- mhatt2: cross-attention (x attends over y) ------------
    vk2 = _mm(y2, wrows(4 * H, 6 * H), ((1,), (1,)))           # fused V/K (bb*Sy, 2H)
    v2 = vk2[:, 0:H] + prow(ROW_B_ATTN + 4)
    k2 = vk2[:, H:2 * H] + prow(ROW_B_ATTN + 5)
    q2 = _mm(x2, wrows(6 * H, 7 * H), ((1,), (1,))) + prow(ROW_B_ATTN + 6)

    merged2, _ = _mha_heads(q2, k2, v2, neg_y, bb, sx, sy,
                            wrows(7 * H, 8 * H), accumulate_p=False)
    atted2 = merged2 + prow(ROW_B_ATTN + 7)
    x2 = _layernorm(x2 + atted2, prow(ROW_LN_G + 1), prow(ROW_LN_B + 1))

    # ---------------------------------- FFN ---------------------------------
    h1 = jnp.maximum(
        _mm(x2, wrows(8 * H, 8 * H + FF), ((1,), (1,))) + prow(ROW_B_FF1, FF), 0.0)
    f = _mm(h1, wrows(8 * H + FF, 8 * H + 2 * FF), ((1,), (0,))) + prow(ROW_B_FF2)
    x2 = _layernorm(x2 + f, prow(ROW_LN_G + 2), prow(ROW_LN_B + 2))

    out_ref[...] = x2.reshape(bb, sx, H)          # single full-block store


# ------------------------------ host wrapper ---------------------------------
def _pack_params(params):
    H = HIDDEN
    w_all = jnp.concatenate([
        params["w_attn"].reshape(8 * H, H),       # 8 attention Linears (out,in)
        params["w_ff1"],                          # (FF, H)  (out,in)
        params["w_ff2"].T,                        # (FF, H)  (in,out)
    ], axis=0).astype(jnp.float32)

    def pad(a):
        return jnp.pad(a, ((0, 0), (0, FF - a.shape[-1])))

    p_all = jnp.concatenate([
        pad(params["b_attn"]),                    # rows 0..7
        pad(params["w_thr"]),                     # row 8
        pad(params["b_thr"]),                     # row 9
        params["b_ff1"],                          # row 10
        pad(params["b_ff2"]),                     # row 11
        pad(params["ln_g"]),                      # rows 12..14
        pad(params["ln_b"]),                      # rows 15..17
    ], axis=0).astype(jnp.float32)
    return w_all, p_all


def selres_ga(x, y, x_mask, y_mask, params, bb=None):
    B, Sx, H = x.shape
    Sy = y.shape[1]
    assert H == HIDDEN
    bb = B if bb is None else bb
    assert B % bb == 0, "batch must be divisible by the per-step batch chunk"

    w_all, p_all = _pack_params(params)

    return pl.pallas_call(
        selres_ga_kernel,
        grid=(B // bb,),
        in_specs=[
            pl.BlockSpec((bb, Sx, H), lambda i: (i, 0, 0)),      # x
            pl.BlockSpec((bb, Sy, H), lambda i: (i, 0, 0)),      # y
            pl.BlockSpec((bb, 1, Sx), lambda i: (i, 0, 0)),      # x_mask
            pl.BlockSpec((bb, 1, Sy), lambda i: (i, 0, 0)),      # y_mask
            pl.BlockSpec(w_all.shape, lambda i: (0, 0)),         # packed weights
            pl.BlockSpec(p_all.shape, lambda i: (0, 0)),         # packed small params
        ],
        out_specs=pl.BlockSpec((bb, Sx, H), lambda i: (i, 0, 0)),
        out_shape=jax.ShapeDtypeStruct((B, Sx, H), jnp.float32),
        compiler_params=pltpu.CompilerParams(
            # batch-chunk axis is fully independent -> shard across TCs on v7x
            dimension_semantics=("parallel",),
        ),
    )(x, y, x_mask, y_mask, w_all, p_all)


# --------------------------- pure-JAX reference ------------------------------
def reference(x, y, x_mask, y_mask, p, mm_dtype=jnp.float32):
    """Reference forward.  mm_dtype controls the matmul-operand precision so the
    same function provides both a float32 ground truth and a bf16-operand
    'emulated' reference that matches the kernel's MXU precision."""
    hi = jax.lax.Precision.HIGHEST
    c = lambda t: t.astype(mm_dtype)

    def linear(t, w, b):
        return jnp.einsum('bsi,oi->bso', c(t), c(w), precision=hi,
                          preferred_element_type=jnp.float32) + b

    def layernorm(t, g, bt):
        mean = t.mean(-1, keepdims=True)
        d = t - mean
        var = (d * d).sum(-1, keepdims=True) / (t.shape[-1] - 1)
        return g * d / (jnp.sqrt(var) + EPS) + bt

    def split_heads(t):
        B, S, H = t.shape
        return t.reshape(B, S, HEADS, DH).transpose(0, 2, 1, 3)

    def merge_heads(t):
        B, nH, S, Dh = t.shape
        return t.transpose(0, 2, 1, 3).reshape(B, S, nH * Dh)

    def att(q4, k4, mask4):
        s = jnp.einsum('bhqd,bhkd->bhqk', c(q4), c(k4), precision=hi,
                       preferred_element_type=jnp.float32) / math.sqrt(DH)
        s = jnp.where(mask4, NEG, s)
        return jax.nn.softmax(s, axis=-1)

    def pv(p4, v4):
        return jnp.einsum('bhqk,bhkd->bhqd', c(p4), c(v4), precision=hi,
                          preferred_element_type=jnp.float32)

    W, b = p["w_attn"], p["b_attn"]
    xm4 = (x_mask > 0.5)[:, None, :, :]   # (B,1,1,Sx)
    ym4 = (y_mask > 0.5)[:, None, :, :]

    # mhatt1 (selective)
    v1 = linear(x, W[0], b[0]); k1 = linear(x, W[1], b[1]); q1 = linear(x, W[2], b[2])
    thr = jnp.einsum('bsi,oi->bso', q1 * k1, p["w_thr"], precision=hi,
                     preferred_element_type=jnp.float32) + p["b_thr"][0, 0]
    am = att(split_heads(q1), split_heads(k1), xm4)            # (B,nH,Sq,Sk)
    a = (am.sum(-2).sum(-2)[..., None] - thr) > 0              # (B,Sx,1)
    atted = merge_heads(pv(am, split_heads(v1))) * a.astype(jnp.float32)
    atted = linear(atted, W[3], b[3])
    xx = layernorm(x + atted, p["ln_g"][0], p["ln_b"][0])

    # mhatt2 (cross)
    v2 = linear(y, W[4], b[4]); k2 = linear(y, W[5], b[5]); q2 = linear(xx, W[6], b[6])
    am2 = att(split_heads(q2), split_heads(k2), ym4)
    atted2 = linear(merge_heads(pv(am2, split_heads(v2))), W[7], b[7])
    xx = layernorm(xx + atted2, p["ln_g"][1], p["ln_b"][1])

    # ffn
    h = jax.nn.relu(jnp.einsum('bsi,oi->bso', c(xx), c(p["w_ff1"]), precision=hi,
                               preferred_element_type=jnp.float32) + p["b_ff1"][0])
    f = jnp.einsum('bsi,oi->bso', c(h), c(p["w_ff2"]), precision=hi,
                   preferred_element_type=jnp.float32) + p["b_ff2"][0]
    return layernorm(xx + f, p["ln_g"][2], p["ln_b"][2])


# ----------------------------------- main ------------------------------------
if __name__ == "__main__":
    key = jax.random.PRNGKey(0)
    ks = jax.random.split(key, 12)

    B = 2
    x = jax.random.normal(ks[0], (B, SEQ_X, HIDDEN), jnp.float32)
    y = jax.random.normal(ks[1], (B, SEQ_Y, HIDDEN), jnp.float32)

    # masks: 1.0 -> masked key position
    x_mask = jnp.zeros((B, 1, SEQ_X), jnp.float32).at[1, 0, -2:].set(1.0)
    y_mask = jnp.zeros((B, 1, SEQ_Y), jnp.float32).at[0, 0, -1:].set(1.0)

    scale = 0.1
    params = {
        "w_attn": scale * jax.random.normal(ks[2], (8, HIDDEN, HIDDEN), jnp.float32),
        "b_attn": scale * jax.random.normal(ks[3], (8, HIDDEN), jnp.float32),
        # small threshold weights + bias of 2.0 so the selection gate is
        # exercised on both branches without sitting on the decision boundary
        "w_thr": 0.01 * jax.random.normal(ks[4], (1, HIDDEN), jnp.float32),
        "b_thr": jnp.full((1, 1), 2.0, jnp.float32),
        "w_ff1": scale * jax.random.normal(ks[5], (FF, HIDDEN), jnp.float32),
        "b_ff1": scale * jax.random.normal(ks[6], (1, FF), jnp.float32),
        "w_ff2": scale * jax.random.normal(ks[7], (HIDDEN, FF), jnp.float32),
        "b_ff2": scale * jax.random.normal(ks[8], (1, HIDDEN), jnp.float32),
        "ln_g": jnp.ones((3, HIDDEN), jnp.float32),
        "ln_b": jnp.zeros((3, HIDDEN), jnp.float32),
    }

    out = jax.block_until_ready(selres_ga(x, y, x_mask, y_mask, params))
    # precision-matched reference (bf16 matmul operands, like the kernel's MXU)
    ref_emul = jax.block_until_ready(reference(x, y, x_mask, y_mask, params, MM_DTYPE))
    # full-f32 ground truth
    ref_f32 = jax.block_until_ready(reference(x, y, x_mask, y_mask, params, jnp.float32))

    assert out.shape == (B, SEQ_X, HIDDEN)
    assert jnp.all(jnp.isfinite(out))
    err_emul = float(jnp.max(jnp.abs(out - ref_emul)))
    err_f32 = float(jnp.max(jnp.abs(out - ref_f32)))
    # tight check against the precision-matched reference (catches logic bugs)
    assert jnp.allclose(out, ref_emul, rtol=5e-3, atol=5e-3), \
        f"emulated-reference max abs err {err_emul}"
    # loose check against the f32 reference (catches precision blow-ups)
    assert jnp.allclose(out, ref_f32, rtol=3e-2, atol=3e-2), \
        f"f32-reference max abs err {err_f32}"

    print("KERNEL_OK")
</pallas_src>

<mosaic_0001>
module attributes {stable_mosaic.version = 11 : i64} {
  func.func @selres_ga_kernel(%arg0: i32, %arg1: memref<2x8x32xf32, #tpu.memory_space<vmem>>, %arg2: memref<2x8x32xf32, #tpu.memory_space<vmem>>, %arg3: memref<2x1x8xf32, #tpu.memory_space<vmem>>, %arg4: memref<2x1x8xf32, #tpu.memory_space<vmem>>, %arg5: memref<384x32xf32, #tpu.memory_space<vmem>>, %arg6: memref<18x64xf32, #tpu.memory_space<vmem>>, %arg7: memref<2x8x32xf32, #tpu.memory_space<vmem>>) attributes {dimension_semantics = [#tpu.dimension_semantics<parallel>], iteration_bounds = array<i64: 1>, scalar_prefetch = 0 : i64, scratch_operands = 0 : i64, tpu.core_type = #tpu.core_type<tc>, window_params = [{transform_indices = @transform_0, window_bounds = array<i64: 2, 8, 32>}, {transform_indices = @transform_1, window_bounds = array<i64: 2, 8, 32>}, {transform_indices = @transform_2, window_bounds = array<i64: 2, 1, 8>}, {transform_indices = @transform_3, window_bounds = array<i64: 2, 1, 8>}, {pipeline_mode = #tpu.pipeline_mode<synchronous>, transform_indices = @transform_4, window_bounds = array<i64: 384, 32>}, {pipeline_mode = #tpu.pipeline_mode<synchronous>, transform_indices = @transform_5, window_bounds = array<i64: 18, 64>}, {transform_indices = @transform_6, window_bounds = array<i64: 2, 8, 32>}]} {
    %c0 = arith.constant 0 : index
    %c0_0 = arith.constant 0 : index
    %c0_1 = arith.constant 0 : index
    %0 = vector.load %arg1[%c0, %c0_0, %c0_1] : memref<2x8x32xf32, #tpu.memory_space<vmem>>, vector<2x8x32xf32>
    %1 = vector.shape_cast %0 : vector<2x8x32xf32> to vector<16x32xf32>
    %c0_2 = arith.constant 0 : index
    %c0_3 = arith.constant 0 : index
    %c0_4 = arith.constant 0 : index
    %2 = vector.load %arg2[%c0_2, %c0_3, %c0_4] : memref<2x8x32xf32, #tpu.memory_space<vmem>>, vector<2x8x32xf32>
    %3 = vector.shape_cast %2 : vector<2x8x32xf32> to vector<16x32xf32>
    %c0_5 = arith.constant 0 : index
    %c0_6 = arith.constant 0 : index
    %c0_7 = arith.constant 0 : index
    %4 = vector.load %arg3[%c0_5, %c0_6, %c0_7] : memref<2x1x8xf32, #tpu.memory_space<vmem>>, vector<2x1x8xf32>
    %cst = arith.constant -1.000000e+09 : f32
    %5 = vector.broadcast %cst : f32 to vector<2x1x8xf32>
    %6 = arith.mulf %4, %5 : vector<2x1x8xf32>
    %c0_8 = arith.constant 0 : index
    %c0_9 = arith.constant 0 : index
    %c0_10 = arith.constant 0 : index
    %7 = vector.load %arg4[%c0_8, %c0_9, %c0_10] : memref<2x1x8xf32, #tpu.memory_space<vmem>>, vector<2x1x8xf32>
    %cst_11 = arith.constant -1.000000e+09 : f32
    %8 = vector.broadcast %cst_11 : f32 to vector<2x1x8xf32>
    %9 = arith.mulf %7, %8 : vector<2x1x8xf32>
    %c0_12 = arith.constant 0 : index
    %c0_13 = arith.constant 0 : index
    %10 = vector.load %arg5[%c0_12, %c0_13] : memref<384x32xf32, #tpu.memory_space<vmem>>, vector<96x32xf32>
    %11 = arith.truncf %1 : vector<16x32xf32> to vector<16x32xbf16>
    %12 = arith.truncf %10 : vector<96x32xf32> to vector<96x32xbf16>
    %cst_14 = arith.constant dense<0.000000e+00> : vector<16x96xf32>
    %13 = tpu.matmul %11, %12, %cst_14 {dimension_numbers = #tpu.dot_dimension_numbers<[1], [1], [0], [0], [0, 0, 1, 0], [], []>} : vector<16x32xbf16>, vector<96x32xbf16>, vector<16x96xf32> -> vector<16x96xf32>
    %14 = vector.extract_strided_slice %13 {offsets = [0, 0], sizes = [16, 32], strides = [1, 1]} : vector<16x96xf32> to vector<16x32xf32>
    %c0_15 = arith.constant 0 : index
    %c0_16 = arith.constant 0 : index
    %15 = vector.load %arg6[%c0_15, %c0_16] : memref<18x64xf32, #tpu.memory_space<vmem>>, vector<1x32xf32>
    %16 = vector.broadcast %15 : vector<1x32xf32> to vector<16x32xf32>
    %17 = arith.addf %14, %16 : vector<16x32xf32>
    %18 = vector.extract_strided_slice %13 {offsets = [0, 32], sizes = [16, 32], strides = [1, 1]} : vector<16x96xf32> to vector<16x32xf32>
    %c1 = arith.constant 1 : index
    %c0_17 = arith.constant 0 : index
    %19 = vector.load %arg6[%c1, %c0_17] : memref<18x64xf32, #tpu.memory_space<vmem>>, vector<1x32xf32>
    %20 = vector.broadcast %19 : vector<1x32xf32> to vector<16x32xf32>
    %21 = arith.addf %18, %20 : vector<16x32xf32>
    %22 = vector.extract_strided_slice %13 {offsets = [0, 64], sizes = [16, 32], strides = [1, 1]} : vector<16x96xf32> to vector<16x32xf32>
    %c2 = arith.constant 2 : index
    %c0_18 = arith.constant 0 : index
    %23 = vector.load %arg6[%c2, %c0_18] : memref<18x64xf32, #tpu.memory_space<vmem>>, vector<1x32xf32>
    %24 = vector.broadcast %23 : vector<1x32xf32> to vector<16x32xf32>
    %25 = arith.addf %22, %24 : vector<16x32xf32>
    %26 = arith.mulf %25, %21 : vector<16x32xf32>
    %c8 = arith.constant 8 : index
    %c0_19 = arith.constant 0 : index
    %27 = vector.load %arg6[%c8, %c0_19] : memref<18x64xf32, #tpu.memory_space<vmem>>, vector<1x32xf32>
    %28 = vector.broadcast %27 : vector<1x32xf32> to vector<16x32xf32>
    %29 = arith.mulf %26, %28 : vector<16x32xf32>
    %cst_20 = arith.constant dense<0.000000e+00> : vector<16xf32>
    %30 = vector.multi_reduction <add>, %29, %cst_20 [1] : vector<16x32xf32> to vector<16xf32>
    %31 = vector.shape_cast %30 : vector<16xf32> to vector<16x1xf32>
    %c9 = arith.constant 9 : index
    %c0_21 = arith.constant 0 : index
    %32 = vector.load %arg6[%c9, %c0_21] : memref<18x64xf32, #tpu.memory_space<vmem>>, vector<1x1xf32>
    %33 = vector.broadcast %32 : vector<1x1xf32> to vector<16x1xf32>
    %34 = arith.addf %31, %33 : vector<16x1xf32>
    %c96 = arith.constant 96 : index
    %c0_22 = arith.constant 0 : index
    %35 = vector.load %arg5[%c96, %c0_22] : memref<384x32xf32, #tpu.memory_space<vmem>>, vector<32x32xf32>
    %cst_23 = arith.constant 0.000000e+00 : f32
    %36 = vector.broadcast %cst_23 : f32 to vector<16x32xf32>
    %cst_24 = arith.constant 0.000000e+00 : f32
    %37 = vector.broadcast %cst_24 : f32 to vector<2x8x8xf32>
    %38 = vector.extract_strided_slice %25 {offsets = [0, 0], sizes = [16, 8], strides = [1, 1]} : vector<16x32xf32> to vector<16x8xf32>
    %39 = vector.shape_cast %38 : vector<16x8xf32> to vector<2x8x8xf32>
    %40 = vector.extract_strided_slice %21 {offsets = [0, 0], sizes = [16, 8], strides = [1, 1]} : vector<16x32xf32> to vector<16x8xf32>
    %41 = vector.shape_cast %40 : vector<16x8xf32> to vector<2x8x8xf32>
    %42 = vector.extract_strided_slice %17 {offsets = [0, 0], sizes = [16, 8], strides = [1, 1]} : vector<16x32xf32> to vector<16x8xf32>
    %43 = vector.shape_cast %42 : vector<16x8xf32> to vector<2x8x8xf32>
    %44 = arith.truncf %39 : vector<2x8x8xf32> to vector<2x8x8xbf16>
    %45 = arith.truncf %41 : vector<2x8x8xf32> to vector<2x8x8xbf16>
    "tpu.trace_start"() <{level = 10 : i32, message = "bqd,bkd->bqk"}> : () -> ()
    %cst_25 = arith.constant dense<0.000000e+00> : vector<2x8x8xf32>
    %46 = tpu.matmul %44, %45, %cst_25 {dimension_numbers = #tpu.dot_dimension_numbers<[2], [2], [1], [1], [0, 0, 0, 1, 1, 1], [0], [0]>} : vector<2x8x8xbf16>, vector<2x8x8xbf16>, vector<2x8x8xf32> -> vector<2x8x8xf32>
    "tpu.trace_stop"() : () -> ()
    %cst_26 = arith.constant 0.353553385 : f32
    %47 = vector.broadcast %cst_26 : f32 to vector<2x8x8xf32>
    %48 = arith.mulf %46, %47 : vector<2x8x8xf32>
    %49 = vector.broadcast %6 : vector<2x1x8xf32> to vector<2x8x8xf32>
    %50 = arith.addf %48, %49 : vector<2x8x8xf32>
    %cst_27 = arith.constant dense<0xFF800000> : vector<2x8xf32>
    %51 = vector.multi_reduction <maximumf>, %50, %cst_27 [2] : vector<2x8x8xf32> to vector<2x8xf32>
    %52 = vector.shape_cast %51 : vector<2x8xf32> to vector<2x8x1xf32>
    %53 = vector.broadcast %52 : vector<2x8x1xf32> to vector<2x8x8xf32>
    %54 = arith.subf %50, %53 : vector<2x8x8xf32>
    %55 = math.exp %54 : vector<2x8x8xf32>
    %cst_28 = arith.constant dense<0.000000e+00> : vector<2x8xf32>
    %56 = vector.multi_reduction <add>, %55, %cst_28 [2] : vector<2x8x8xf32> to vector<2x8xf32>
    %57 = vector.shape_cast %56 : vector<2x8xf32> to vector<2x8x1xf32>
    %58 = tpu.reciprocal %57 {approx = true} : vector<2x8x1xf32> -> vector<2x8x1xf32>
    %59 = vector.broadcast %58 : vector<2x8x1xf32> to vector<2x8x8xf32>
    %60 = arith.mulf %55, %59 : vector<2x8x8xf32>
    %61 = arith.addf %37, %60 : vector<2x8x8xf32>
    %62 = arith.truncf %60 : vector<2x8x8xf32> to vector<2x8x8xbf16>
    %63 = arith.truncf %43 : vector<2x8x8xf32> to vector<2x8x8xbf16>
    "tpu.trace_start"() <{level = 10 : i32, message = "bqk,bkd->bqd"}> : () -> ()
    %cst_29 = arith.constant dense<0.000000e+00> : vector<2x8x8xf32>
    %64 = tpu.matmul %62, %63, %cst_29 {dimension_numbers = #tpu.dot_dimension_numbers<[2], [1], [1], [2], [0, 0, 0, 1, 1, 2], [0], [0]>} : vector<2x8x8xbf16>, vector<2x8x8xbf16>, vector<2x8x8xf32> -> vector<2x8x8xf32>
    "tpu.trace_stop"() : () -> ()
    %65 = vector.shape_cast %64 : vector<2x8x8xf32> to vector<16x8xf32>
    %66 = vector.extract_strided_slice %35 {offsets = [0, 0], sizes = [32, 8], strides = [1, 1]} : vector<32x32xf32> to vector<32x8xf32>
    %67 = arith.truncf %65 : vector<16x8xf32> to vector<16x8xbf16>
    %68 = arith.truncf %66 : vector<32x8xf32> to vector<32x8xbf16>
    %cst_30 = arith.constant dense<0.000000e+00> : vector<16x32xf32>
    %69 = tpu.matmul %67, %68, %cst_30 {dimension_numbers = #tpu.dot_dimension_numbers<[1], [1], [0], [0], [0, 0, 1, 0], [], []>} : vector<16x8xbf16>, vector<32x8xbf16>, vector<16x32xf32> -> vector<16x32xf32>
    %70 = arith.addf %36, %69 : vector<16x32xf32>
    %71 = vector.extract_strided_slice %25 {offsets = [0, 8], sizes = [16, 8], strides = [1, 1]} : vector<16x32xf32> to vector<16x8xf32>
    %72 = vector.shape_cast %71 : vector<16x8xf32> to vector<2x8x8xf32>
    %73 = vector.extract_strided_slice %21 {offsets = [0, 8], sizes = [16, 8], strides = [1, 1]} : vector<16x32xf32> to vector<16x8xf32>
    %74 = vector.shape_cast %73 : vector<16x8xf32> to vector<2x8x8xf32>
    %75 = vector.extract_strided_slice %17 {offsets = [0, 8], sizes = [16, 8], strides = [1, 1]} : vector<16x32xf32> to vector<16x8xf32>
    %76 = vector.shape_cast %75 : vector<16x8xf32> to vector<2x8x8xf32>
    %77 = arith.truncf %72 : vector<2x8x8xf32> to vector<2x8x8xbf16>
    %78 = arith.truncf %74 : vector<2x8x8xf32> to vector<2x8x8xbf16>
    "tpu.trace_start"() <{level = 10 : i32, message = "bqd,bkd->bqk"}> : () -> ()
    %cst_31 = arith.constant dense<0.000000e+00> : vector<2x8x8xf32>
    %79 = tpu.matmul %77, %78, %cst_31 {dimension_numbers = #tpu.dot_dimension_numbers<[2], [2], [1], [1], [0, 0, 0, 1, 1, 1], [0], [0]>} : vector<2x8x8xbf16>, vector<2x8x8xbf16>, vector<2x8x8xf32> -> vector<2x8x8xf32>
    "tpu.trace_stop"() : () -> ()
    %cst_32 = arith.constant 0.353553385 : f32
    %80 = vector.broadcast %cst_32 : f32 to vector<2x8x8xf32>
    %81 = arith.mulf %79, %80 : vector<2x8x8xf32>
    %82 = vector.broadcast %6 : vector<2x1x8xf32> to vector<2x8x8xf32>
    %83 = arith.addf %81, %82 : vector<2x8x8xf32>
    %cst_33 = arith.constant dense<0xFF800000> : vector<2x8xf32>
    %84 = vector.multi_reduction <maximumf>, %83, %cst_33 [2] : vector<2x8x8xf32> to vector<2x8xf32>
    %85 = vector.shape_cast %84 : vector<2x8xf32> to vector<2x8x1xf32>
    %86 = vector.broadcast %85 : vector<2x8x1xf32> to vector<2x8x8xf32>
    %87 = arith.subf %83, %86 : vector<2x8x8xf32>
    %88 = math.exp %87 : vector<2x8x8xf32>
    %cst_34 = arith.constant dense<0.000000e+00> : vector<2x8xf32>
    %89 = vector.multi_reduction <add>, %88, %cst_34 [2] : vector<2x8x8xf32> to vector<2x8xf32>
    %90 = vector.shape_cast %89 : vector<2x8xf32> to vector<2x8x1xf32>
    %91 = tpu.reciprocal %90 {approx = true} : vector<2x8x1xf32> -> vector<2x8x1xf32>
    %92 = vector.broadcast %91 : vector<2x8x1xf32> to vector<2x8x8xf32>
    %93 = arith.mulf %88, %92 : vector<2x8x8xf32>
    %94 = arith.addf %61, %93 : vector<2x8x8xf32>
    %95 = arith.truncf %93 : vector<2x8x8xf32> to vector<2x8x8xbf16>
    %96 = arith.truncf %76 : vector<2x8x8xf32> to vector<2x8x8xbf16>
    "tpu.trace_start"() <{level = 10 : i32, message = "bqk,bkd->bqd"}> : () -> ()
    %cst_35 = arith.constant dense<0.000000e+00> : vector<2x8x8xf32>
    %97 = tpu.matmul %95, %96, %cst_35 {dimension_numbers = #tpu.dot_dimension_numbers<[2], [1], [1], [2], [0, 0, 0, 1, 1, 2], [0], [0]>} : vector<2x8x8xbf16>, vector<2x8x8xbf16>, vector<2x8x8xf32> -> vector<2x8x8xf32>
    "tpu.trace_stop"() : () -> ()
    %98 = vector.shape_cast %97 : vector<2x8x8xf32> to vector<16x8xf32>
    %99 = vector.extract_strided_slice %35 {offsets = [0, 8], sizes = [32, 8], strides = [1, 1]} : vector<32x32xf32> to vector<32x8xf32>
    %100 = arith.truncf %98 : vector<16x8xf32> to vector<16x8xbf16>
    %101 = arith.truncf %99 : vector<32x8xf32> to vector<32x8xbf16>
    %cst_36 = arith.constant dense<0.000000e+00> : vector<16x32xf32>
    %102 = tpu.matmul %100, %101, %cst_36 {dimension_numbers = #tpu.dot_dimension_numbers<[1], [1], [0], [0], [0, 0, 1, 0], [], []>} : vector<16x8xbf16>, vector<32x8xbf16>, vector<16x32xf32> -> vector<16x32xf32>
    %103 = arith.addf %70, %102 : vector<16x32xf32>
    %104 = vector.extract_strided_slice %25 {offsets = [0, 16], sizes = [16, 8], strides = [1, 1]} : vector<16x32xf32> to vector<16x8xf32>
    %105 = vector.shape_cast %104 : vector<16x8xf32> to vector<2x8x8xf32>
    %106 = vector.extract_strided_slice %21 {offsets = [0, 16], sizes = [16, 8], strides = [1, 1]} : vector<16x32xf32> to vector<16x8xf32>
    %107 = vector.shape_cast %106 : vector<16x8xf32> to vector<2x8x8xf32>
    %108 = vector.extract_strided_slice %17 {offsets = [0, 16], sizes = [16, 8], strides = [1, 1]} : vector<16x32xf32> to vector<16x8xf32>
    %109 = vector.shape_cast %108 : vector<16x8xf32> to vector<2x8x8xf32>
    %110 = arith.truncf %105 : vector<2x8x8xf32> to vector<2x8x8xbf16>
    %111 = arith.truncf %107 : vector<2x8x8xf32> to vector<2x8x8xbf16>
    "tpu.trace_start"() <{level = 10 : i32, message = "bqd,bkd->bqk"}> : () -> ()
    %cst_37 = arith.constant dense<0.000000e+00> : vector<2x8x8xf32>
    %112 = tpu.matmul %110, %111, %cst_37 {dimension_numbers = #tpu.dot_dimension_numbers<[2], [2], [1], [1], [0, 0, 0, 1, 1, 1], [0], [0]>} : vector<2x8x8xbf16>, vector<2x8x8xbf16>, vector<2x8x8xf32> -> vector<2x8x8xf32>
    "tpu.trace_stop"() : () -> ()
    %cst_38 = arith.constant 0.353553385 : f32
    %113 = vector.broadcast %cst_38 : f32 to vector<2x8x8xf32>
    %114 = arith.mulf %112, %113 : vector<2x8x8xf32>
    %115 = vector.broadcast %6 : vector<2x1x8xf32> to vector<2x8x8xf32>
    %116 = arith.addf %114, %115 : vector<2x8x8xf32>
    %cst_39 = arith.constant dense<0xFF800000> : vector<2x8xf32>
    %117 = vector.multi_reduction <maximumf>, %116, %cst_39 [2] : vector<2x8x8xf32> to vector<2x8xf32>
    %118 = vector.shape_cast %117 : vector<2x8xf32> to vector<2x8x1xf32>
    %119 = vector.broadcast %118 : vector<2x8x1xf32> to vector<2x8x8xf32>
    %120 = arith.subf %116, %119 : vector<2x8x8xf32>
    %121 = math.exp %120 : vector<2x8x8xf32>
    %cst_40 = arith.constant dense<0.000000e+00> : vector<2x8xf32>
    %122 = vector.multi_reduction <add>, %121, %cst_40 [2] : vector<2x8x8xf32> to vector<2x8xf32>
    %123 = vector.shape_cast %122 : vector<2x8xf32> to vector<2x8x1xf32>
    %124 = tpu.reciprocal %123 {approx = true} : vector<2x8x1xf32> -> vector<2x8x1xf32>
    %125 = vector.broadcast %124 : vector<2x8x1xf32> to vector<2x8x8xf32>
    %126 = arith.mulf %121, %125 : vector<2x8x8xf32>
    %127 = arith.addf %94, %126 : vector<2x8x8xf32>
    %128 = arith.truncf %126 : vector<2x8x8xf32> to vector<2x8x8xbf16>
    %129 = arith.truncf %109 : vector<2x8x8xf32> to vector<2x8x8xbf16>
    "tpu.trace_start"() <{level = 10 : i32, message = "bqk,bkd->bqd"}> : () -> ()
    %cst_41 = arith.constant dense<0.000000e+00> : vector<2x8x8xf32>
    %130 = tpu.matmul %128, %129, %cst_41 {dimension_numbers = #tpu.dot_dimension_numbers<[2], [1], [1], [2], [0, 0, 0, 1, 1, 2], [0], [0]>} : vector<2x8x8xbf16>, vector<2x8x8xbf16>, vector<2x8x8xf32> -> vector<2x8x8xf32>
    "tpu.trace_stop"() : () -> ()
    %131 = vector.shape_cast %130 : vector<2x8x8xf32> to vector<16x8xf32>
    %132 = vector.extract_strided_slice %35 {offsets = [0, 16], sizes = [32, 8], strides = [1, 1]} : vector<32x32xf32> to vector<32x8xf32>
    %133 = arith.truncf %131 : vector<16x8xf32> to vector<16x8xbf16>
    %134 = arith.truncf %132 : vector<32x8xf32> to vector<32x8xbf16>
    %cst_42 = arith.constant dense<0.000000e+00> : vector<16x32xf32>
    %135 = tpu.matmul %133, %134, %cst_42 {dimension_numbers = #tpu.dot_dimension_numbers<[1], [1], [0], [0], [0, 0, 1, 0], [], []>} : vector<16x8xbf16>, vector<32x8xbf16>, vector<16x32xf32> -> vector<16x32xf32>
    %136 = arith.addf %103, %135 : vector<16x32xf32>
    %137 = vector.extract_strided_slice %25 {offsets = [0, 24], sizes = [16, 8], strides = [1, 1]} : vector<16x32xf32> to vector<16x8xf32>
    %138 = vector.shape_cast %137 : vector<16x8xf32> to vector<2x8x8xf32>
    %139 = vector.extract_strided_slice %21 {offsets = [0, 24], sizes = [16, 8], strides = [1, 1]} : vector<16x32xf32> to vector<16x8xf32>
    %140 = vector.shape_cast %139 : vector<16x8xf32> to vector<2x8x8xf32>
    %141 = vector.extract_strided_slice %17 {offsets = [0, 24], sizes = [16, 8], strides = [1, 1]} : vector<16x32xf32> to vector<16x8xf32>
    %142 = vector.shape_cast %141 : vector<16x8xf32> to vector<2x8x8xf32>
    %143 = arith.truncf %138 : vector<2x8x8xf32> to vector<2x8x8xbf16>
    %144 = arith.truncf %140 : vector<2x8x8xf32> to vector<2x8x8xbf16>
    "tpu.trace_start"() <{level = 10 : i32, message = "bqd,bkd->bqk"}> : () -> ()
    %cst_43 = arith.constant dense<0.000000e+00> : vector<2x8x8xf32>
    %145 = tpu.matmul %143, %144, %cst_43 {dimension_numbers = #tpu.dot_dimension_numbers<[2], [2], [1], [1], [0, 0, 0, 1, 1, 1], [0], [0]>} : vector<2x8x8xbf16>, vector<2x8x8xbf16>, vector<2x8x8xf32> -> vector<2x8x8xf32>
    "tpu.trace_stop"() : () -> ()
    %cst_44 = arith.constant 0.353553385 : f32
    %146 = vector.broadcast %cst_44 : f32 to vector<2x8x8xf32>
    %147 = arith.mulf %145, %146 : vector<2x8x8xf32>
    %148 = vector.broadcast %6 : vector<2x1x8xf32> to vector<2x8x8xf32>
    %149 = arith.addf %147, %148 : vector<2x8x8xf32>
    %cst_45 = arith.constant dense<0xFF800000> : vector<2x8xf32>
    %150 = vector.multi_reduction <maximumf>, %149, %cst_45 [2] : vector<2x8x8xf32> to vector<2x8xf32>
    %151 = vector.shape_cast %150 : vector<2x8xf32> to vector<2x8x1xf32>
    %152 = vector.broadcast %151 : vector<2x8x1xf32> to vector<2x8x8xf32>
    %153 = arith.subf %149, %152 : vector<2x8x8xf32>
    %154 = math.exp %153 : vector<2x8x8xf32>
    %cst_46 = arith.constant dense<0.000000e+00> : vector<2x8xf32>
    %155 = vector.multi_reduction <add>, %154, %cst_46 [2] : vector<2x8x8xf32> to vector<2x8xf32>
    %156 = vector.shape_cast %155 : vector<2x8xf32> to vector<2x8x1xf32>
    %157 = tpu.reciprocal %156 {approx = true} : vector<2x8x1xf32> -> vector<2x8x1xf32>
    %158 = vector.broadcast %157 : vector<2x8x1xf32> to vector<2x8x8xf32>
    %159 = arith.mulf %154, %158 : vector<2x8x8xf32>
    %160 = arith.addf %127, %159 : vector<2x8x8xf32>
    %161 = arith.truncf %159 : vector<2x8x8xf32> to vector<2x8x8xbf16>
    %162 = arith.truncf %142 : vector<2x8x8xf32> to vector<2x8x8xbf16>
    "tpu.trace_start"() <{level = 10 : i32, message = "bqk,bkd->bqd"}> : () -> ()
    %cst_47 = arith.constant dense<0.000000e+00> : vector<2x8x8xf32>
    %163 = tpu.matmul %161, %162, %cst_47 {dimension_numbers = #tpu.dot_dimension_numbers<[2], [1], [1], [2], [0, 0, 0, 1, 1, 2], [0], [0]>} : vector<2x8x8xbf16>, vector<2x8x8xbf16>, vector<2x8x8xf32> -> vector<2x8x8xf32>
    "tpu.trace_stop"() : () -> ()
    %164 = vector.shape_cast %163 : vector<2x8x8xf32> to vector<16x8xf32>
    %165 = vector.extract_strided_slice %35 {offsets = [0, 24], sizes = [32, 8], strides = [1, 1]} : vector<32x32xf32> to vector<32x8xf32>
    %166 = arith.truncf %164 : vector<16x8xf32> to vector<16x8xbf16>
    %167 = arith.truncf %165 : vector<32x8xf32> to vector<32x8xbf16>
    %cst_48 = arith.constant dense<0.000000e+00> : vector<16x32xf32>
    %168 = tpu.matmul %166, %167, %cst_48 {dimension_numbers = #tpu.dot_dimension_numbers<[1], [1], [0], [0], [0, 0, 1, 0], [], []>} : vector<16x8xbf16>, vector<32x8xbf16>, vector<16x32xf32> -> vector<16x32xf32>
    %169 = arith.addf %136, %168 : vector<16x32xf32>
    %170 = tpu.transpose %160, [0, 2, 1] : vector<2x8x8xf32> -> vector<2x8x8xf32>
    %cst_49 = arith.constant dense<0.000000e+00> : vector<2x8xf32>
    %171 = vector.multi_reduction <add>, %170, %cst_49 [2] : vector<2x8x8xf32> to vector<2x8xf32>
    %172 = vector.shape_cast %171 : vector<2x8xf32> to vector<2x8x1xf32>
    %173 = vector.shape_cast %34 : vector<16x1xf32> to vector<2x8x1xf32>
    %174 = arith.subf %172, %173 : vector<2x8x1xf32>
    %cst_50 = arith.constant 0.000000e+00 : f32
    %175 = vector.broadcast %cst_50 : f32 to vector<2x8x1xf32>
    %176 = arith.cmpf ogt, %174, %175 : vector<2x8x1xf32>
    %177 = arith.extui %176 : vector<2x8x1xi1> to vector<2x8x1xi32>
    %178 = arith.sitofp %177 : vector<2x8x1xi32> to vector<2x8x1xf32>
    %179 = vector.shape_cast %169 : vector<16x32xf32> to vector<2x8x32xf32>
    %180 = vector.broadcast %178 : vector<2x8x1xf32> to vector<2x8x32xf32>
    %181 = arith.mulf %180, %179 : vector<2x8x32xf32>
    %c3 = arith.constant 3 : index
    %c0_51 = arith.constant 0 : index
    %182 = vector.load %arg6[%c3, %c0_51] : memref<18x64xf32, #tpu.memory_space<vmem>>, vector<1x32xf32>
    %183 = vector.shape_cast %182 : vector<1x32xf32> to vector<1x1x32xf32>
    %184 = vector.broadcast %183 : vector<1x1x32xf32> to vector<2x8x32xf32>
    %185 = arith.addf %181, %184 : vector<2x8x32xf32>
    %186 = vector.shape_cast %185 : vector<2x8x32xf32> to vector<16x32xf32>
    %187 = arith.addf %1, %186 : vector<16x32xf32>
    %c12 = arith.constant 12 : index
    %c0_52 = arith.constant 0 : index
    %188 = vector.load %arg6[%c12, %c0_52] : memref<18x64xf32, #tpu.memory_space<vmem>>, vector<1x32xf32>
    %c15 = arith.constant 15 : index
    %c0_53 = arith.constant 0 : index
    %189 = vector.load %arg6[%c15, %c0_53] : memref<18x64xf32, #tpu.memory_space<vmem>>, vector<1x32xf32>
    %cst_54 = arith.constant dense<0.000000e+00> : vector<16xf32>
    %190 = vector.multi_reduction <add>, %187, %cst_54 [1] : vector<16x32xf32> to vector<16xf32>
    %191 = vector.shape_cast %190 : vector<16xf32> to vector<16x1xf32>
    %cst_55 = arith.constant 3.200000e+01 : f32
    %192 = vector.broadcast %cst_55 : f32 to vector<16x1xf32>
    %193 = arith.divf %191, %192 : vector<16x1xf32>
    %194 = vector.broadcast %193 : vector<16x1xf32> to vector<16x32xf32>
    %195 = arith.subf %187, %194 : vector<16x32xf32>
    %196 = arith.mulf %195, %195 : vector<16x32xf32>
    %cst_56 = arith.constant dense<0.000000e+00> : vector<16xf32>
    %197 = vector.multi_reduction <add>, %196, %cst_56 [1] : vector<16x32xf32> to vector<16xf32>
    %198 = vector.shape_cast %197 : vector<16xf32> to vector<16x1xf32>
    %cst_57 = arith.constant 0.0322580636 : f32
    %199 = vector.broadcast %cst_57 : f32 to vector<16x1xf32>
    %200 = arith.mulf %198, %199 : vector<16x1xf32>
    %201 = math.sqrt %200 : vector<16x1xf32>
    %cst_58 = arith.constant 9.99999997E-7 : f32
    %202 = vector.broadcast %cst_58 : f32 to vector<16x1xf32>
    %203 = arith.addf %201, %202 : vector<16x1xf32>
    %204 = tpu.reciprocal %203 : vector<16x1xf32> -> vector<16x1xf32>
    %205 = vector.broadcast %204 : vector<16x1xf32> to vector<16x32xf32>
    %206 = arith.mulf %195, %205 : vector<16x32xf32>
    %207 = vector.broadcast %188 : vector<1x32xf32> to vector<16x32xf32>
    %208 = arith.mulf %207, %206 : vector<16x32xf32>
    %209 = vector.broadcast %189 : vector<1x32xf32> to vector<16x32xf32>
    %210 = arith.addf %208, %209 : vector<16x32xf32>
    %c128 = arith.constant 128 : index
    %c0_59 = arith.constant 0 : index
    %211 = vector.load %arg5[%c128, %c0_59] : memref<384x32xf32, #tpu.memory_space<vmem>>, vector<64x32xf32>
    %212 = arith.truncf %3 : vector<16x32xf32> to vector<16x32xbf16>
    %213 = arith.truncf %211 : vector<64x32xf32> to vector<64x32xbf16>
    %cst_60 = arith.constant dense<0.000000e+00> : vector<16x64xf32>
    %214 = tpu.matmul %212, %213, %cst_60 {dimension_numbers = #tpu.dot_dimension_numbers<[1], [1], [0], [0], [0, 0, 1, 0], [], []>} : vector<16x32xbf16>, vector<64x32xbf16>, vector<16x64xf32> -> vector<16x64xf32>
    %215 = vector.extract_strided_slice %214 {offsets = [0, 0], sizes = [16, 32], strides = [1, 1]} : vector<16x64xf32> to vector<16x32xf32>
    %c4 = arith.constant 4 : index
    %c0_61 = arith.constant 0 : index
    %216 = vector.load %arg6[%c4, %c0_61] : memref<18x64xf32, #tpu.memory_space<vmem>>, vector<1x32xf32>
    %217 = vector.broadcast %216 : vector<1x32xf32> to vector<16x32xf32>
    %218 = arith.addf %215, %217 : vector<16x32xf32>
    %219 = vector.extract_strided_slice %214 {offsets = [0, 32], sizes = [16, 32], strides = [1, 1]} : vector<16x64xf32> to vector<16x32xf32>
    %c5 = arith.constant 5 : index
    %c0_62 = arith.constant 0 : index
    %220 = vector.load %arg6[%c5, %c0_62] : memref<18x64xf32, #tpu.memory_space<vmem>>, vector<1x32xf32>
    %221 = vector.broadcast %220 : vector<1x32xf32> to vector<16x32xf32>
    %222 = arith.addf %219, %221 : vector<16x32xf32>
    %c192 = arith.constant 192 : index
    %c0_63 = arith.constant 0 : index
    %223 = vector.load %arg5[%c192, %c0_63] : memref<384x32xf32, #tpu.memory_space<vmem>>, vector<32x32xf32>
    %224 = arith.truncf %210 : vector<16x32xf32> to vector<16x32xbf16>
    %225 = arith.truncf %223 : vector<32x32xf32> to vector<32x32xbf16>
    %cst_64 = arith.constant dense<0.000000e+00> : vector<16x32xf32>
    %226 = tpu.matmul %224, %225, %cst_64 {dimension_numbers = #tpu.dot_dimension_numbers<[1], [1], [0], [0], [0, 0, 1, 0], [], []>} : vector<16x32xbf16>, vector<32x32xbf16>, vector<16x32xf32> -> vector<16x32xf32>
    %c6 = arith.constant 6 : index
    %c0_65 = arith.constant 0 : index
    %227 = vector.load %arg6[%c6, %c0_65] : memref<18x64xf32, #tpu.memory_space<vmem>>, vector<1x32xf32>
    %228 = vector.broadcast %227 : vector<1x32xf32> to vector<16x32xf32>
    %229 = arith.addf %226, %228 : vector<16x32xf32>
    %c224 = arith.constant 224 : index
    %c0_66 = arith.constant 0 : index
    %230 = vector.load %arg5[%c224, %c0_66] : memref<384x32xf32, #tpu.memory_space<vmem>>, vector<32x32xf32>
    %cst_67 = arith.constant 0.000000e+00 : f32
    %231 = vector.broadcast %cst_67 : f32 to vector<16x32xf32>
    %232 = vector.extract_strided_slice %229 {offsets = [0, 0], sizes = [16, 8], strides = [1, 1]} : vector<16x32xf32> to vector<16x8xf32>
    %233 = vector.shape_cast %232 : vector<16x8xf32> to vector<2x8x8xf32>
    %234 = vector.extract_strided_slice %222 {offsets = [0, 0], sizes = [16, 8], strides = [1, 1]} : vector<16x32xf32> to vector<16x8xf32>
    %235 = vector.shape_cast %234 : vector<16x8xf32> to vector<2x8x8xf32>
    %236 = vector.extract_strided_slice %218 {offsets = [0, 0], sizes = [16, 8], strides = [1, 1]} : vector<16x32xf32> to vector<16x8xf32>
    %237 = vector.shape_cast %236 : vector<16x8xf32> to vector<2x8x8xf32>
    %238 = arith.truncf %233 : vector<2x8x8xf32> to vector<2x8x8xbf16>
    %239 = arith.truncf %235 : vector<2x8x8xf32> to vector<2x8x8xbf16>
    "tpu.trace_start"() <{level = 10 : i32, message = "bqd,bkd->bqk"}> : () -> ()
    %cst_68 = arith.constant dense<0.000000e+00> : vector<2x8x8xf32>
    %240 = tpu.matmul %238, %239, %cst_68 {dimension_numbers = #tpu.dot_dimension_numbers<[2], [2], [1], [1], [0, 0, 0, 1, 1, 1], [0], [0]>} : vector<2x8x8xbf16>, vector<2x8x8xbf16>, vector<2x8x8xf32> -> vector<2x8x8xf32>
    "tpu.trace_stop"() : () -> ()
    %cst_69 = arith.constant 0.353553385 : f32
    %241 = vector.broadcast %cst_69 : f32 to vector<2x8x8xf32>
    %242 = arith.mulf %240, %241 : vector<2x8x8xf32>
    %243 = vector.broadcast %9 : vector<2x1x8xf32> to vector<2x8x8xf32>
    %244 = arith.addf %242, %243 : vector<2x8x8xf32>
    %cst_70 = arith.constant dense<0xFF800000> : vector<2x8xf32>
    %245 = vector.multi_reduction <maximumf>, %244, %cst_70 [2] : vector<2x8x8xf32> to vector<2x8xf32>
    %246 = vector.shape_cast %245 : vector<2x8xf32> to vector<2x8x1xf32>
    %247 = vector.broadcast %246 : vector<2x8x1xf32> to vector<2x8x8xf32>
    %248 = arith.subf %244, %247 : vector<2x8x8xf32>
    %249 = math.exp %248 : vector<2x8x8xf32>
    %cst_71 = arith.constant dense<0.000000e+00> : vector<2x8xf32>
    %250 = vector.multi_reduction <add>, %249, %cst_71 [2] : vector<2x8x8xf32> to vector<2x8xf32>
    %251 = vector.shape_cast %250 : vector<2x8xf32> to vector<2x8x1xf32>
    %252 = tpu.reciprocal %251 {approx = true} : vector<2x8x1xf32> -> vector<2x8x1xf32>
    %253 = vector.broadcast %252 : vector<2x8x1xf32> to vector<2x8x8xf32>
    %254 = arith.mulf %249, %253 : vector<2x8x8xf32>
    %255 = arith.truncf %254 : vector<2x8x8xf32> to vector<2x8x8xbf16>
    %256 = arith.truncf %237 : vector<2x8x8xf32> to vector<2x8x8xbf16>
    "tpu.trace_start"() <{level = 10 : i32, message = "bqk,bkd->bqd"}> : () -> ()
    %cst_72 = arith.constant dense<0.000000e+00> : vector<2x8x8xf32>
    %257 = tpu.matmul %255, %256, %cst_72 {dimension_numbers = #tpu.dot_dimension_numbers<[2], [1], [1], [2], [0, 0, 0, 1, 1, 2], [0], [0]>} : vector<2x8x8xbf16>, vector<2x8x8xbf16>, vector<2x8x8xf32> -> vector<2x8x8xf32>
    "tpu.trace_stop"() : () -> ()
    %258 = vector.shape_cast %257 : vector<2x8x8xf32> to vector<16x8xf32>
    %259 = vector.extract_strided_slice %230 {offsets = [0, 0], sizes = [32, 8], strides = [1, 1]} : vector<32x32xf32> to vector<32x8xf32>
    %260 = arith.truncf %258 : vector<16x8xf32> to vector<16x8xbf16>
    %261 = arith.truncf %259 : vector<32x8xf32> to vector<32x8xbf16>
    %cst_73 = arith.constant dense<0.000000e+00> : vector<16x32xf32>
    %262 = tpu.matmul %260, %261, %cst_73 {dimension_numbers = #tpu.dot_dimension_numbers<[1], [1], [0], [0], [0, 0, 1, 0], [], []>} : vector<16x8xbf16>, vector<32x8xbf16>, vector<16x32xf32> -> vector<16x32xf32>
    %263 = arith.addf %231, %262 : vector<16x32xf32>
    %264 = vector.extract_strided_slice %229 {offsets = [0, 8], sizes = [16, 8], strides = [1, 1]} : vector<16x32xf32> to vector<16x8xf32>
    %265 = vector.shape_cast %264 : vector<16x8xf32> to vector<2x8x8xf32>
    %266 = vector.extract_strided_slice %222 {offsets = [0, 8], sizes = [16, 8], strides = [1, 1]} : vector<16x32xf32> to vector<16x8xf32>
    %267 = vector.shape_cast %266 : vector<16x8xf32> to vector<2x8x8xf32>
    %268 = vector.extract_strided_slice %218 {offsets = [0, 8], sizes = [16, 8], strides = [1, 1]} : vector<16x32xf32> to vector<16x8xf32>
    %269 = vector.shape_cast %268 : vector<16x8xf32> to vector<2x8x8xf32>
    %270 = arith.truncf %265 : vector<2x8x8xf32> to vector<2x8x8xbf16>
    %271 = arith.truncf %267 : vector<2x8x8xf32> to vector<2x8x8xbf16>
    "tpu.trace_start"() <{level = 10 : i32, message = "bqd,bkd->bqk"}> : () -> ()
    %cst_74 = arith.constant dense<0.000000e+00> : vector<2x8x8xf32>
    %272 = tpu.matmul %270, %271, %cst_74 {dimension_numbers = #tpu.dot_dimension_numbers<[2], [2], [1], [1], [0, 0, 0, 1, 1, 1], [0], [0]>} : vector<2x8x8xbf16>, vector<2x8x8xbf16>, vector<2x8x8xf32> -> vector<2x8x8xf32>
    "tpu.trace_stop"() : () -> ()
    %cst_75 = arith.constant 0.353553385 : f32
    %273 = vector.broadcast %cst_75 : f32 to vector<2x8x8xf32>
    %274 = arith.mulf %272, %273 : vector<2x8x8xf32>
    %275 = vector.broadcast %9 : vector<2x1x8xf32> to vector<2x8x8xf32>
    %276 = arith.addf %274, %275 : vector<2x8x8xf32>
    %cst_76 = arith.constant dense<0xFF800000> : vector<2x8xf32>
    %277 = vector.multi_reduction <maximumf>, %276, %cst_76 [2] : vector<2x8x8xf32> to vector<2x8xf32>
    %278 = vector.shape_cast %277 : vector<2x8xf32> to vector<2x8x1xf32>
    %279 = vector.broadcast %278 : vector<2x8x1xf32> to vector<2x8x8xf32>
    %280 = arith.subf %276, %279 : vector<2x8x8xf32>
    %281 = math.exp %280 : vector<2x8x8xf32>
    %cst_77 = arith.constant dense<0.000000e+00> : vector<2x8xf32>
    %282 = vector.multi_reduction <add>, %281, %cst_77 [2] : vector<2x8x8xf32> to vector<2x8xf32>
    %283 = vector.shape_cast %282 : vector<2x8xf32> to vector<2x8x1xf32>
    %284 = tpu.reciprocal %283 {approx = true} : vector<2x8x1xf32> -> vector<2x8x1xf32>
    %285 = vector.broadcast %284 : vector<2x8x1xf32> to vector<2x8x8xf32>
    %286 = arith.mulf %281, %285 : vector<2x8x8xf32>
    %287 = arith.truncf %286 : vector<2x8x8xf32> to vector<2x8x8xbf16>
    %288 = arith.truncf %269 : vector<2x8x8xf32> to vector<2x8x8xbf16>
    "tpu.trace_start"() <{level = 10 : i32, message = "bqk,bkd->bqd"}> : () -> ()
    %cst_78 = arith.constant dense<0.000000e+00> : vector<2x8x8xf32>
    %289 = tpu.matmul %287, %288, %cst_78 {dimension_numbers = #tpu.dot_dimension_numbers<[2], [1], [1], [2], [0, 0, 0, 1, 1, 2], [0], [0]>} : vector<2x8x8xbf16>, vector<2x8x8xbf16>, vector<2x8x8xf32> -> vector<2x8x8xf32>
    "tpu.trace_stop"() : () -> ()
    %290 = vector.shape_cast %289 : vector<2x8x8xf32> to vector<16x8xf32>
    %291 = vector.extract_strided_slice %230 {offsets = [0, 8], sizes = [32, 8], strides = [1, 1]} : vector<32x32xf32> to vector<32x8xf32>
    %292 = arith.truncf %290 : vector<16x8xf32> to vector<16x8xbf16>
    %293 = arith.truncf %291 : vector<32x8xf32> to vector<32x8xbf16>
    %cst_79 = arith.constant dense<0.000000e+00> : vector<16x32xf32>
    %294 = tpu.matmul %292, %293, %cst_79 {dimension_numbers = #tpu.dot_dimension_numbers<[1], [1], [0], [0], [0, 0, 1, 0], [], []>} : vector<16x8xbf16>, vector<32x8xbf16>, vector<16x32xf32> -> vector<16x32xf32>
    %295 = arith.addf %263, %294 : vector<16x32xf32>
    %296 = vector.extract_strided_slice %229 {offsets = [0, 16], sizes = [16, 8], strides = [1, 1]} : vector<16x32xf32> to vector<16x8xf32>
    %297 = vector.shape_cast %296 : vector<16x8xf32> to vector<2x8x8xf32>
    %298 = vector.extract_strided_slice %222 {offsets = [0, 16], sizes = [16, 8], strides = [1, 1]} : vector<16x32xf32> to vector<16x8xf32>
    %299 = vector.shape_cast %298 : vector<16x8xf32> to vector<2x8x8xf32>
    %300 = vector.extract_strided_slice %218 {offsets = [0, 16], sizes = [16, 8], strides = [1, 1]} : vector<16x32xf32> to vector<16x8xf32>
    %301 = vector.shape_cast %300 : vector<16x8xf32> to vector<2x8x8xf32>
    %302 = arith.truncf %297 : vector<2x8x8xf32> to vector<2x8x8xbf16>
    %303 = arith.truncf %299 : vector<2x8x8xf32> to vector<2x8x8xbf16>
    "tpu.trace_start"() <{level = 10 : i32, message = "bqd,bkd->bqk"}> : () -> ()
    %cst_80 = arith.constant dense<0.000000e+00> : vector<2x8x8xf32>
    %304 = tpu.matmul %302, %303, %cst_80 {dimension_numbers = #tpu.dot_dimension_numbers<[2], [2], [1], [1], [0, 0, 0, 1, 1, 1], [0], [0]>} : vector<2x8x8xbf16>, vector<2x8x8xbf16>, vector<2x8x8xf32> -> vector<2x8x8xf32>
    "tpu.trace_stop"() : () -> ()
    %cst_81 = arith.constant 0.353553385 : f32
    %305 = vector.broadcast %cst_81 : f32 to vector<2x8x8xf32>
    %306 = arith.mulf %304, %305 : vector<2x8x8xf32>
    %307 = vector.broadcast %9 : vector<2x1x8xf32> to vector<2x8x8xf32>
    %308 = arith.addf %306, %307 : vector<2x8x8xf32>
    %cst_82 = arith.constant dense<0xFF800000> : vector<2x8xf32>
    %309 = vector.multi_reduction <maximumf>, %308, %cst_82 [2] : vector<2x8x8xf32> to vector<2x8xf32>
    %310 = vector.shape_cast %309 : vector<2x8xf32> to vector<2x8x1xf32>
    %311 = vector.broadcast %310 : vector<2x8x1xf32> to vector<2x8x8xf32>
    %312 = arith.subf %308, %311 : vector<2x8x8xf32>
    %313 = math.exp %312 : vector<2x8x8xf32>
    %cst_83 = arith.constant dense<0.000000e+00> : vector<2x8xf32>
    %314 = vector.multi_reduction <add>, %313, %cst_83 [2] : vector<2x8x8xf32> to vector<2x8xf32>
    %315 = vector.shape_cast %314 : vector<2x8xf32> to vector<2x8x1xf32>
    %316 = tpu.reciprocal %315 {approx = true} : vector<2x8x1xf32> -> vector<2x8x1xf32>
    %317 = vector.broadcast %316 : vector<2x8x1xf32> to vector<2x8x8xf32>
    %318 = arith.mulf %313, %317 : vector<2x8x8xf32>
    %319 = arith.truncf %318 : vector<2x8x8xf32> to vector<2x8x8xbf16>
    %320 = arith.truncf %301 : vector<2x8x8xf32> to vector<2x8x8xbf16>
    "tpu.trace_start"() <{level = 10 : i32, message = "bqk,bkd->bqd"}> : () -> ()
    %cst_84 = arith.constant dense<0.000000e+00> : vector<2x8x8xf32>
    %321 = tpu.matmul %319, %320, %cst_84 {dimension_numbers = #tpu.dot_dimension_numbers<[2], [1], [1], [2], [0, 0, 0, 1, 1, 2], [0], [0]>} : vector<2x8x8xbf16>, vector<2x8x8xbf16>, vector<2x8x8xf32> -> vector<2x8x8xf32>
    "tpu.trace_stop"() : () -> ()
    %322 = vector.shape_cast %321 : vector<2x8x8xf32> to vector<16x8xf32>
    %323 = vector.extract_strided_slice %230 {offsets = [0, 16], sizes = [32, 8], strides = [1, 1]} : vector<32x32xf32> to vector<32x8xf32>
    %324 = arith.truncf %322 : vector<16x8xf32> to vector<16x8xbf16>
    %325 = arith.truncf %323 : vector<32x8xf32> to vector<32x8xbf16>
    %cst_85 = arith.constant dense<0.000000e+00> : vector<16x32xf32>
    %326 = tpu.matmul %324, %325, %cst_85 {dimension_numbers = #tpu.dot_dimension_numbers<[1], [1], [0], [0], [0, 0, 1, 0], [], []>} : vector<16x8xbf16>, vector<32x8xbf16>, vector<16x32xf32> -> vector<16x32xf32>
    %327 = arith.addf %295, %326 : vector<16x32xf32>
    %328 = vector.extract_strided_slice %229 {offsets = [0, 24], sizes = [16, 8], strides = [1, 1]} : vector<16x32xf32> to vector<16x8xf32>
    %329 = vector.shape_cast %328 : vector<16x8xf32> to vector<2x8x8xf32>
    %330 = vector.extract_strided_slice %222 {offsets = [0, 24], sizes = [16, 8], strides = [1, 1]} : vector<16x32xf32> to vector<16x8xf32>
    %331 = vector.shape_cast %330 : vector<16x8xf32> to vector<2x8x8xf32>
    %332 = vector.extract_strided_slice %218 {offsets = [0, 24], sizes = [16, 8], strides = [1, 1]} : vector<16x32xf32> to vector<16x8xf32>
    %333 = vector.shape_cast %332 : vector<16x8xf32> to vector<2x8x8xf32>
    %334 = arith.truncf %329 : vector<2x8x8xf32> to vector<2x8x8xbf16>
    %335 = arith.truncf %331 : vector<2x8x8xf32> to vector<2x8x8xbf16>
    "tpu.trace_start"() <{level = 10 : i32, message = "bqd,bkd->bqk"}> : () -> ()
    %cst_86 = arith.constant dense<0.000000e+00> : vector<2x8x8xf32>
    %336 = tpu.matmul %334, %335, %cst_86 {dimension_numbers = #tpu.dot_dimension_numbers<[2], [2], [1], [1], [0, 0, 0, 1, 1, 1], [0], [0]>} : vector<2x8x8xbf16>, vector<2x8x8xbf16>, vector<2x8x8xf32> -> vector<2x8x8xf32>
    "tpu.trace_stop"() : () -> ()
    %cst_87 = arith.constant 0.353553385 : f32
    %337 = vector.broadcast %cst_87 : f32 to vector<2x8x8xf32>
    %338 = arith.mulf %336, %337 : vector<2x8x8xf32>
    %339 = vector.broadcast %9 : vector<2x1x8xf32> to vector<2x8x8xf32>
    %340 = arith.addf %338, %339 : vector<2x8x8xf32>
    %cst_88 = arith.constant dense<0xFF800000> : vector<2x8xf32>
    %341 = vector.multi_reduction <maximumf>, %340, %cst_88 [2] : vector<2x8x8xf32> to vector<2x8xf32>
    %342 = vector.shape_cast %341 : vector<2x8xf32> to vector<2x8x1xf32>
    %343 = vector.broadcast %342 : vector<2x8x1xf32> to vector<2x8x8xf32>
    %344 = arith.subf %340, %343 : vector<2x8x8xf32>
    %345 = math.exp %344 : vector<2x8x8xf32>
    %cst_89 = arith.constant dense<0.000000e+00> : vector<2x8xf32>
    %346 = vector.multi_reduction <add>, %345, %cst_89 [2] : vector<2x8x8xf32> to vector<2x8xf32>
    %347 = vector.shape_cast %346 : vector<2x8xf32> to vector<2x8x1xf32>
    %348 = tpu.reciprocal %347 {approx = true} : vector<2x8x1xf32> -> vector<2x8x1xf32>
    %349 = vector.broadcast %348 : vector<2x8x1xf32> to vector<2x8x8xf32>
    %350 = arith.mulf %345, %349 : vector<2x8x8xf32>
    %351 = arith.truncf %350 : vector<2x8x8xf32> to vector<2x8x8xbf16>
    %352 = arith.truncf %333 : vector<2x8x8xf32> to vector<2x8x8xbf16>
    "tpu.trace_start"() <{level = 10 : i32, message = "bqk,bkd->bqd"}> : () -> ()
    %cst_90 = arith.constant dense<0.000000e+00> : vector<2x8x8xf32>
    %353 = tpu.matmul %351, %352, %cst_90 {dimension_numbers = #tpu.dot_dimension_numbers<[2], [1], [1], [2], [0, 0, 0, 1, 1, 2], [0], [0]>} : vector<2x8x8xbf16>, vector<2x8x8xbf16>, vector<2x8x8xf32> -> vector<2x8x8xf32>
    "tpu.trace_stop"() : () -> ()
    %354 = vector.shape_cast %353 : vector<2x8x8xf32> to vector<16x8xf32>
    %355 = vector.extract_strided_slice %230 {offsets = [0, 24], sizes = [32, 8], strides = [1, 1]} : vector<32x32xf32> to vector<32x8xf32>
    %356 = arith.truncf %354 : vector<16x8xf32> to vector<16x8xbf16>
    %357 = arith.truncf %355 : vector<32x8xf32> to vector<32x8xbf16>
    %cst_91 = arith.constant dense<0.000000e+00> : vector<16x32xf32>
    %358 = tpu.matmul %356, %357, %cst_91 {dimension_numbers = #tpu.dot_dimension_numbers<[1], [1], [0], [0], [0, 0, 1, 0], [], []>} : vector<16x8xbf16>, vector<32x8xbf16>, vector<16x32xf32> -> vector<16x32xf32>
    %359 = arith.addf %327, %358 : vector<16x32xf32>
    %c7 = arith.constant 7 : index
    %c0_92 = arith.constant 0 : index
    %360 = vector.load %arg6[%c7, %c0_92] : memref<18x64xf32, #tpu.memory_space<vmem>>, vector<1x32xf32>
    %361 = vector.broadcast %360 : vector<1x32xf32> to vector<16x32xf32>
    %362 = arith.addf %359, %361 : vector<16x32xf32>
    %363 = arith.addf %210, %362 : vector<16x32xf32>
    %c13 = arith.constant 13 : index
    %c0_93 = arith.constant 0 : index
    %364 = vector.load %arg6[%c13, %c0_93] : memref<18x64xf32, #tpu.memory_space<vmem>>, vector<1x32xf32>
    %c16 = arith.constant 16 : index
    %c0_94 = arith.constant 0 : index
    %365 = vector.load %arg6[%c16, %c0_94] : memref<18x64xf32, #tpu.memory_space<vmem>>, vector<1x32xf32>
    %cst_95 = arith.constant dense<0.000000e+00> : vector<16xf32>
    %366 = vector.multi_reduction <add>, %363, %cst_95 [1] : vector<16x32xf32> to vector<16xf32>
    %367 = vector.shape_cast %366 : vector<16xf32> to vector<16x1xf32>
    %cst_96 = arith.constant 3.200000e+01 : f32
    %368 = vector.broadcast %cst_96 : f32 to vector<16x1xf32>
    %369 = arith.divf %367, %368 : vector<16x1xf32>
    %370 = vector.broadcast %369 : vector<16x1xf32> to vector<16x32xf32>
    %371 = arith.subf %363, %370 : vector<16x32xf32>
    %372 = arith.mulf %371, %371 : vector<16x32xf32>
    %cst_97 = arith.constant dense<0.000000e+00> : vector<16xf32>
    %373 = vector.multi_reduction <add>, %372, %cst_97 [1] : vector<16x32xf32> to vector<16xf32>
    %374 = vector.shape_cast %373 : vector<16xf32> to vector<16x1xf32>
    %cst_98 = arith.constant 0.0322580636 : f32
    %375 = vector.broadcast %cst_98 : f32 to vector<16x1xf32>
    %376 = arith.mulf %374, %375 : vector<16x1xf32>
    %377 = math.sqrt %376 : vector<16x1xf32>
    %cst_99 = arith.constant 9.99999997E-7 : f32
    %378 = vector.broadcast %cst_99 : f32 to vector<16x1xf32>
    %379 = arith.addf %377, %378 : vector<16x1xf32>
    %380 = tpu.reciprocal %379 : vector<16x1xf32> -> vector<16x1xf32>
    %381 = vector.broadcast %380 : vector<16x1xf32> to vector<16x32xf32>
    %382 = arith.mulf %371, %381 : vector<16x32xf32>
    %383 = vector.broadcast %364 : vector<1x32xf32> to vector<16x32xf32>
    %384 = arith.mulf %383, %382 : vector<16x32xf32>
    %385 = vector.broadcast %365 : vector<1x32xf32> to vector<16x32xf32>
    %386 = arith.addf %384, %385 : vector<16x32xf32>
    %c256 = arith.constant 256 : index
    %c0_100 = arith.constant 0 : index
    %387 = vector.load %arg5[%c256, %c0_100] : memref<384x32xf32, #tpu.memory_space<vmem>>, vector<64x32xf32>
    %388 = arith.truncf %386 : vector<16x32xf32> to vector<16x32xbf16>
    %389 = arith.truncf %387 : vector<64x32xf32> to vector<64x32xbf16>
    %cst_101 = arith.constant dense<0.000000e+00> : vector<16x64xf32>
    %390 = tpu.matmul %388, %389, %cst_101 {dimension_numbers = #tpu.dot_dimension_numbers<[1], [1], [0], [0], [0, 0, 1, 0], [], []>} : vector<16x32xbf16>, vector<64x32xbf16>, vector<16x64xf32> -> vector<16x64xf32>
    %c10 = arith.constant 10 : index
    %c0_102 = arith.constant 0 : index
    %391 = vector.load %arg6[%c10, %c0_102] : memref<18x64xf32, #tpu.memory_space<vmem>>, vector<1x64xf32>
    %392 = vector.broadcast %391 : vector<1x64xf32> to vector<16x64xf32>
    %393 = arith.addf %390, %392 : vector<16x64xf32>
    %cst_103 = arith.constant 0.000000e+00 : f32
    %394 = vector.broadcast %cst_103 : f32 to vector<16x64xf32>
    %395 = arith.maximumf %393, %394 : vector<16x64xf32>
    %c320 = arith.constant 320 : index
    %c0_104 = arith.constant 0 : index
    %396 = vector.load %arg5[%c320, %c0_104] : memref<384x32xf32, #tpu.memory_space<vmem>>, vector<64x32xf32>
    %397 = arith.truncf %395 : vector<16x64xf32> to vector<16x64xbf16>
    %398 = arith.truncf %396 : vector<64x32xf32> to vector<64x32xbf16>
    %cst_105 = arith.constant dense<0.000000e+00> : vector<16x32xf32>
    %399 = tpu.matmul %397, %398, %cst_105 {dimension_numbers = #tpu.dot_dimension_numbers<[1], [0], [0], [1], [0, 0, 1, 1], [], []>} : vector<16x64xbf16>, vector<64x32xbf16>, vector<16x32xf32> -> vector<16x32xf32>
    %c11 = arith.constant 11 : index
    %c0_106 = arith.constant 0 : index
    %400 = vector.load %arg6[%c11, %c0_106] : memref<18x64xf32, #tpu.memory_space<vmem>>, vector<1x32xf32>
    %401 = vector.broadcast %400 : vector<1x32xf32> to vector<16x32xf32>
    %402 = arith.addf %399, %401 : vector<16x32xf32>
    %403 = arith.addf %386, %402 : vector<16x32xf32>
    %c14 = arith.constant 14 : index
    %c0_107 = arith.constant 0 : index
    %404 = vector.load %arg6[%c14, %c0_107] : memref<18x64xf32, #tpu.memory_space<vmem>>, vector<1x32xf32>
    %c17 = arith.constant 17 : index
    %c0_108 = arith.constant 0 : index
    %405 = vector.load %arg6[%c17, %c0_108] : memref<18x64xf32, #tpu.memory_space<vmem>>, vector<1x32xf32>
    %cst_109 = arith.constant dense<0.000000e+00> : vector<16xf32>
    %406 = vector.multi_reduction <add>, %403, %cst_109 [1] : vector<16x32xf32> to vector<16xf32>
    %407 = vector.shape_cast %406 : vector<16xf32> to vector<16x1xf32>
    %cst_110 = arith.constant 3.200000e+01 : f32
    %408 = vector.broadcast %cst_110 : f32 to vector<16x1xf32>
    %409 = arith.divf %407, %408 : vector<16x1xf32>
    %410 = vector.broadcast %409 : vector<16x1xf32> to vector<16x32xf32>
    %411 = arith.subf %403, %410 : vector<16x32xf32>
    %412 = arith.mulf %411, %411 : vector<16x32xf32>
    %cst_111 = arith.constant dense<0.000000e+00> : vector<16xf32>
    %413 = vector.multi_reduction <add>, %412, %cst_111 [1] : vector<16x32xf32> to vector<16xf32>
    %414 = vector.shape_cast %413 : vector<16xf32> to vector<16x1xf32>
    %cst_112 = arith.constant 0.0322580636 : f32
    %415 = vector.broadcast %cst_112 : f32 to vector<16x1xf32>
    %416 = arith.mulf %414, %415 : vector<16x1xf32>
    %417 = math.sqrt %416 : vector<16x1xf32>
    %cst_113 = arith.constant 9.99999997E-7 : f32
    %418 = vector.broadcast %cst_113 : f32 to vector<16x1xf32>
    %419 = arith.addf %417, %418 : vector<16x1xf32>
    %420 = tpu.reciprocal %419 : vector<16x1xf32> -> vector<16x1xf32>
    %421 = vector.broadcast %420 : vector<16x1xf32> to vector<16x32xf32>
    %422 = arith.mulf %411, %421 : vector<16x32xf32>
    %423 = vector.broadcast %404 : vector<1x32xf32> to vector<16x32xf32>
    %424 = arith.mulf %423, %422 : vector<16x32xf32>
    %425 = vector.broadcast %405 : vector<1x32xf32> to vector<16x32xf32>
    %426 = arith.addf %424, %425 : vector<16x32xf32>
    %427 = vector.shape_cast %426 : vector<16x32xf32> to vector<2x8x32xf32>
    %c0_114 = arith.constant 0 : index
    %c0_115 = arith.constant 0 : index
    %c0_116 = arith.constant 0 : index
    %428 = vector.load %arg7[%c0_114, %c0_115, %c0_116] : memref<2x8x32xf32, #tpu.memory_space<vmem>>, vector<2x8x32xf32>
    tpu.vector_store %arg7[%c0_114, %c0_115, %c0_116], %427 {strides = array<i32>} : memref<2x8x32xf32, #tpu.memory_space<vmem>>, vector<2x8x32xf32>,
    return
  }
  func.func @transform_0(%arg0: i32) -> (i32, i32, i32) {
    %c0_i32 = arith.constant 0 : i32
    %c0_i32_0 = arith.constant 0 : i32
    %c0_i32_1 = arith.constant 0 : i32
    return %arg0, %c0_i32, %c0_i32_0 : i32, i32, i32
  }
  func.func @transform_1(%arg0: i32) -> (i32, i32, i32) {
    %c0_i32 = arith.constant 0 : i32
    %c0_i32_0 = arith.constant 0 : i32
    %c0_i32_1 = arith.constant 0 : i32
    return %arg0, %c0_i32, %c0_i32_0 : i32, i32, i32
  }
  func.func @transform_2(%arg0: i32) -> (i32, i32, i32) {
    %c0_i32 = arith.constant 0 : i32
    %c0_i32_0 = arith.constant 0 : i32
    %c0_i32_1 = arith.constant 0 : i32
    return %arg0, %c0_i32, %c0_i32_0 : i32, i32, i32
  }
  func.func @transform_3(%arg0: i32) -> (i32, i32, i32) {
    %c0_i32 = arith.constant 0 : i32
    %c0_i32_0 = arith.constant 0 : i32
    %c0_i32_1 = arith.constant 0 : i32
    return %arg0, %c0_i32, %c0_i32_0 : i32, i32, i32
  }
  func.func @transform_4(%arg0: i32) -> (i32, i32) {
    %c0_i32 = arith.constant 0 : i32
    %c0_i32_0 = arith.constant 0 : i32
    %c0_i32_1 = arith.constant 0 : i32
    return %c0_i32, %c0_i32_0 : i32, i32
  }
  func.func @transform_5(%arg0: i32) -> (i32, i32) {
    %c0_i32 = arith.constant 0 : i32
    %c0_i32_0 = arith.constant 0 : i32
    %c0_i32_1 = arith.constant 0 : i32
    return %c0_i32, %c0_i32_0 : i32, i32
  }
  func.func @transform_6(%arg0: i32) -> (i32, i32, i32) {
    %c0_i32 = arith.constant 0 : i32
    %c0_i32_0 = arith.constant 0 : i32
    %c0_i32_1 = arith.constant 0 : i32
    return %arg0, %c0_i32, %c0_i32_0 : i32, i32, i32
  }
}

</mosaic_0001>

<bundles_post_ra>
// kernel: tpu_custom_call.1
= control target key start
LH: loop header
LB: loop body
LE: loop exit
PB: predicated region body
PF: predicated region fallthrough
CT: control target
= control target key end

     0   :  { %vm56_vm0 = vcmask 261120   ;;  %v3705_v2 = vmov 0.0   ;;  %vm3706_vm1 = vmmov 0   ;;  %s3707_s7 = smov 32   ;;  %s4616_s0 = inlined_call_operand.vmem [shape: f32[2,8,32], index: 0, kind: input, shape index: {}]   ;;  %s4617_s1 = inlined_call_operand.vmem [shape: f32[2,8,32], index: 1, kind: input, shape index: {}]   ;;  %s4618_s2 = inlined_call_operand.vmem [shape: f32[2,1,8], index: 2, kind: input, shape index: {}]   ;;  %s4619_s3 = inlined_call_operand.vmem [shape: f32[2,1,8], index: 3, kind: input, shape index: {}]   ;;  %s4620_s4 = inlined_call_operand.vmem [shape: f32[384,32], index: 4, kind: input, shape index: {}]   ;;  %s4621_s5 = inlined_call_operand.vmem [shape: f32[18,64], index: 5, kind: input, shape index: {}]   ;;  %s4622_s6 = inlined_call_operand.hbm [shape: f32[2,8,32], index: 6, kind: output, shape index: {}]  }
   0x1   :  { %v37_v0 = vld [vmem:[%s4620_s4] sm:$0xff]  ;;  %v38_v1 = vld [vmem:[%s4620_s4 + $0x8] sm:$0xff]  ;;  %3241 = vmatprep.subr.bf16.mxu0 %v3705_v2  ;;  %3253 = vmatprep.mubr.msk.bf16.mxu0 %vm3706_vm1, %v3705_v2  ;;  %v39_v4 = vld [vmem:[%s4620_s4 + $0x10] sm:$0xff] }
   0x2   :  { %v50_v3 = vpack.c.bf16 %v38_v1, %v37_v0  ;;  %v40_v5 = vld [vmem:[%s4620_s4 + $0x18] sm:$0xff]  ;;  %3257 = vmatprep.subr.bf16.mxu1 %v3705_v2  ;;  %3259 = vmatprep.mubr.msk.bf16.mxu1 %vm3706_vm1, %v3705_v2  ;;  %v3065_v7 = vld [vmem:[%s4621_s5 + $0x1] ss:$0 sm:$0xff] }
   0x3   :  { %v51_v8 = vpack.c.bf16 %v40_v5, %v39_v4  ;;  %132 = vrot.lane.b32.xlu0 %v3065_v7, %s3707_s7 }
   0x4   :  { %v61_v6 = vsel %vm56_vm0, %v50_v3, 0 }
   0x5   :  { %3242 = vmatpush3.bf16.xpose.msra.mxu0 %v61_v6 }
   0x6   :  { %3243 = vmatprep.subr.bf16.mxu0 %v3705_v2 }
   0x7   :  { %11 = vsyncpa [#allocation3], 0  ;;  %v3066_v9 = vld [vmem:[%s4621_s5 + $0x2] ss:$0 sm:$0xff]  ;;  %v64_v10 = vsel %vm56_vm0, %v51_v8, 0  ;;  %s3708_s10 = smov 64   ;;  %v307_v55 = vlaneseq }
   0x8   :  { %143 = vrot.lane.b32.xlu0 %v3066_v9, %s3708_s10  ;;  %v41_v11 = vld [vmem:[%s4620_s4 + $0x20] sm:$0xff]  ;;  %v42_v12 = vld [vmem:[%s4620_s4 + $0x28] sm:$0xff]  ;;  %v43_v15 = vld [vmem:[%s4620_s4 + $0x30] sm:$0xff]  ;;  %vm204_vm2 = vcmask 64512   ;;  %vm350_vm3 = vcmask 1043456   ;;  %s3711_s15 = smov 56  }
   0x9   :  { %v52_v13 = vpack.c.bf16 %v42_v12, %v41_v11  ;;  %v44_v16 = vld [vmem:[%s4620_s4 + $0x38] sm:$0xff]  ;;  %v45_v19 = vld [vmem:[%s4620_s4 + $0x40] sm:$0xff]  ;;  %v46_v20 = vld [vmem:[%s4620_s4 + $0x48] sm:$0xff]  ;;  %v308_v56 = vshrl.u32 %v307_v55, 7  ;;  %s3712_s16 = smov 120   ;;  %s3713_s17 = smov 48  }
   0xa   :  { %v53_v17 = vpack.c.bf16 %v44_v16, %v43_v15  ;;  %v54_v21 = vpack.c.bf16 %v46_v20, %v45_v19  ;;  %v47_v23 = vld [vmem:[%s4620_s4 + $0x50] sm:$0xff]  ;;  %v48_v24 = vld [vmem:[%s4620_s4 + $0x58] sm:$0xff]  ;;  %v3822_v27 = vld [vmem:[%s4616_s0] sm:$0xff]  ;;  %s3714_s18 = smov 80   ;;  %s3715_s19 = smov 112   ;;  %vm2944_vm14 = vcmask 523264  }
   0xb   :  { %v67_v14 = vsel %vm56_vm0, %v52_v13, 0  ;;  %v55_v25 = vpack.c.bf16 %v48_v24, %v47_v23  ;;  %v3827_v28 = vld [vmem:[%s4616_s0 + $0x8] sm:$0xff]  ;;  %v3064_v35 = vld [vmem:[%s4621_s5] ss:$0 sm:$0xff]  ;;  %s3709_s0 = smov 96   ;;  %v3890_v59 = vsub.s32 0, %v308_v56 }
   0xc   :  { %v70_v18 = vsel %vm56_vm0, %v53_v17, 0  ;;  %v73_v22 = vsel %vm56_vm0, %v54_v21, 0  ;;  %v49_v29 = vpack.c.bf16 %v3827_v28, %v3822_v27  ;;  %v29_v57 = vld [vmem:[%s4618_s2] sm:$0x1]  ;;  %v30_v62 = vld [vmem:[%s4618_s2 + $0x1] sm:$0x1] }
   0xd   :  { %3244 = vmatpush3.bf16.xpose.msra.mxu0 %v64_v10  ;;  %v76_v26 = vsel %vm56_vm0, %v55_v25, 0  ;;  %v31_v58 = vmul.f32 -1e+09, %v29_v57  ;;  %v32_v5 = vmul.f32 -1e+09, %v30_v62  ;;  %s3710_s2 = smov 88  }
   0xe   :  { %3245 = vmatprep.subr.bf16.mxu0 %v3705_v2  ;;  %s3716_s20 = smov 72   ;;  %s3717_s21 = smov 40  }
   0xf   :  { %v3893_v60 = vrot.slane %v31_v58, %v3890_v59  ;;  %v3901_v7 = vrot.slane %v32_v5, %v3890_v59  ;;  %s3718_s30 = smov 104   ;;  %s3720_s14 = smov [#allocation2]  }
  0x15   :  { %3246 = vmatpush3.bf16.xpose.msra.mxu0 %v67_v14 }
  0x16   :  { %3247 = vmatprep.subr.bf16.mxu0 %v3705_v2 }
  0x1d   :  { %3248 = vmatpush3.bf16.xpose.msra.mxu0 %v70_v18 }
  0x1e   :  { %3249 = vmatprep.subr.bf16.mxu0 %v3705_v2 }
  0x25   :  { %3250 = vmatpush3.bf16.xpose.msra.mxu0 %v73_v22 }
  0x26   :  { %3251 = vmatprep.subr.bf16.mxu0 %v3705_v2 }
  0x2d   :  { %3252 = vmatpush3.bf16.xpose.msra.mxu0 %v76_v26 }
  0x2e   :  { %3293 = vmatprep.subr.bf16.mxu0 %v3705_v2 }
  0x34   :  { %3254 = vmatmul.mubr.msk.bf16.vlgmr.msra.gmra.mrb[0].mxu0 %vm56_vm0, %v49_v29 }
  0x35   :  { %3295 = vmatprep.mubr.msk.bf16.mxu0 %vm3706_vm1, %v3705_v2 }
  0x75   :  { %v133_v30 = vpop.permute.xlu0 %132 }
  0x7a   :  { %v144_v31 = vpop.permute.xlu0 %143 }
 0x107   :  { %v112_v32 = vpop.f32.mrb[0].mxu0 }
 0x108   :  { %v3835_v33 = vadd.f32 %v133_v30, %v112_v32  ;;  %v3255_v34 = vpop.f32.mrb[1].mxu0  ;;  %v3840_v37 = vadd.f32 %v144_v31, %v112_v32  ;;  %v124_v50 = vadd.f32 %v3064_v35, %v112_v32 }
 0x109   :  { %v115_v36 = vpop.f32.mrb[2].mxu0 }
 0x10a   :  { %v3844_v38 = vpack.c.bf16 %v3835_v33, %v3835_v33  ;;  %v3846_v39 = vadd.f32 %v3064_v35, %v115_v36  ;;  %v3256_v40 = vpop.f32.mrb[3].mxu0  ;;  %v3848_v41 = vadd.f32 %v133_v30, %v115_v36  ;;  %v3858_v43 = vpack.c.bf16 %v3840_v37, %v3840_v37 }
 0x10b   :  { %v3860_v44 = vadd.f32 %v144_v31, %v115_v36  ;;  %v3879_v52 = vpack.c.bf16 %v124_v50, %v124_v50 }
 0x10c   :  { %202 = vrot.lane.b32.xlu1 %v3844_v38, %s3709_s0  ;;  %v3854_v42 = vpack.c.bf16 %v3848_v41, %v3848_v41  ;;  %v3915_v30 = vpack.c.bf16 %v3846_v39, %v3846_v39 }
 0x10d   :  { %v3868_v45 = vpack.c.bf16 %v3860_v44, %v3860_v44  ;;  %v352_v54 = vsel %vm350_vm3, %v3879_v52, 0 }
 0x10e   :  { %255 = vrot.lane.b32.xlu0 %v3854_v42, %s3709_s0  ;;  %v398_v34 = vsel %vm350_vm3, %v3915_v30, 0 }
 0x110   :  { %199 = vrot.lane.b32.xlu1 %v3858_v43, %s3708_s10 }
 0x114   :  { %252 = vrot.lane.b32.xlu1 %v3868_v45, %s3708_s10 }
 0x17e   :  { %v203_v46 = vpop.permute.xlu1 %202 }
 0x17f   :  { %v209_v47 = vsel %vm204_vm2, %v203_v46, 0 }
 0x180   :  { %3258 = vmatpush3.bf16.xpose.msra.mxu1 %v209_v47  ;;  %v256_v48 = vpop.permute.xlu0 %255 }
 0x181   :  { %3263 = vmatprep.subr.bf16.mxu1 %v3705_v2  ;;  %v261_v51 = vsel %vm204_vm2, %v256_v48, 0 }
 0x182   :  { %v200_v49 = vpop.permute.xlu1 %199 }
 0x186   :  { %v253_v53 = vpop.permute.xlu1 %252 }
 0x187   :  { %3260 = vmatmul.mubr.msk.bf16.vlgmr.msra.gmra.mrb[0].mxu1 %vm204_vm2, %v200_v49 }
 0x188   :  { %3264 = vmatpush3.bf16.xpose.msra.mxu1 %v261_v51  ;;  %3265 = vmatprep.mubr.msk.bf16.mxu1 %vm3706_vm1, %v3705_v2 }
 0x189   :  { %3269 = vmatprep.subr.bf16.mxu1 %v3705_v2 }
 0x18f   :  { %3266 = vmatmul.mubr.msk.bf16.vlgmr.msra.gmra.mrb[4].mxu1 %vm204_vm2, %v253_v53 }
 0x190   :  { %3270 = vmatpush3.bf16.msra.mxu1 %v352_v54  ;;  %3271 = vmatprep.mubr.msk.bf16.mxu1 %vm3706_vm1, %v3705_v2 }
 0x191   :  { %3275 = vmatprep.subr.bf16.mxu1 %v3705_v2 }
 0x25a   :  { %v245_v61 = vpop.f32.mrb[0].mxu1 }
 0x25b   :  { %v303_v63 = vmul.f32 0.35355338, %v245_v61  ;;  %v3261_v0 = vpop.f32.mrb[1].mxu1 }
 0x25c   :  { %v248_v1 = vpop.f32.mrb[2].mxu1 }
 0x25d   :  { %v3262_v3 = vpop.f32.mrb[3].mxu1  ;;  %v317_v4 = vadd.f32 %v3893_v60, %v303_v63 }
 0x25f   :  { %v319_v6 = vsel %vm204_vm2, %v317_v4, -inf }
 0x260   :  { %320 = vmax.xlane.f32.xlu0 %v319_v6 }
 0x262   :  { %v297_v8 = vpop.f32.mrb[4].mxu1 }
 0x263   :  { %v304_v9 = vmul.f32 0.35355338, %v297_v8  ;;  %v3267_v10 = vpop.f32.mrb[5].mxu1 }
 0x264   :  { %v300_v11 = vpop.f32.mrb[6].mxu1 }
 0x265   :  { %v3268_v12 = vpop.f32.mrb[7].mxu1  ;;  %v318_v13 = vadd.f32 %v3901_v7, %v304_v9 }
 0x267   :  { %v322_v14 = vsel %vm204_vm2, %v318_v13, -inf }
 0x268   :  { %323 = vmax.xlane.f32.xlu1 %v322_v14 }
 0x279   :  { %445 = vrot.lane.b32.xlu1 %v3844_v38, %s3710_s2 }
 0x27d   :  { %495 = vrot.lane.b32.xlu1 %v3854_v42, %s3710_s2 }
 0x281   :  { %493 = vrot.lane.b32.xlu1 %v3868_v45, %s3711_s15 }
 0x2ed   :  { %v321_v15 = vpop.xlane.xlu0 %320 }
 0x2ee   :  { %v325_v16 = vsub.f32 %v317_v4, %v321_v15 }
 0x2f0   :  { %v327_v17 = vmul.f32 1.442695, %v325_v16 }
 0x2f2   :  { %3593 = vpow2.f32 %v327_v17 }
 0x2f5   :  { %v324_v18 = vpop.xlane.xlu1 %323 }
 0x2f6   :  { %v326_v19 = vsub.f32 %v318_v13, %v324_v18 }
 0x2f8   :  { %v329_v20 = vmul.f32 1.442695, %v326_v19 }
 0x2f9   :  { %v446_v39 = vpop.permute.xlu1 %445 }
 0x2fa   :  { %3595 = vpow2.f32 %v329_v20  ;;  %v451_v46 = vsel %vm204_vm2, %v446_v39, 0 }
 0x2fc   :  { %v3594_v21 = vpop.eup %3593 }
 0x2fd   :  { %v331_v22 = vsel %vm204_vm2, %v3594_v21, 0.0  ;;  %v496_v47 = vpop.permute.xlu1 %495 }
 0x2fe   :  { %332 = vadd.xlane.f32.xlu0 %v331_v22  ;;  %v501_v49 = vsel %vm204_vm2, %v496_v47, 0 }
 0x301   :  { %v494_v50 = vpop.permute.xlu1 %493 }
 0x304   :  { %v3596_v23 = vpop.eup %3595 }
 0x305   :  { %v334_v24 = vsel %vm204_vm2, %v3596_v23, 0.0 }
 0x306   :  { %335 = vadd.xlane.f32.xlu0 %v334_v24 }
 0x31c   :  { %443 = vrot.lane.b32.xlu0 %v3858_v43, %s3711_s15  ;;  %s3052_s15 = sshll.u32 %s3720_s14, 4  ;;  %s3053_s15 = int_to_ptr.vmem [resolvable:$true] %s3052_s15 }
 0x31d   :  { %p3686_p1 = scmp.lt.s32.totalorder %s3053_s15, %s3053_s15 }
 0x38b   :  { %v333_v25 = vpop.xlane.xlu0 %332 }
 0x38c   :  { %3597 = vrcp.f32 %v333_v25 }
 0x393   :  { %v336_v26 = vpop.xlane.xlu0 %335 }
 0x394   :  { %3599 = vrcp.f32 %v336_v26 }
 0x396   :  { %v3598_v29 = vpop.eup %3597 }
 0x397   :  { %v3917_v31 = vmul.f32 %v3598_v29, %v3594_v21  ;;  %v444_v48 = vpop.permute.xlu0 %443 }
 0x399   :  { %v343_v32 = vpack.c.bf16 %v3917_v31, %v3917_v31 }
 0x39b   :  { %3272 = vmatmul.mubr.msk.bf16.vlgmr.msra.gmra.mrb[8].mxu1 %vm204_vm2, %v343_v32 }
 0x39c   :  { %3276 = vmatpush3.bf16.msra.mxu1 %v398_v34  ;;  %3277 = vmatprep.mubr.msk.bf16.mxu1 %vm3706_vm1, %v3705_v2 }
 0x39d   :  { %3281 = vmatprep.subr.bf16.mxu1 %v3705_v2 }
 0x39e   :  { %v3600_v35 = vpop.eup %3599 }
 0x39f   :  { %v3927_v36 = vmul.f32 %v3600_v35, %v3596_v23 }
 0x3a1   :  { %v344_v40 = vpack.c.bf16 %v3927_v36, %v3927_v36 }
 0x3a3   :  { %3278 = vmatmul.mubr.msk.bf16.vlgmr.msra.gmra.mrb[12].mxu1 %vm204_vm2, %v344_v40 }
 0x3a4   :  { %3283 = vmatprep.mubr.msk.bf16.mxu1 %vm3706_vm1, %v3705_v2 }
 0x3a5   :  { %3282 = vmatpush3.bf16.xpose.msra.mxu1 %v451_v46 }
 0x3a6   :  { %3287 = vmatprep.subr.bf16.mxu1 %v3705_v2 }
 0x3ac   :  { %3284 = vmatmul.mubr.msk.bf16.vlgmr.msra.gmra.mrb[16].mxu1 %vm204_vm2, %v444_v48 }
 0x3ad   :  { %3288 = vmatpush3.bf16.xpose.msra.mxu1 %v501_v49  ;;  %3289 = vmatprep.mubr.msk.bf16.mxu1 %vm3706_vm1, %v3705_v2 }
 0x3ae   :  { %3299 = vmatprep.subr.bf16.mxu1 %v3705_v2 }
 0x3b4   :  { %3290 = vmatmul.mubr.msk.bf16.vlgmr.msra.gmra.mrb[20].mxu1 %vm204_vm2, %v494_v50 }
 0x3b5   :  { %3301 = vmatprep.mubr.msk.bf16.mxu1 %vm3706_vm1, %v3705_v2 }
 0x46e   :  { %v3944_v51 = vpop.f32.mrb[8].mxu1 }
 0x46f   :  { %v3273_v53 = vpop.f32.mrb[9].mxu1 }
 0x470   :  { %v391_v54 = vpop.f32.mrb[10].mxu1 }
 0x471   :  { %v3274_v55 = vpop.f32.mrb[11].mxu1 }
 0x476   :  { %v3946_v56 = vpop.f32.mrb[12].mxu1 }
 0x477   :  { %v440_v57 = vpack.c.bf16 %v3946_v56, %v3944_v51  ;;  %v3279_v58 = vpop.f32.mrb[13].mxu1 }
 0x478   :  { %v437_v61 = vpop.f32.mrb[14].mxu1 }
 0x479   :  { %v3280_v62 = vpop.f32.mrb[15].mxu1 }
 0x47f   :  { %v3950_v63 = vpop.f32.mrb[16].mxu1 }
 0x480   :  { %v3285_v0 = vpop.f32.mrb[17].mxu1 }
 0x481   :  { %v490_v1 = vpop.f32.mrb[18].mxu1 }
 0x482   :  { %v3286_v3 = vpop.f32.mrb[19].mxu1 }
 0x487   :  { %v537_v4 = vpop.f32.mrb[20].mxu1 }
 0x488   :  { %v544_v5 = vmul.f32 0.35355338, %v537_v4  ;;  %v3291_v6 = vpop.f32.mrb[21].mxu1 }
 0x489   :  { %v540_v8 = vpop.f32.mrb[22].mxu1 }
 0x48a   :  { %v3292_v9 = vpop.f32.mrb[23].mxu1  ;;  %v546_v10 = vadd.f32 %v544_v5, %v3901_v7 }
 0x48c   :  { %v550_v11 = vsel %vm204_vm2, %v546_v10, -inf }
 0x48d   :  { %551 = vmax.xlane.f32.xlu0 %v550_v11 }
 0x4a3   :  { %623 = vrot.lane.b32.xlu0 %v3915_v30, %s3712_s16 }
 0x4a7   :  { %778 = vrot.lane.b32.xlu0 %v3858_v43, %s3713_s17 }
 0x4ab   :  { %828 = vrot.lane.b32.xlu0 %v3868_v45, %s3713_s17 }
 0x51a   :  { %v552_v12 = vpop.xlane.xlu0 %551 }
 0x51b   :  { %v554_v13 = vsub.f32 %v546_v10, %v552_v12 }
 0x51d   :  { %v557_v14 = vmul.f32 1.442695, %v554_v13 }
 0x51e   :  { %v624_v15 = vpop.permute.xlu0 %623 }
 0x51f   :  { %3601 = vpow2.f32 %v557_v14  ;;  %v629_v16 = vsel %vm350_vm3, %v624_v15, 0  ;;  %v543_v15 = vmul.f32 0.35355338, %v3950_v63 }
 0x520   :  { %3300 = vmatpush3.bf16.msra.mxu1 %v629_v16 }
 0x521   :  { %3321 = vmatprep.subr.bf16.mxu1 %v3705_v2  ;;  %v545_v16 = vadd.f32 %v543_v15, %v3893_v60 }
 0x522   :  { %v779_v26 = vpop.permute.xlu0 %778 }
 0x526   :  { %v829_v32 = vpop.permute.xlu0 %828 }
 0x529   :  { %v3602_v17 = vpop.eup %3601 }
 0x52a   :  { %v562_v18 = vsel %vm204_vm2, %v3602_v17, 0.0 }
 0x52b   :  { %563 = vadd.xlane.f32.xlu1 %v562_v18 }
 0x53c   :  { %780 = vrot.lane.b32.xlu1 %v3844_v38, %s3714_s18 }
 0x540   :  { %830 = vrot.lane.b32.xlu1 %v3854_v42, %s3714_s18 }
 0x5b8   :  { %v564_v19 = vpop.xlane.xlu1 %563 }
 0x5b9   :  { %3603 = vrcp.f32 %v564_v19 }
 0x5bc   :  { %v781_v22 = vpop.permute.xlu1 %780 }
 0x5bd   :  { %v786_v24 = vsel %vm204_vm2, %v781_v22, 0 }
 0x5c0   :  { %v831_v25 = vpop.permute.xlu1 %830 }
 0x5c1   :  { %v836_v29 = vsel %vm204_vm2, %v831_v25, 0 }
 0x5c3   :  { %v3604_v20 = vpop.eup %3603 }
 0x5c4   :  { %v3965_v21 = vmul.f32 %v3604_v20, %v3602_v17  ;;  %v547_v17 = vsel %vm204_vm2, %v545_v16, -inf }
 0x5c6   :  { %v572_v23 = vpack.c.bf16 %v3965_v21, %v3965_v21  ;;  %v570_v25 = vadd.f32 %v3965_v21, %v3927_v36 }
 0x5c8   :  { %3302 = vmatmul.mubr.msk.bf16.vlgmr.msra.gmra.mrb[24].mxu1 %vm204_vm2, %v572_v23 }
 0x5c9   :  { %3322 = vmatpush3.bf16.xpose.msra.mxu1 %v786_v24  ;;  %3323 = vmatprep.mubr.msk.bf16.mxu1 %vm3706_vm1, %v3705_v2 }
 0x5ca   :  { %3327 = vmatprep.subr.bf16.mxu1 %v3705_v2 }
 0x5d0   :  { %3324 = vmatmul.mubr.msk.bf16.vlgmr.msra.gmra.mrb[28].mxu1 %vm204_vm2, %v779_v26 }
 0x5d1   :  { %3328 = vmatpush3.bf16.xpose.msra.mxu1 %v836_v29  ;;  %3329 = vmatprep.mubr.msk.bf16.mxu1 %vm3706_vm1, %v3705_v2 }
 0x5d2   :  { %3333 = vmatprep.subr.bf16.mxu1 %v3705_v2 }
 0x5d8   :  { %3330 = vmatmul.mubr.msk.bf16.vlgmr.msra.gmra.mrb[32].mxu1 %vm204_vm2, %v829_v32 }
 0x5d9   :  { %3335 = vmatprep.mubr.msk.bf16.mxu1 %vm3706_vm1, %v3705_v2 }
 0x69b   :  { %v3982_v34 = vpop.f32.mrb[24].mxu1 }
 0x69c   :  { %v3303_v35 = vpop.f32.mrb[25].mxu1 }
 0x69d   :  { %v668_v39 = vpop.f32.mrb[26].mxu1 }
 0x69e   :  { %v3304_v40 = vpop.f32.mrb[27].mxu1 }
 0x6a3   :  { %v822_v46 = vpop.f32.mrb[28].mxu1 }
 0x6a4   :  { %v878_v47 = vmul.f32 0.35355338, %v822_v46  ;;  %v3325_v48 = vpop.f32.mrb[29].mxu1 }
 0x6a5   :  { %v825_v49 = vpop.f32.mrb[30].mxu1 }
 0x6a6   :  { %v3326_v50 = vpop.f32.mrb[31].mxu1  ;;  %v880_v53 = vadd.f32 %v878_v47, %v3893_v60 }
 0x6a8   :  { %v882_v54 = vsel %vm204_vm2, %v880_v53, -inf }
 0x6a9   :  { %883 = vmax.xlane.f32.xlu1 %v882_v54  ;;  %v193_v54 = vld [vmem:[%s4620_s4 + $0x78] sm:$0xff] }
 0x6ab   :  { %v872_v55 = vpop.f32.mrb[32].mxu1 }
 0x6ac   :  { %v879_v58 = vmul.f32 0.35355338, %v872_v55  ;;  %v3331_v61 = vpop.f32.mrb[33].mxu1 }
 0x6ad   :  { %v875_v62 = vpop.f32.mrb[34].mxu1  ;;  %v191_v61 = vld [vmem:[%s4620_s4 + $0x68] sm:$0xff] }
 0x6ae   :  { %v3332_v0 = vpop.f32.mrb[35].mxu1  ;;  %v881_v1 = vadd.f32 %v879_v58, %v3901_v7  ;;  %v190_v58 = vld [vmem:[%s4620_s4 + $0x60] sm:$0xff] }
 0x6af   :  { %v4050_v62 = vpack.c.bf16 %v191_v61, %v190_v58  ;;  %v3067_v58 = vld [vmem:[%s4621_s5 + $0x8] ss:$0 sm:$0xff] }
 0x6b0   :  { %v885_v3 = vsel %vm204_vm2, %v881_v1, -inf }
 0x6b1   :  { %886 = vmax.xlane.f32.xlu0 %v885_v3 }
 0x6ba   :  { %956 = vrot.lane.b32.xlu1 %v3915_v30, %s3715_s19 }
 0x736   :  { %v884_v4 = vpop.xlane.xlu1 %883 }
 0x737   :  { %v888_v5 = vsub.f32 %v880_v53, %v884_v4  ;;  %v192_v53 = vld [vmem:[%s4620_s4 + $0x70] sm:$0xff] }
 0x738   :  { %v4040_v55 = vpack.c.bf16 %v193_v54, %v192_v53 }
 0x739   :  { %v890_v6 = vmul.f32 1.442695, %v888_v5 }
 0x73a   :  { %v957_v19 = vpop.permute.xlu1 %956 }
 0x73b   :  { %3605 = vpow2.f32 %v890_v6  ;;  %v962_v22 = vsel %vm350_vm3, %v957_v19, 0 }
 0x73e   :  { %v887_v8 = vpop.xlane.xlu0 %886 }
 0x73f   :  { %v889_v9 = vsub.f32 %v881_v1, %v887_v8 }
 0x741   :  { %v892_v10 = vmul.f32 1.442695, %v889_v9 }
 0x743   :  { %3607 = vpow2.f32 %v892_v10 }
 0x745   :  { %v3606_v11 = vpop.eup %3605 }
 0x746   :  { %v894_v12 = vsel %vm204_vm2, %v3606_v11, 0.0 }
 0x747   :  { %895 = vadd.xlane.f32.xlu0 %v894_v12 }
 0x74d   :  { %v3608_v13 = vpop.eup %3607 }
 0x74e   :  { %v897_v14 = vsel %vm204_vm2, %v3608_v13, 0.0 }
 0x74f   :  { %898 = vadd.xlane.f32.xlu1 %v897_v14 }
 0x75d   :  { %908 = vrot.lane.b32.xlu0 %v3879_v52, %s3715_s19 }
 0x760   :  { %1063 = vrot.lane.b32.xlu1 %v3844_v38, %s3716_s20 }
 0x761   :  { %1061 = vrot.lane.b32.xlu0 %v3858_v43, %s3717_s21 }
 0x764   :  { %1113 = vrot.lane.b32.xlu1 %v3854_v42, %s3716_s20 }
 0x765   :  { %1111 = vrot.lane.b32.xlu0 %v3868_v45, %s3717_s21 }
 0x788   :  { %548 = vmax.xlane.f32.xlu1 %v547_v17 }
 0x7d4   :  { %v896_v18 = vpop.xlane.xlu0 %895 }
 0x7d5   :  { %3609 = vrcp.f32 %v896_v18 }
 0x7d8   :  { %v909_v20 = vpop.permute.xlu0 %908 }
 0x7d9   :  { %v914_v38 = vsel %vm350_vm3, %v909_v20, 0 }
 0x7da   :  { %3334 = vmatpush3.bf16.msra.mxu1 %v914_v38 }
 0x7db   :  { %3339 = vmatprep.subr.bf16.mxu1 %v3705_v2 }
 0x7dc   :  { %v899_v43 = vpop.xlane.xlu1 %898  ;;  %v1062_v40 = vpop.permute.xlu0 %1061 }
 0x7dd   :  { %3611 = vrcp.f32 %v899_v43 }
 0x7df   :  { %v3610_v42 = vpop.eup %3609 }
 0x7e0   :  { %v4005_v45 = vmul.f32 %v3610_v42, %v3606_v11  ;;  %v1064_v26 = vpop.permute.xlu1 %1063  ;;  %v1112_v36 = vpop.permute.xlu0 %1111 }
 0x7e1   :  { %v1069_v35 = vsel %vm204_vm2, %v1064_v26, 0 }
 0x7e2   :  { %v906_v63 = vpack.c.bf16 %v4005_v45, %v4005_v45 }
 0x7e4   :  { %3336 = vmatmul.mubr.msk.bf16.vlgmr.msra.gmra.mrb[36].mxu1 %vm204_vm2, %v906_v63  ;;  %v1114_v39 = vpop.permute.xlu1 %1113 }
 0x7e5   :  { %3340 = vmatpush3.bf16.msra.mxu1 %v962_v22  ;;  %3341 = vmatprep.mubr.msk.bf16.mxu1 %vm3706_vm1, %v3705_v2  ;;  %v1119_v46 = vsel %vm204_vm2, %v1114_v39, 0 }
 0x7e6   :  { %3353 = vmatprep.subr.bf16.mxu1 %v3705_v2 }
 0x7e7   :  { %v3612_v23 = vpop.eup %3611 }
 0x7e8   :  { %v903_v24 = vmul.f32 %v3612_v23, %v3608_v13 }
 0x7ea   :  { %v907_v29 = vpack.c.bf16 %v903_v24, %v903_v24  ;;  %v4016_v32 = vadd.f32 %v903_v24, %v570_v25 }
 0x7ec   :  { %3342 = vmatmul.mubr.msk.bf16.vlgmr.msra.gmra.mrb[40].mxu1 %vm204_vm2, %v907_v29 }
 0x7ed   :  { %3355 = vmatprep.mubr.msk.bf16.mxu1 %vm3706_vm1, %v3705_v2 }
 0x7ee   :  { %3354 = vmatpush3.bf16.xpose.msra.mxu1 %v1069_v35 }
 0x7ef   :  { %3359 = vmatprep.subr.bf16.mxu1 %v3705_v2 }
 0x7f5   :  { %3356 = vmatmul.mubr.msk.bf16.vlgmr.msra.gmra.mrb[44].mxu1 %vm204_vm2, %v1062_v40 }
 0x7f6   :  { %3360 = vmatpush3.bf16.xpose.msra.mxu1 %v1119_v46  ;;  %3361 = vmatprep.mubr.msk.bf16.mxu1 %vm3706_vm1, %v3705_v2 }
 0x7f7   :  { %3371 = vmatprep.subr.bf16.mxu1 %v3705_v2 }
 0x7fd   :  { %3362 = vmatmul.mubr.msk.bf16.vlgmr.msra.gmra.mrb[48].mxu1 %vm204_vm2, %v1112_v36 }
 0x7fe   :  { %3373 = vmatprep.mubr.msk.bf16.mxu1 %vm3706_vm1, %v3705_v2 }
 0x815   :  { %v549_v21 = vpop.xlane.xlu1 %548 }
 0x816   :  { %v553_v47 = vsub.f32 %v545_v16, %v549_v21 }
 0x818   :  { %v555_v48 = vmul.f32 1.442695, %v553_v47 }
 0x81a   :  { %3613 = vpow2.f32 %v555_v48 }
 0x824   :  { %v3614_v49 = vpop.eup %3613 }
 0x825   :  { %v559_v50 = vsel %vm204_vm2, %v3614_v49, 0.0 }
 0x826   :  { %560 = vadd.xlane.f32.xlu0 %v559_v50 }
 0x83c   :  { %574 = vrot.lane.b32.xlu0 %v3879_v52, %s3712_s16 }
 0x840   :  { %676 = vrot.lane.b32.xlu0 %v4040_v55, %s3712_s16 }
 0x844   :  { %1005 = vrot.lane.b32.xlu0 %v4050_v62, %s3715_s19 }
 0x8b3   :  { %v561_v0 = vpop.xlane.xlu0 %560 }
 0x8b4   :  { %3615 = vrcp.f32 %v561_v0  ;;  %v732_v0 = vsel %vm204_vm2, %v4050_v62, 0 }
 0x8b7   :  { %v575_v1 = vpop.permute.xlu0 %574  ;;  %v4054_v3 = vpop.f32.mrb[36].mxu1 }
 0x8b8   :  { %v580_v4 = vsel %vm350_vm3, %v575_v1, 0  ;;  %v3337_v5 = vpop.f32.mrb[37].mxu1 }
 0x8b9   :  { %3294 = vmatpush3.bf16.msra.mxu0 %v580_v4  ;;  %v953_v6 = vpop.f32.mrb[38].mxu1 }
 0x8ba   :  { %v3338_v8 = vpop.f32.mrb[39].mxu1  ;;  %3305 = vmatprep.subr.bf16.mxu0 %v3705_v2 }
 0x8be   :  { %v3616_v9 = vpop.eup %3615 }
 0x8bf   :  { %v4058_v10 = vmul.f32 %v3616_v9, %v3614_v49  ;;  %v4060_v11 = vpop.f32.mrb[40].mxu1  ;;  %v677_v49 = vpop.permute.xlu0 %676 }
 0x8c0   :  { %v1004_v12 = vpack.c.bf16 %v4060_v11, %v4054_v3  ;;  %v3343_v13 = vpop.f32.mrb[41].mxu1  ;;  %v685_v50 = vsel %vm204_vm2, %v677_v49, 0 }
 0x8c1   :  { %v1001_v14 = vpop.f32.mrb[42].mxu1  ;;  %v571_v15 = vpack.c.bf16 %v4058_v10, %v4058_v10  ;;  %v569_v8 = vadd.f32 %v4058_v10, %v3917_v31 }
 0x8c2   :  { %v3344_v16 = vpop.f32.mrb[43].mxu1 }
 0x8c3   :  { %3296 = vmatmul.mubr.msk.bf16.vlgmr.msra.gmra.mrb[4].mxu0 %vm204_vm2, %v571_v15  ;;  %v904_v13 = vadd.f32 %v4005_v45, %v569_v8 }
 0x8c4   :  { %3309 = vmatprep.mubr.msk.bf16.mxu0 %vm3706_vm1, %v3705_v2 }
 0x8c8   :  { %v1105_v17 = vpop.f32.mrb[44].mxu1 }
 0x8c9   :  { %v1161_v18 = vmul.f32 0.35355338, %v1105_v17  ;;  %v3357_v19 = vpop.f32.mrb[45].mxu1 }
 0x8ca   :  { %v1108_v20 = vpop.f32.mrb[46].mxu1 }
 0x8cb   :  { %v3358_v38 = vpop.f32.mrb[47].mxu1  ;;  %v1163_v43 = vadd.f32 %v1161_v18, %v3893_v60 }
 0x8cd   :  { %v1165_v42 = vsel %vm204_vm2, %v1163_v43, -inf }
 0x8ce   :  { %1166 = vmax.xlane.f32.xlu1 %v1165_v42 }
 0x8d0   :  { %v1155_v63 = vpop.f32.mrb[48].mxu1 }
 0x8d1   :  { %v1162_v22 = vmul.f32 0.35355338, %v1155_v63  ;;  %v3363_v23 = vpop.f32.mrb[49].mxu1 }
 0x8d2   :  { %v1158_v24 = vpop.f32.mrb[50].mxu1 }
 0x8d3   :  { %v3364_v25 = vpop.f32.mrb[51].mxu1  ;;  %v1164_v26 = vadd.f32 %v1162_v22, %v3901_v7 }
 0x8d5   :  { %v1168_v29 = vsel %vm204_vm2, %v1164_v26, -inf }
 0x8d6   :  { %1169 = vmax.xlane.f32.xlu1 %v1168_v29 }
 0x8e7   :  { %674 = vrot.lane.b32.xlu1 %v4050_v62, %s3712_s16 }
 0x8eb   :  { %1007 = vrot.lane.b32.xlu1 %v4040_v55, %s3715_s19 }
 0x95b   :  { %v1167_v60 = vpop.xlane.xlu1 %1166 }
 0x95c   :  { %v1171_v35 = vsub.f32 %v1163_v43, %v1167_v60 }
 0x95e   :  { %v1173_v39 = vmul.f32 1.442695, %v1171_v35 }
 0x960   :  { %3617 = vpow2.f32 %v1173_v39 }
 0x963   :  { %v1170_v40 = vpop.xlane.xlu1 %1169 }
 0x964   :  { %v1172_v46 = vsub.f32 %v1164_v26, %v1170_v40 }
 0x966   :  { %v1175_v36 = vmul.f32 1.442695, %v1172_v46 }
 0x967   :  { %v675_v21 = vpop.permute.xlu1 %674 }
 0x968   :  { %3619 = vpow2.f32 %v1175_v36  ;;  %v682_v7 = vsel %vm204_vm2, %v675_v21, 0 }
 0x969   :  { %3306 = vmatpush3.bf16.xpose.msra.mxu0 %v682_v7 }
 0x96a   :  { %v3618_v47 = vpop.eup %3617  ;;  %3307 = vmatprep.subr.bf16.mxu0 %v3705_v2 }
 0x96b   :  { %v1177_v48 = vsel %vm204_vm2, %v3618_v47, 0.0 }
 0x96c   :  { %1178 = vadd.xlane.f32.xlu0 %v1177_v48 }
 0x971   :  { %3308 = vmatpush3.bf16.xpose.msra.mxu0 %v685_v50 }
 0x972   :  { %v4081_v53 = vpop.eup %3619  ;;  %3313 = vmatprep.subr.bf16.mxu0 %v3705_v2 }
 0x973   :  { %v1180_v54 = vsel %vm204_vm2, %v4081_v53, 0.0 }
 0x974   :  { %1181 = vadd.xlane.f32.xlu1 %v1180_v54 }
 0x982   :  { %1191 = vrot.lane.b32.xlu0 %v3879_v52, %s3718_s30 }
 0x985   :  { %1239 = vrot.lane.b32.xlu1 %v3915_v30, %s3718_s30 }
 0x986   :  { %1288 = vrot.lane.b32.xlu0 %v4050_v62, %s3718_s30  ;;  %v1008_v62 = vpop.permute.xlu1 %1007 }
 0x989   :  { %1290 = vrot.lane.b32.xlu1 %v4040_v55, %s3718_s30 }
 0x98a   :  { %150 = vrot.lane.b32.xlu0 %v3835_v33, %s3707_s7  ;;  %v735_v33 = vsel %vm204_vm2, %v4040_v55, 0  ;;  %v1016_v55 = vsel %vm204_vm2, %v1008_v62, 0 }
 0x98d   :  { %152 = vrot.lane.b32.xlu1 %v3848_v41, %s3707_s7  ;;  %v1006_v41 = vpop.permute.xlu0 %1005 }
 0x98e   :  { %164 = vrot.lane.b32.xlu0 %v3067_v58, %s3708_s10 }
 0x996   :  { %v616_v52 = vpop.f32.mrb[4].mxu0 }
 0x997   :  { %v671_v30 = vpack.c.bf16 %v3982_v34, %v616_v52  ;;  %v3297_v61 = vpop.f32.mrb[5].mxu0  ;;  %v1013_v34 = vsel %vm204_vm2, %v1006_v41, 0 }
 0x998   :  { %v619_v1 = vpop.f32.mrb[6].mxu0  ;;  %v3068_v61 = vld [vmem:[%s4621_s5 + $0x9] ss:$0 sm:$0xff] }
 0x999   :  { %v3298_v4 = vpop.f32.mrb[7].mxu0  ;;  %3310 = vmatmul.mubr.msk.bf16.vlgmr.msra.gmra.mrb[8].mxu0 %vm204_vm2, %v671_v30 }
 0x99a   :  { %3314 = vmatpush3.bf16.xpose.msra.mxu0 %v732_v0  ;;  %3317 = vmatprep.mubr.msk.bf16.mxu0 %vm3706_vm1, %v3705_v2 }
 0x99b   :  { %3315 = vmatprep.subr.bf16.mxu0 %v3705_v2 }
 0x9a2   :  { %3316 = vmatpush3.bf16.xpose.msra.mxu0 %v735_v33 }
 0x9a3   :  { %3345 = vmatprep.subr.bf16.mxu0 %v3705_v2 }
 0x9a9   :  { %3318 = vmatmul.mubr.msk.bf16.vlgmr.msra.gmra.mrb[8].mxu0 %vm204_vm2, %v440_v57 }
 0x9aa   :  { %3346 = vmatpush3.bf16.xpose.msra.mxu0 %v1013_v34  ;;  %3349 = vmatprep.mubr.msk.bf16.mxu0 %vm3706_vm1, %v3705_v2 }
 0x9ab   :  { %3347 = vmatprep.subr.bf16.mxu0 %v3705_v2 }
 0x9b2   :  { %3348 = vmatpush3.bf16.xpose.msra.mxu0 %v1016_v55 }
 0x9b3   :  { %3365 = vmatprep.subr.bf16.mxu0 %v3705_v2 }
 0x9b9   :  { %3350 = vmatmul.mubr.msk.bf16.vlgmr.msra.gmra.mrb[8].mxu0 %vm204_vm2, %v1004_v12 }
 0x9ba   :  { %3367 = vmatprep.mubr.msk.bf16.mxu0 %vm3706_vm1, %v3705_v2 }
 0x9f9   :  { %v1179_v51 = vpop.xlane.xlu0 %1178 }
 0x9fa   :  { %3621 = vrcp.f32 %v1179_v51 }
 0x9fd   :  { %v1192_v56 = vpop.permute.xlu0 %1191 }
 0x9fe   :  { %v1197_v57 = vsel %vm350_vm3, %v1192_v56, 0 }
 0x9ff   :  { %3366 = vmatpush3.bf16.msra.mxu0 %v1197_v57 }
 0xa00   :  { %3377 = vmatprep.subr.bf16.mxu0 %v3705_v2 }
 0xa01   :  { %v1289_v5 = vpop.permute.xlu0 %1288  ;;  %v1182_v6 = vpop.xlane.xlu1 %1181 }
 0xa02   :  { %3623 = vrcp.f32 %v1182_v6  ;;  %v1296_v15 = vsel %vm204_vm2, %v1289_v5, 0  ;;  %v3091_v6 = vld [vmem:[%s4621_s5 + $0x3] ss:$0 sm:$0xff] }
 0xa04   :  { %v3622_v3 = vpop.eup %3621 }
 0xa05   :  { %v1185_v9 = vmul.f32 %v3622_v3, %v3618_v47  ;;  %v151_v11 = vpop.permute.xlu0 %150  ;;  %v1240_v12 = vpop.permute.xlu1 %1239 }
 0xa06   :  { %v1245_v14 = vsel %vm350_vm3, %v1240_v12, 0  ;;  %v156_v18 = vmul.f32 %v151_v11, %v3840_v37 }
 0xa07   :  { %3372 = vmatpush3.bf16.msra.mxu1 %v1245_v14  ;;  %v1189_v16 = vpack.c.bf16 %v1185_v9, %v1185_v9  ;;  %v1187_v17 = vadd.f32 %v1185_v9, %v904_v13 }
 0xa08   :  { %3385 = vmatprep.subr.bf16.mxu1 %v3705_v2 }
 0xa09   :  { %v165_v19 = vpop.permute.xlu0 %164  ;;  %v1291_v31 = vpop.permute.xlu1 %1290  ;;  %3368 = vmatmul.mubr.msk.bf16.vlgmr.msra.gmra.mrb[12].mxu0 %vm204_vm2, %v1189_v16  ;;  %v1498_v16 = vld [vmem:[%s4620_s4 + $0x80] sm:$0xff] }
 0xa0a   :  { %v167_v10 = vmul.f32 %v165_v19, %v156_v18  ;;  %3378 = vmatpush3.bf16.xpose.msra.mxu0 %v1296_v15  ;;  %3381 = vmatprep.mubr.msk.bf16.mxu0 %vm3706_vm1, %v3705_v2  ;;  %v1299_v22 = vsel %vm204_vm2, %v1291_v31, 0 }
 0xa0b   :  { %3379 = vmatprep.subr.bf16.mxu0 %v3705_v2 }
 0xa0c   :  { %v3624_v45 = vpop.eup %3623  ;;  %171 = vrot.lane.b32.xlu1 %v167_v10, %s3708_s10 }
 0xa0d   :  { %v1186_v20 = vmul.f32 %v3624_v45, %v4081_v53  ;;  %v153_v38 = vpop.permute.xlu1 %152  ;;  %v3719_v53 = vmov 0   ;;  %v1502_v45 = vld [vmem:[%s4620_s4 + $0xa0] sm:$0xff] }
 0xa0e   :  { %v157_v37 = vmul.f32 %v153_v38, %v3860_v44 }
 0xa0f   :  { %v1190_v43 = vpack.c.bf16 %v1186_v20, %v1186_v20  ;;  %v1188_v42 = vadd.f32 %v1186_v20, %v4016_v32  ;;  %v1503_v20 = vld [vmem:[%s4620_s4 + $0xa8] sm:$0xff] }
 0xa10   :  { %v168_v63 = vmul.f32 %v165_v19, %v157_v37  ;;  %v1509_v38 = vpack.c.bf16 %v1503_v20, %v1502_v45 }
 0xa11   :  { %3374 = vmatmul.mubr.msk.bf16.vlgmr.msra.gmra.mrb[52].mxu1 %vm204_vm2, %v1190_v43  ;;  %v1504_v43 = vld [vmem:[%s4620_s4 + $0xb0] sm:$0xff] }
 0xa12   :  { %3380 = vmatpush3.bf16.xpose.msra.mxu0 %v1299_v22  ;;  %173 = vrot.lane.b32.xlu0 %v168_v63, %s3708_s10  ;;  %v1521_v37 = vsel %vm56_vm0, %v1509_v38, 0 }
 0xa13   :  { %3393 = vmatprep.mubr.msk.bf16.mxu1 %vm3706_vm1, %v3705_v2  ;;  %3397 = vmatprep.subr.bf16.mxu0 %v3705_v2 }
 0xa7e   :  { %v172_v23 = vpop.permute.xlu1 %171 }
 0xa7f   :  { %v177_v24 = vsel %vm56_vm0, %v172_v23, 0.0  ;;  %v27_v23 = vld [vmem:[%s4617_s1] sm:$0xff] }
 0xa80   :  { %178 = vadd.xlane.f32.xlu0 %v177_v24  ;;  %v28_v24 = vld [vmem:[%s4617_s1 + $0x8] sm:$0xff]  ;;  %s3681_s1 = scalar_lea.vmem %s3053_s15, 256 }
 0xa81   :  { %p3682_p0 = scmp.ne.s32.totalorder %s3053_s15, %s3681_s1  ;;  %p3687_p2 = scmp.lt.s32.totalorder %s3681_s1, %s3681_s1 }
 0xa83   :  { %p3688_p3 = por %p3687_p2, %p3686_p1 }
 0xa84   :  { %v174_v44 = vpop.permute.xlu0 %173 }
 0xa85   :  { %v180_v32 = vsel %vm56_vm0, %v174_v44, 0.0  ;;  %v1506_v44 = vpack.c.bf16 %v28_v24, %v27_v23  ;;  %v3095_v23 = vld [vmem:[%s4621_s5 + $0x4] ss:$0 sm:$0xff]  ;;  %p3689_p4 = pnand %p3688_p3, %p3682_p0 }
 0xa86   :  { %181 = vadd.xlane.f32.xlu1 %v180_v32 }
 0xaad   :  { %1376 = vxpose.xlu0.b32.start.end [1/1] (short) (narrow) %v1188_v42, 8  ;;  %v1505_v42 = vld [vmem:[%s4620_s4 + $0xb8] sm:$0xff] }
 0xaae   :  { %v1510_v63 = vpack.c.bf16 %v1505_v42, %v1504_v43 }
 0xab0   :  { %v1524_v22 = vsel %vm56_vm0, %v1510_v63, 0 }
 0xab9   :  { %1344 = vxpose.xlu1.b32.start.end [1/1] (short) (narrow) %v1187_v17, 8  ;;  %v1499_v17 = vld [vmem:[%s4620_s4 + $0x88] sm:$0xff] }
 0xaba   :  { %v1507_v18 = vpack.c.bf16 %v1499_v17, %v1498_v16 }
 0xabc   :  { %v1515_v19 = vsel %vm56_vm0, %v1507_v18, 0 }
 0xabd   :  { %3386 = vmatpush3.bf16.xpose.msra.mxu1 %v1515_v19 }
 0xabe   :  { %3387 = vmatprep.subr.bf16.mxu1 %v3705_v2 }
 0xad6   :  { %3587 = vset.pattern.permute.xlu0 %v3719_v53 }
 0xadc   :  { %v1233_v25 = vpop.f32.mrb[12].mxu0 }
 0xadd   :  { %v3369_v26 = vpop.f32.mrb[13].mxu0 }
 0xade   :  { %v1236_v29 = vpop.f32.mrb[14].mxu0 }
 0xadf   :  { %v3370_v60 = vpop.f32.mrb[15].mxu0 }
 0xae4   :  { %v1281_v35 = vpop.f32.mrb[52].mxu1 }
 0xae5   :  { %v1287_v39 = vpack.c.bf16 %v1281_v35, %v1233_v25  ;;  %v3375_v40 = vpop.f32.mrb[53].mxu1 }
 0xae6   :  { %v1284_v46 = vpop.f32.mrb[54].mxu1 }
 0xae7   :  { %v3376_v36 = vpop.f32.mrb[55].mxu1  ;;  %3382 = vmatmul.mubr.msk.bf16.vlgmr.msra.gmra.mrb[8].mxu0 %vm204_vm2, %v1287_v39 }
 0xae8   :  { %3401 = vmatprep.mubr.msk.bf16.mxu0 %vm3706_vm1, %v3705_v2 }
 0xb0d   :  { %v179_v21 = vpop.xlane.xlu0 %178 }
 0xb0e   :  { %v188_v33 = vadd.f32 %v3068_v61, %v179_v21  ;;  %v3096_v21 = vld [vmem:[%s4621_s5 + $0x5] ss:$0 sm:$0xff] }
 0xb13   :  { %v182_v48 = vpop.xlane.xlu1 %181 }
 0xb14   :  { %v189_v1 = vadd.f32 %v3068_v61, %v182_v48 }
 0xb2d   :  { %v1392_v7 = vpop.trf.xlu0 }
 0xb2e   :  { %v1411_v47 = vsel %vm204_vm2, %v1392_v7, 0.0  ;;  %v1585_v7 = vld [vmem:[%s4620_s4 + $0xc0] sm:$0xff] }
 0xb2f   :  { %1412 = vadd.xlane.f32.xlu1 %v1411_v47  ;;  %v1586_v47 = vld [vmem:[%s4620_s4 + $0xc8] sm:$0xff] }
 0xb30   :  { %v1590_v48 = vpack.c.bf16 %v1586_v47, %v1585_v7 }
 0xb32   :  { %v1601_v53 = vsel %vm56_vm0, %v1590_v48, 0  ;;  %v33_v48 = vld [vmem:[%s4619_s3] sm:$0x1] }
 0xb33   :  { %3398 = vmatpush3.bf16.xpose.msra.mxu0 %v1601_v53 }
 0xb34   :  { %3399 = vmatprep.subr.bf16.mxu0 %v3705_v2 }
 0xb39   :  { %v1360_v49 = vpop.trf.xlu1 }
 0xb3a   :  { %v1408_v50 = vsel %vm204_vm2, %v1360_v49, 0.0  ;;  %v1587_v49 = vld [vmem:[%s4620_s4 + $0xd0] sm:$0xff] }
 0xb3b   :  { %1409 = vadd.xlane.f32.xlu0 %v1408_v50  ;;  %v1588_v50 = vld [vmem:[%s4620_s4 + $0xd8] sm:$0xff] }
 0xbba   :  { %v1335_v54 = vpop.f32.mrb[8].mxu0 }
 0xbbb   :  { %v3383_v58 = vpop.f32.mrb[9].mxu0 }
 0xbbc   :  { %v1338_v52 = vpop.f32.mrb[10].mxu0  ;;  %v1413_v0 = vpop.xlane.xlu1 %1412 }
 0xbbd   :  { %v3384_v30 = vpop.f32.mrb[11].mxu0  ;;  %v1415_v4 = vsub.f32 %v1413_v0, %v189_v1 }
 0xbbf   :  { %vm1417_vm4 = vcmp.gt.f32.partialorder %v1415_v4, 0.0 }
 0xbc0   :  { %v3090_v62 = vsel %vm1417_vm4, 1.0, %v3705_v2 }
 0xbc8   :  { %v1410_v41 = vpop.xlane.xlu0 %1409 }
 0xbc9   :  { %v1414_v34 = vsub.f32 %v1410_v41, %v188_v33 }
 0xbcb   :  { %vm1416_vm5 = vcmp.gt.f32.partialorder %v1414_v34, 0.0 }
 0xbcc   :  { %v3089_v55 = vsel %vm1416_vm5, 1.0, %v3705_v2 }
 0xbcd   :  { %v3588_v51 = vpack.i.bf16 %v3090_v62, %v3089_v55 }
 0xbcf   :  { %3589 = vperm.xlu0 %3587, %v3588_v51  }
 0xc4e   :  { %v3590_v56 = vpop.permute.xlu0 %3589 }
 0xc4f   :  { %v3592_v57 = vunpack.i.h.bf16 %v3590_v56  ;;  %v3591_v5 = vunpack.i.l.bf16 %v3590_v56 }
 0xc51   :  { %v1432_v8 = vmul.f32 %v3591_v5, %v1335_v54  ;;  %v1433_v3 = vmul.f32 %v3592_v57, %v1338_v52  ;;  %v1591_v54 = vpack.c.bf16 %v1588_v50, %v1587_v49  ;;  %v34_v49 = vld [vmem:[%s4619_s3 + $0x1] sm:$0x1]  ;;  %v35_v50 = vmul.f32 -1e+09, %v33_v48 }
 0xc52   :  { %v36_v53 = vmul.f32 -1e+09, %v34_v49 }
 0xc53   :  { %v1439_v9 = vadd.f32 %v3091_v6, %v1432_v8  ;;  %v1440_v11 = vadd.f32 %v3091_v6, %v1433_v3  ;;  %v1604_v58 = vsel %vm56_vm0, %v1591_v54, 0  ;;  %v4295_v54 = vrot.slane %v35_v50, %v3890_v59 }
 0xc54   :  { %3400 = vmatpush3.bf16.xpose.msra.mxu0 %v1604_v58 }
 0xc55   :  { %v1441_v12 = vadd.f32 %v1439_v9, %v3822_v27  ;;  %v1442_v14 = vadd.f32 %v1440_v11, %v3827_v28  ;;  %v1500_v27 = vld [vmem:[%s4620_s4 + $0x90] sm:$0xff]  ;;  %v1501_v28 = vld [vmem:[%s4620_s4 + $0x98] sm:$0xff]  ;;  %3405 = vmatprep.subr.bf16.mxu0 %v3705_v2 }
 0xc56   :  { %v1508_v31 = vpack.c.bf16 %v1501_v28, %v1500_v27  ;;  %v3092_v27 = vld [vmem:[%s4621_s5 + $0xc] ss:$0 sm:$0xff] }
 0xc57   :  { %v1445_v13 = vsel %vm56_vm0, %v1441_v12, 0.0  ;;  %v1448_v15 = vsel %vm56_vm0, %v1442_v14, 0.0 }
 0xc58   :  { %1446 = vadd.xlane.f32.xlu1 %v1445_v13  ;;  %v1518_v10 = vsel %vm56_vm0, %v1508_v31, 0 }
 0xc59   :  { %3388 = vmatpush3.bf16.xpose.msra.mxu1 %v1518_v10  ;;  %v3093_v10 = vld [vmem:[%s4621_s5 + $0xf] ss:$0 sm:$0xff] }
 0xc5a   :  { %3389 = vmatprep.subr.bf16.mxu1 %v3705_v2 }
 0xc5c   :  { %1449 = vadd.xlane.f32.xlu1 %v1448_v15 }
 0xc61   :  { %3390 = vmatpush3.bf16.xpose.msra.mxu1 %v1521_v37 }
 0xc62   :  { %3391 = vmatprep.subr.bf16.mxu1 %v3705_v2 }
 0xc69   :  { %3392 = vmatpush3.bf16.xpose.msra.mxu1 %v1524_v22 }
 0xc6a   :  { %3411 = vmatprep.subr.bf16.mxu1 %v3705_v2 }
 0xc70   :  { %3394 = vmatmul.mubr.msk.bf16.vlgmr.msra.gmra.mrb[56].mxu1 %vm56_vm0, %v1506_v44  ;;  %v3097_v44 = vld [vmem:[%s4621_s5 + $0x6] ss:$0 sm:$0xff] }
 0xc71   :  { %3413 = vmatprep.mubr.msk.bf16.mxu1 %vm3706_vm1, %v3705_v2 }
 0xce5   :  { %v1447_v32 = vpop.xlane.xlu1 %1446 }
 0xce6   :  { %v1452_v25 = vmul.f32 0.03125, %v1447_v32 }
 0xce8   :  { %v1454_v26 = vsub.f32 %v1441_v12, %v1452_v25 }
 0xce9   :  { %v1450_v29 = vpop.xlane.xlu1 %1449 }
 0xcea   :  { %v1453_v60 = vmul.f32 0.03125, %v1450_v29  ;;  %v1456_v35 = vmul.f32 %v1454_v26, %v1454_v26 }
 0xcec   :  { %v1455_v39 = vsub.f32 %v1442_v14, %v1453_v60  ;;  %v1458_v40 = vsel %vm56_vm0, %v1456_v35, 0.0 }
 0xced   :  { %1459 = vadd.xlane.f32.xlu1 %v1458_v40 }
 0xcee   :  { %v1457_v46 = vmul.f32 %v1455_v39, %v1455_v39 }
 0xcf0   :  { %v1461_v36 = vsel %vm56_vm0, %v1457_v46, 0.0 }
 0xcf1   :  { %1462 = vadd.xlane.f32.xlu1 %v1461_v36 }
 0xd02   :  { %1580 = vrot.lane.b32.xlu1 %v3096_v21, %s3707_s7 }
 0xd43   :  { %v1560_v52 = vpop.f32.mrb[56].mxu1 }
 0xd44   :  { %v3395_v30 = vpop.f32.mrb[57].mxu1  ;;  %v1572_v24 = vadd.f32 %v3095_v23, %v1560_v52 }
 0xd45   :  { %v1563_v61 = vpop.f32.mrb[58].mxu1 }
 0xd46   :  { %v3396_v0 = vpop.f32.mrb[59].mxu1  ;;  %v1573_v32 = vadd.f32 %v3095_v23, %v1563_v61 }
 0xd7a   :  { %v1460_v1 = vpop.xlane.xlu1 %1459 }
 0xd7b   :  { %v1464_v4 = vmul.f32 0.032258064, %v1460_v1 }
 0xd7d   :  { %3625 = vrsqrt.f32 %v1464_v4  ;;  %vm1468_vm6 = vcmp.eq.f32.partialorder %v1464_v4, inf  ;;  %v1471_v6 = vand.u32 2147483648, %v1464_v4  ;;  %vm1470_vm7 = vcmp.eq.f32.partialorder %v1464_v4, 0.0 }
 0xd7e   :  { %v1463_v33 = vpop.xlane.xlu1 %1462 }
 0xd7f   :  { %v1465_v41 = vmul.f32 0.032258064, %v1463_v33 }
 0xd81   :  { %3627 = vrsqrt.f32 %v1465_v41  ;;  %vm1475_vm8 = vcmp.eq.f32.partialorder %v1465_v41, inf  ;;  %v1478_v13 = vand.u32 2147483648, %v1465_v41  ;;  %vm1477_vm9 = vcmp.eq.f32.partialorder %v1465_v41, 0.0 }
 0xd82   :  { %v1581_v34 = vpop.permute.xlu1 %1580 }
 0xd83   :  { %v1583_v62 = vadd.f32 %v1581_v34, %v1560_v52  ;;  %v1584_v55 = vadd.f32 %v1581_v34, %v1563_v61  ;;  %v4298_v61 = vrot.slane %v36_v53, %v3890_v59 }
 0xd85   :  { %v4233_v51 = vpack.c.bf16 %v1583_v62, %v1583_v62  ;;  %v4235_v57 = vpack.c.bf16 %v1584_v55, %v1584_v55 }
 0xd87   :  { %v3626_v56 = vpop.eup %3625  ;;  %1656 = vrot.lane.b32.xlu1 %v4233_v51, %s3709_s0 }
 0xd88   :  { %v1467_v5 = vmul.f32 %v3626_v56, %v1464_v4 }
 0xd8a   :  { %v1469_v8 = vsel %vm1468_vm6, %v1464_v4, %v1467_v5 }
 0xd8b   :  { %v3628_v3 = vpop.eup %3627  ;;  %v1472_v9 = vsel %vm1470_vm7, %v1471_v6, %v1469_v8  ;;  %1705 = vrot.lane.b32.xlu1 %v4235_v57, %s3709_s0 }
 0xd8c   :  { %v1480_v11 = vadd.f32 1e-06, %v1472_v9  ;;  %v1474_v12 = vmul.f32 %v3628_v3, %v1465_v41 }
 0xd8e   :  { %3629 = vrcp.f32 %v1480_v11  ;;  %v1476_v14 = vsel %vm1475_vm8, %v1465_v41, %v1474_v12 }
 0xd8f   :  { %v1479_v15 = vsel %vm1477_vm9, %v1478_v13, %v1476_v14 }
 0xd90   :  { %v1481_v16 = vadd.f32 1e-06, %v1479_v15 }
 0xd92   :  { %3631 = vrcp.f32 %v1481_v16 }
 0xd98   :  { %v3630_v17 = vpop.eup %3629 }
 0xd99   :  { %v1484_v18 = vmul.f32 %v3630_v17, %v1454_v26  ;;  %v4266_v26 = vpack.c.bf16 %v1572_v24, %v1572_v24 }
 0xd9b   :  { %v1490_v31 = vmul.f32 %v3092_v27, %v1484_v18  ;;  %v1799_v7 = vsel %vm350_vm3, %v4266_v26, 0 }
 0xd9c   :  { %v3632_v28 = vpop.eup %3631 }
 0xd9d   :  { %v1485_v19 = vmul.f32 %v3632_v28, %v1455_v39  ;;  %v4247_v20 = vadd.f32 %v3093_v10, %v1490_v31  ;;  %v4268_v39 = vpack.c.bf16 %v1573_v32, %v1573_v32 }
 0xd9f   :  { %v1491_v45 = vmul.f32 %v3092_v27, %v1485_v19  ;;  %v1845_v47 = vsel %vm350_vm3, %v4268_v39, 0 }
 0xda1   :  { %v4249_v38 = vadd.f32 %v3093_v10, %v1491_v45 }
 0xda3   :  { %v1589_v37 = vpack.c.bf16 %v4249_v38, %v4247_v20 }
 0xda5   :  { %3402 = vmatmul.mubr.msk.bf16.vlgmr.msra.gmra.mrb[16].mxu0 %vm56_vm0, %v1589_v37 }
 0xda6   :  { %3407 = vmatprep.mubr.msk.bf16.mxu0 %vm3706_vm1, %v3705_v2 }
 0xdf9   :  { %v1657_v43 = vpop.permute.xlu1 %1656 }
 0xdfa   :  { %v1662_v42 = vsel %vm204_vm2, %v1657_v43, 0 }
 0xdfb   :  { %3406 = vmatpush3.bf16.xpose.msra.mxu0 %v1662_v42 }
 0xdfc   :  { %3417 = vmatprep.subr.bf16.mxu0 %v3705_v2 }
 0xdfd   :  { %v1706_v63 = vpop.permute.xlu1 %1705 }
 0xdfe   :  { %v1711_v22 = vsel %vm204_vm2, %v1706_v63, 0 }
 0xdff   :  { %3412 = vmatpush3.bf16.xpose.msra.mxu1 %v1711_v22 }
 0xe00   :  { %3423 = vmatprep.subr.bf16.mxu1 %v3705_v2 }
 0xe78   :  { %v1640_v25 = vpop.f32.mrb[16].mxu0 }
 0xe79   :  { %v1641_v29 = vadd.f32 %v3097_v44, %v1640_v25  ;;  %v3403_v60 = vpop.f32.mrb[17].mxu0 }
 0xe7a   :  { %v1643_v35 = vpop.f32.mrb[18].mxu0 }
 0xe7b   :  { %v4270_v40 = vpack.c.bf16 %v1641_v29, %v1641_v29  ;;  %v1644_v46 = vadd.f32 %v3097_v44, %v1643_v35  ;;  %v3404_v36 = vpop.f32.mrb[19].mxu0 }
 0xe7d   :  { %v4272_v21 = vpack.c.bf16 %v1644_v46, %v1644_v46  ;;  %3408 = vmatmul.mubr.msk.bf16.vlgmr.msra.gmra.mrb[20].mxu0 %vm204_vm2, %v4270_v40 }
 0xe7e   :  { %3418 = vmatpush3.bf16.msra.mxu0 %v1799_v7  ;;  %3419 = vmatprep.mubr.msk.bf16.mxu0 %vm3706_vm1, %v3705_v2 }
 0xe7f   :  { %3414 = vmatmul.mubr.msk.bf16.vlgmr.msra.gmra.mrb[60].mxu1 %vm204_vm2, %v4272_v21  ;;  %3429 = vmatprep.subr.bf16.mxu0 %v3705_v2 }
 0xe80   :  { %3424 = vmatpush3.bf16.msra.mxu1 %v1845_v47  ;;  %3425 = vmatprep.mubr.msk.bf16.mxu1 %vm3706_vm1, %v3705_v2 }
 0xe81   :  { %3435 = vmatprep.subr.bf16.mxu1 %v3705_v2 }
 0xf50   :  { %v1698_v58 = vpop.f32.mrb[20].mxu0 }
 0xf51   :  { %v1753_v52 = vmul.f32 0.35355338, %v1698_v58  ;;  %v3409_v30 = vpop.f32.mrb[21].mxu0 }
 0xf52   :  { %v1701_v0 = vpop.f32.mrb[22].mxu0  ;;  %v1747_v1 = vpop.f32.mrb[60].mxu1 }
 0xf53   :  { %v1754_v4 = vmul.f32 0.35355338, %v1747_v1  ;;  %v3410_v33 = vpop.f32.mrb[23].mxu0  ;;  %v3415_v41 = vpop.f32.mrb[61].mxu1  ;;  %v1767_v34 = vadd.f32 %v4295_v54, %v1753_v52 }
 0xf54   :  { %v1750_v62 = vpop.f32.mrb[62].mxu1 }
 0xf55   :  { %v3416_v55 = vpop.f32.mrb[63].mxu1  ;;  %v1769_v56 = vsel %vm204_vm2, %v1767_v34, -inf  ;;  %v1768_v5 = vadd.f32 %v4298_v61, %v1754_v4 }
 0xf56   :  { %1770 = vmax.xlane.f32.xlu1 %v1769_v56 }
 0xf57   :  { %v1772_v6 = vsel %vm204_vm2, %v1768_v5, -inf }
 0xf58   :  { %1773 = vmax.xlane.f32.xlu0 %v1772_v6 }
 0xfe3   :  { %v1771_v8 = vpop.xlane.xlu1 %1770 }
 0xfe4   :  { %v1775_v59 = vsub.f32 %v1767_v34, %v1771_v8 }
 0xfe5   :  { %v1774_v3 = vpop.xlane.xlu0 %1773 }
 0xfe6   :  { %v1777_v9 = vmul.f32 1.442695, %v1775_v59  ;;  %v1776_v11 = vsub.f32 %v1768_v5, %v1774_v3 }
 0xfe8   :  { %3633 = vpow2.f32 %v1777_v9  ;;  %v1779_v12 = vmul.f32 1.442695, %v1776_v11  ;;  %v1647_v11 = vld [vmem:[%s4620_s4 + $0xe0] sm:$0xff] }
 0xfea   :  { %3635 = vpow2.f32 %v1779_v12  ;;  %v1648_v12 = vld [vmem:[%s4620_s4 + $0xe8] sm:$0xff] }
 0xff2   :  { %v3634_v13 = vpop.eup %3633 }
 0xff3   :  { %v1781_v14 = vsel %vm204_vm2, %v3634_v13, 0.0 }
 0xff4   :  { %v3636_v15 = vpop.eup %3635  ;;  %1782 = vadd.xlane.f32.xlu0 %v1781_v14  ;;  %v1649_v14 = vld [vmem:[%s4620_s4 + $0xf0] sm:$0xff] }
 0xff5   :  { %v1784_v16 = vsel %vm204_vm2, %v3636_v15, 0.0 }
 0xff6   :  { %1785 = vadd.xlane.f32.xlu1 %v1784_v16 }
0x1007   :  { %1944 = vrot.lane.b32.xlu1 %v4235_v57, %s3710_s2 }
0x100a   :  { %1893 = vrot.lane.b32.xlu0 %v4233_v51, %s3710_s2 }
0x100b   :  { %1891 = vrot.lane.b32.xlu1 %v4270_v40, %s3712_s16 }
0x100e   :  { %1942 = vrot.lane.b32.xlu0 %v4272_v21, %s3712_s16 }
0x1081   :  { %v1783_v17 = vpop.xlane.xlu0 %1782 }
0x1082   :  { %3637 = vrcp.f32 %v1783_v17 }
0x1083   :  { %v1786_v18 = vpop.xlane.xlu1 %1785 }
0x1084   :  { %3639 = vrcp.f32 %v1786_v18 }
0x1085   :  { %v1894_v31 = vpop.permute.xlu0 %1893 }
0x1086   :  { %v1899_v43 = vsel %vm204_vm2, %v1894_v31, 0 }
0x1087   :  { %v1945_v37 = vpop.permute.xlu1 %1944 }
0x1088   :  { %v1950_v63 = vsel %vm204_vm2, %v1945_v37, 0 }
0x1089   :  { %v1943_v23 = vpop.permute.xlu0 %1942 }
0x108b   :  { %v1892_v22 = vpop.permute.xlu1 %1891 }
0x108c   :  { %v3638_v27 = vpop.eup %3637 }
0x108d   :  { %v1789_v28 = vmul.f32 %v3638_v27, %v3634_v13  ;;  %v4354_v13 = vpack.c.bf16 %v1648_v12, %v1647_v11 }
0x108e   :  { %v3640_v19 = vpop.eup %3639 }
0x108f   :  { %v1790_v10 = vmul.f32 %v3640_v19, %v3636_v15  ;;  %v1791_v45 = vpack.c.bf16 %v1789_v28, %v1789_v28  ;;  %v1650_v15 = vld [vmem:[%s4620_s4 + $0xf8] sm:$0xff] }
0x1090   :  { %v4364_v16 = vpack.c.bf16 %v1650_v15, %v1649_v14 }
0x1091   :  { %3420 = vmatmul.mubr.msk.bf16.vlgmr.msra.gmra.mrb[24].mxu0 %vm204_vm2, %v1791_v45  ;;  %v1792_v42 = vpack.c.bf16 %v1790_v10, %v1790_v10 }
0x1092   :  { %3430 = vmatpush3.bf16.xpose.msra.mxu0 %v1899_v43  ;;  %3431 = vmatprep.mubr.msk.bf16.mxu0 %vm3706_vm1, %v3705_v2 }
0x1093   :  { %3426 = vmatmul.mubr.msk.bf16.vlgmr.msra.gmra.mrb[64].mxu1 %vm204_vm2, %v1792_v42  ;;  %3441 = vmatprep.subr.bf16.mxu0 %v3705_v2 }
0x1094   :  { %3436 = vmatpush3.bf16.xpose.msra.mxu1 %v1950_v63  ;;  %3437 = vmatprep.mubr.msk.bf16.mxu1 %vm3706_vm1, %v3705_v2 }
0x1095   :  { %3447 = vmatprep.subr.bf16.mxu1 %v3705_v2 }
0x1099   :  { %3432 = vmatmul.mubr.msk.bf16.vlgmr.msra.gmra.mrb[28].mxu0 %vm204_vm2, %v1892_v22 }
0x109a   :  { %3443 = vmatprep.mubr.msk.bf16.mxu0 %vm3706_vm1, %v3705_v2 }
0x109b   :  { %3438 = vmatmul.mubr.msk.bf16.vlgmr.msra.gmra.mrb[68].mxu1 %vm204_vm2, %v1943_v23 }
0x109c   :  { %3449 = vmatprep.mubr.msk.bf16.mxu1 %vm3706_vm1, %v3705_v2 }
0x1164   :  { %v4330_v24 = vpop.f32.mrb[24].mxu0 }
0x1165   :  { %v3421_v44 = vpop.f32.mrb[25].mxu0 }
0x1166   :  { %v1838_v32 = vpop.f32.mrb[26].mxu0  ;;  %v4332_v25 = vpop.f32.mrb[64].mxu1 }
0x1167   :  { %v1887_v29 = vpack.c.bf16 %v4332_v25, %v4330_v24  ;;  %v3422_v60 = vpop.f32.mrb[27].mxu0  ;;  %v3427_v35 = vpop.f32.mrb[65].mxu1 }
0x1168   :  { %v1884_v46 = vpop.f32.mrb[66].mxu1  ;;  %v2179_v60 = vsel %vm204_vm2, %v4354_v13, 0 }
0x1169   :  { %v3428_v36 = vpop.f32.mrb[67].mxu1 }
0x116a   :  { %v2182_v36 = vsel %vm204_vm2, %v4364_v16, 0 }
0x116c   :  { %v1935_v7 = vpop.f32.mrb[28].mxu0 }
0x116d   :  { %v1992_v47 = vmul.f32 0.35355338, %v1935_v7  ;;  %v3433_v48 = vpop.f32.mrb[29].mxu0 }
0x116e   :  { %v1938_v49 = vpop.f32.mrb[30].mxu0  ;;  %v1986_v50 = vpop.f32.mrb[68].mxu1 }
0x116f   :  { %v1993_v53 = vmul.f32 0.35355338, %v1986_v50  ;;  %v3434_v58 = vpop.f32.mrb[31].mxu0  ;;  %v3439_v52 = vpop.f32.mrb[69].mxu1  ;;  %v1994_v30 = vadd.f32 %v1992_v47, %v4295_v54 }
0x1170   :  { %v1989_v0 = vpop.f32.mrb[70].mxu1 }
0x1171   :  { %v3440_v1 = vpop.f32.mrb[71].mxu1  ;;  %v1996_v4 = vsel %vm204_vm2, %v1994_v30, -inf  ;;  %v1995_v33 = vadd.f32 %v1993_v53, %v4298_v61 }
0x1172   :  { %1997 = vmax.xlane.f32.xlu1 %v1996_v4 }
0x1173   :  { %v1999_v41 = vsel %vm204_vm2, %v1995_v33, -inf }
0x1174   :  { %2000 = vmax.xlane.f32.xlu0 %v1999_v41 }
0x11ff   :  { %v1998_v34 = vpop.xlane.xlu1 %1997 }
0x1200   :  { %v2002_v62 = vsub.f32 %v1994_v30, %v1998_v34 }
0x1201   :  { %v2001_v55 = vpop.xlane.xlu0 %2000 }
0x1202   :  { %v2004_v56 = vmul.f32 1.442695, %v2002_v62  ;;  %v2003_v5 = vsub.f32 %v1995_v33, %v2001_v55 }
0x1204   :  { %3641 = vpow2.f32 %v2004_v56  ;;  %v2006_v6 = vmul.f32 1.442695, %v2003_v5 }
0x1206   :  { %3643 = vpow2.f32 %v2006_v6 }
0x120e   :  { %v3642_v8 = vpop.eup %3641 }
0x120f   :  { %v2008_v59 = vsel %vm204_vm2, %v3642_v8, 0.0 }
0x1210   :  { %v3644_v3 = vpop.eup %3643  ;;  %2009 = vadd.xlane.f32.xlu0 %v2008_v59 }
0x1211   :  { %v2011_v9 = vsel %vm204_vm2, %v3644_v3, 0.0 }
0x1212   :  { %2012 = vadd.xlane.f32.xlu1 %v2011_v9 }
0x1223   :  { %2070 = vrot.lane.b32.xlu1 %v4268_v39, %s3712_s16 }
0x1226   :  { %2021 = vrot.lane.b32.xlu0 %v4266_v26, %s3712_s16 }
0x1227   :  { %2277 = vrot.lane.b32.xlu1 %v4235_v57, %s3714_s18 }
0x122a   :  { %2275 = vrot.lane.b32.xlu0 %v4272_v21, %s3715_s19 }
0x122b   :  { %2121 = vrot.lane.b32.xlu1 %v4354_v13, %s3712_s16 }
0x122e   :  { %2123 = vrot.lane.b32.xlu0 %v4364_v16, %s3712_s16 }
0x122f   :  { %2227 = vrot.lane.b32.xlu1 %v4233_v51, %s3714_s18 }
0x1232   :  { %2225 = vrot.lane.b32.xlu0 %v4270_v40, %s3715_s19 }
0x129d   :  { %v2010_v17 = vpop.xlane.xlu0 %2009 }
0x129e   :  { %3645 = vrcp.f32 %v2010_v17 }
0x129f   :  { %v2013_v18 = vpop.xlane.xlu1 %2012 }
0x12a0   :  { %3647 = vrcp.f32 %v2013_v18 }
0x12a1   :  { %v2022_v27 = vpop.permute.xlu0 %2021 }
0x12a2   :  { %v2027_v28 = vsel %vm350_vm3, %v2022_v27, 0 }
0x12a3   :  { %3442 = vmatpush3.bf16.msra.mxu0 %v2027_v28  ;;  %v2071_v19 = vpop.permute.xlu1 %2070 }
0x12a4   :  { %v2076_v31 = vsel %vm350_vm3, %v2071_v19, 0  ;;  %3453 = vmatprep.subr.bf16.mxu0 %v3705_v2 }
0x12a5   :  { %3448 = vmatpush3.bf16.msra.mxu1 %v2076_v31  ;;  %v2276_v23 = vpop.permute.xlu0 %2275 }
0x12a6   :  { %3461 = vmatprep.subr.bf16.mxu1 %v3705_v2 }
0x12a7   :  { %v2278_v10 = vpop.permute.xlu1 %2277 }
0x12a8   :  { %v3646_v45 = vpop.eup %3645  ;;  %v2283_v7 = vsel %vm204_vm2, %v2278_v10, 0 }
0x12a9   :  { %v2016_v37 = vmul.f32 %v3646_v45, %v3642_v8  ;;  %v2124_v35 = vpop.permute.xlu0 %2123 }
0x12aa   :  { %v3648_v43 = vpop.eup %3647  ;;  %v2132_v46 = vsel %vm204_vm2, %v2124_v35, 0 }
0x12ab   :  { %v2017_v42 = vmul.f32 %v3648_v43, %v3644_v3  ;;  %v2122_v63 = vpop.permute.xlu1 %2121  ;;  %v2018_v22 = vpack.c.bf16 %v2016_v37, %v2016_v37 }
0x12ac   :  { %v2129_v44 = vsel %vm204_vm2, %v2122_v63, 0 }
0x12ad   :  { %3444 = vmatmul.mubr.msk.bf16.vlgmr.msra.gmra.mrb[32].mxu0 %vm204_vm2, %v2018_v22  ;;  %v2019_v32 = vpack.c.bf16 %v2017_v42, %v2017_v42  ;;  %v2226_v0 = vpop.permute.xlu0 %2225 }
0x12ae   :  { %3454 = vmatpush3.bf16.xpose.msra.mxu0 %v2129_v44  ;;  %3457 = vmatprep.mubr.msk.bf16.mxu0 %vm3706_vm1, %v3705_v2 }
0x12af   :  { %3450 = vmatmul.mubr.msk.bf16.vlgmr.msra.gmra.mrb[72].mxu1 %vm204_vm2, %v2019_v32  ;;  %3455 = vmatprep.subr.bf16.mxu0 %v3705_v2  ;;  %v2228_v48 = vpop.permute.xlu1 %2227 }
0x12b0   :  { %3462 = vmatpush3.bf16.xpose.msra.mxu1 %v2179_v60  ;;  %3465 = vmatprep.mubr.msk.bf16.mxu1 %vm3706_vm1, %v3705_v2  ;;  %v2233_v52 = vsel %vm204_vm2, %v2228_v48, 0 }
0x12b1   :  { %3463 = vmatprep.subr.bf16.mxu1 %v3705_v2 }
0x12b6   :  { %3456 = vmatpush3.bf16.xpose.msra.mxu0 %v2132_v46 }
0x12b7   :  { %3469 = vmatprep.subr.bf16.mxu0 %v3705_v2 }
0x12b8   :  { %3464 = vmatpush3.bf16.xpose.msra.mxu1 %v2182_v36 }
0x12b9   :  { %3475 = vmatprep.subr.bf16.mxu1 %v3705_v2 }
0x12bf   :  { %3466 = vmatmul.mubr.msk.bf16.vlgmr.msra.gmra.mrb[76].mxu1 %vm204_vm2, %v1887_v29 }
0x12c0   :  { %3476 = vmatpush3.bf16.xpose.msra.mxu1 %v2283_v7  ;;  %3477 = vmatprep.mubr.msk.bf16.mxu1 %vm3706_vm1, %v3705_v2 }
0x12c1   :  { %3487 = vmatprep.subr.bf16.mxu1 %v3705_v2 }
0x12c7   :  { %3478 = vmatmul.mubr.msk.bf16.vlgmr.msra.gmra.mrb[80].mxu1 %vm204_vm2, %v2276_v23 }
0x12c8   :  { %3489 = vmatprep.mubr.msk.bf16.mxu1 %vm3706_vm1, %v3705_v2 }
0x1380   :  { %v2063_v47 = vpop.f32.mrb[32].mxu0 }
0x1381   :  { %v3445_v49 = vpop.f32.mrb[33].mxu0 }
0x1382   :  { %v2066_v50 = vpop.f32.mrb[34].mxu0  ;;  %v2112_v53 = vpop.f32.mrb[72].mxu1 }
0x1383   :  { %v2118_v58 = vpack.c.bf16 %v2112_v53, %v2063_v47  ;;  %v3446_v24 = vpop.f32.mrb[35].mxu0  ;;  %v3451_v25 = vpop.f32.mrb[73].mxu1 }
0x1384   :  { %v2115_v29 = vpop.f32.mrb[74].mxu1 }
0x1385   :  { %v3452_v30 = vpop.f32.mrb[75].mxu1  ;;  %3458 = vmatmul.mubr.msk.bf16.vlgmr.msra.gmra.mrb[36].mxu0 %vm204_vm2, %v2118_v58 }
0x1386   :  { %3470 = vmatpush3.bf16.xpose.msra.mxu0 %v2233_v52  ;;  %3471 = vmatprep.mubr.msk.bf16.mxu0 %vm3706_vm1, %v3705_v2 }
0x1387   :  { %3481 = vmatprep.subr.bf16.mxu0 %v3705_v2 }
0x138d   :  { %3472 = vmatmul.mubr.msk.bf16.vlgmr.msra.gmra.mrb[40].mxu0 %vm204_vm2, %v2226_v0 }
0x138e   :  { %3483 = vmatprep.mubr.msk.bf16.mxu0 %vm3706_vm1, %v3705_v2 }
0x1392   :  { %v2218_v1 = vpop.f32.mrb[76].mxu1 }
0x1393   :  { %v3467_v4 = vpop.f32.mrb[77].mxu1 }
0x1394   :  { %v2221_v33 = vpop.f32.mrb[78].mxu1 }
0x1395   :  { %v3468_v41 = vpop.f32.mrb[79].mxu1 }
0x139a   :  { %v2319_v34 = vpop.f32.mrb[80].mxu1 }
0x139b   :  { %v2326_v62 = vmul.f32 0.35355338, %v2319_v34  ;;  %v3479_v55 = vpop.f32.mrb[81].mxu1 }
0x139c   :  { %v2322_v56 = vpop.f32.mrb[82].mxu1 }
0x139d   :  { %v3480_v5 = vpop.f32.mrb[83].mxu1  ;;  %v2328_v6 = vadd.f32 %v2326_v62, %v4298_v61 }
0x139f   :  { %v2332_v8 = vsel %vm204_vm2, %v2328_v6, -inf }
0x13a0   :  { %2333 = vmax.xlane.f32.xlu1 %v2332_v8 }
0x13b1   :  { %2508 = vrot.lane.b32.xlu1 %v4233_v51, %s3716_s20 }
0x13b5   :  { %2506 = vrot.lane.b32.xlu1 %v4270_v40, %s3718_s30 }
0x13b9   :  { %2556 = vrot.lane.b32.xlu1 %v4272_v21, %s3718_s30 }
0x142d   :  { %v2334_v59 = vpop.xlane.xlu1 %2333 }
0x142e   :  { %v2336_v3 = vsub.f32 %v2328_v6, %v2334_v59 }
0x1430   :  { %v2339_v9 = vmul.f32 1.442695, %v2336_v3 }
0x1432   :  { %3649 = vpow2.f32 %v2339_v9 }
0x143c   :  { %v3650_v11 = vpop.eup %3649 }
0x143d   :  { %v2344_v12 = vsel %vm204_vm2, %v3650_v11, 0.0 }
0x143e   :  { %2345 = vadd.xlane.f32.xlu0 %v2344_v12 }
0x1454   :  { %2401 = vrot.lane.b32.xlu0 %v4268_v39, %s3715_s19 }
0x1458   :  { %2558 = vrot.lane.b32.xlu0 %v4235_v57, %s3716_s20  ;;  %v2168_v51 = vpop.f32.mrb[36].mxu0 }
0x1459   :  { %v4426_v14 = vadd.f32 %v2218_v1, %v2168_v51  ;;  %v3459_v40 = vpop.f32.mrb[37].mxu0 }
0x145a   :  { %v2171_v15 = vpop.f32.mrb[38].mxu0 }
0x145b   :  { %v4428_v21 = vadd.f32 %v2221_v33, %v2171_v15  ;;  %v3460_v17 = vpop.f32.mrb[39].mxu0 }
0x1460   :  { %v2269_v18 = vpop.f32.mrb[40].mxu0 }
0x1461   :  { %v3473_v27 = vpop.f32.mrb[41].mxu0  ;;  %v2325_v31 = vmul.f32 0.35355338, %v2269_v18 }
0x1462   :  { %v2272_v28 = vpop.f32.mrb[42].mxu0 }
0x1463   :  { %v3474_v19 = vpop.f32.mrb[43].mxu0  ;;  %v2327_v10 = vadd.f32 %v2325_v31, %v4295_v54 }
0x1465   :  { %v2329_v45 = vsel %vm204_vm2, %v2327_v10, -inf }
0x1477   :  { %2330 = vmax.xlane.f32.xlu0 %v2329_v45 }
0x148d   :  { %2353 = vrot.lane.b32.xlu0 %v4266_v26, %s3715_s19 }
0x1491   :  { %2450 = vrot.lane.b32.xlu0 %v4354_v13, %s3715_s19 }
0x1495   :  { %2634 = vrot.lane.b32.xlu0 %v4266_v26, %s3718_s30  ;;  %v2509_v26 = vpop.permute.xlu1 %2508 }
0x1499   :  { %2682 = vrot.lane.b32.xlu0 %v4268_v39, %s3718_s30  ;;  %v2514_v39 = vsel %vm204_vm2, %v2509_v26, 0  ;;  %v2507_v23 = vpop.permute.xlu1 %2506 }
0x149d   :  { %2731 = vrot.lane.b32.xlu0 %v4354_v13, %s3718_s30  ;;  %v2557_v32 = vpop.permute.xlu1 %2556 }
0x14a1   :  { %2733 = vrot.lane.b32.xlu0 %v4364_v16, %s3718_s30 }
0x14cb   :  { %v2346_v57 = vpop.xlane.xlu0 %2345 }
0x14cc   :  { %3651 = vrcp.f32 %v2346_v57 }
0x14cf   :  { %v2402_v37 = vpop.permute.xlu0 %2401 }
0x14d0   :  { %v2407_v43 = vsel %vm350_vm3, %v2402_v37, 0 }
0x14d1   :  { %3488 = vmatpush3.bf16.msra.mxu1 %v2407_v43 }
0x14d2   :  { %3501 = vmatprep.subr.bf16.mxu1 %v3705_v2 }
0x14d3   :  { %v2559_v13 = vpop.permute.xlu0 %2558 }
0x14d4   :  { %v2564_v44 = vsel %vm204_vm2, %v2559_v13, 0 }
0x14d6   :  { %v3652_v42 = vpop.eup %3651 }
0x14d7   :  { %v2350_v63 = vmul.f32 %v3652_v42, %v3650_v11 }
0x14d9   :  { %v2352_v22 = vpack.c.bf16 %v2350_v63, %v2350_v63 }
0x14db   :  { %3490 = vmatmul.mubr.msk.bf16.vlgmr.msra.gmra.mrb[84].mxu1 %vm204_vm2, %v2352_v22 }
0x14dc   :  { %3502 = vmatpush3.bf16.xpose.msra.mxu1 %v2514_v39  ;;  %3503 = vmatprep.mubr.msk.bf16.mxu1 %vm3706_vm1, %v3705_v2 }
0x14dd   :  { %3507 = vmatprep.subr.bf16.mxu1 %v3705_v2 }
0x14e3   :  { %3504 = vmatmul.mubr.msk.bf16.vlgmr.msra.gmra.mrb[88].mxu1 %vm204_vm2, %v2507_v23 }
0x14e4   :  { %3508 = vmatpush3.bf16.xpose.msra.mxu1 %v2564_v44  ;;  %3509 = vmatprep.mubr.msk.bf16.mxu1 %vm3706_vm1, %v3705_v2 }
0x14e5   :  { %3519 = vmatprep.subr.bf16.mxu1 %v3705_v2 }
0x14eb   :  { %3510 = vmatmul.mubr.msk.bf16.vlgmr.msra.gmra.mrb[92].mxu1 %vm204_vm2, %v2557_v32 }
0x14ec   :  { %3521 = vmatprep.mubr.msk.bf16.mxu1 %vm3706_vm1, %v3705_v2 }
0x1504   :  { %v2331_v60 = vpop.xlane.xlu0 %2330 }
0x1505   :  { %v2335_v35 = vsub.f32 %v2327_v10, %v2331_v60 }
0x1507   :  { %v2337_v46 = vmul.f32 1.442695, %v2335_v35 }
0x1508   :  { %v2354_v36 = vpop.permute.xlu0 %2353 }
0x1509   :  { %3653 = vpow2.f32 %v2337_v46  ;;  %v2359_v7 = vsel %vm350_vm3, %v2354_v36, 0 }
0x150a   :  { %3482 = vmatpush3.bf16.msra.mxu0 %v2359_v7 }
0x150b   :  { %3493 = vmatprep.subr.bf16.mxu0 %v3705_v2 }
0x150c   :  { %v2451_v47 = vpop.permute.xlu0 %2450 }
0x150d   :  { %v2458_v0 = vsel %vm204_vm2, %v2451_v47, 0 }
0x1510   :  { %v4461_v48 = vpop.permute.xlu0 %2634 }
0x1513   :  { %v3654_v49 = vpop.eup %3653 }
0x1514   :  { %v2683_v50 = vpop.permute.xlu0 %2682  ;;  %v2341_v53 = vsel %vm204_vm2, %v3654_v49, 0.0 }
0x1515   :  { %v2688_v58 = vsel %vm350_vm3, %v2683_v50, 0  ;;  %2342 = vadd.xlane.f32.xlu1 %v2341_v53 }
0x1516   :  { %3520 = vmatpush3.bf16.msra.mxu1 %v2688_v58 }
0x1517   :  { %3533 = vmatprep.subr.bf16.mxu1 %v3705_v2 }
0x1518   :  { %v2732_v60 = vpop.permute.xlu0 %2731 }
0x1519   :  { %v2739_v46 = vsel %vm204_vm2, %v2732_v60, 0  ;;  %v2929_v60 = vld [vmem:[%s4620_s4 + $0x158] sm:$0xff] }
0x151c   :  { %v2734_v36 = vpop.permute.xlu0 %2733 }
0x151d   :  { %v2742_v7 = vsel %vm204_vm2, %v2734_v36, 0 }
0x15a2   :  { %v2343_v24 = vpop.xlane.xlu1 %2342 }
0x15a3   :  { %3655 = vrcp.f32 %v2343_v24 }
0x15ad   :  { %v3656_v25 = vpop.eup %3655 }
0x15ae   :  { %v2349_v29 = vmul.f32 %v3656_v25, %v3654_v49  ;;  %v2443_v52 = vpop.f32.mrb[84].mxu1 }
0x15af   :  { %v3491_v30 = vpop.f32.mrb[85].mxu1 }
0x15b0   :  { %v2446_v1 = vpop.f32.mrb[86].mxu1  ;;  %v2351_v4 = vpack.c.bf16 %v2349_v29, %v2349_v29 }
0x15b1   :  { %v3492_v33 = vpop.f32.mrb[87].mxu1 }
0x15b2   :  { %3484 = vmatmul.mubr.msk.bf16.vlgmr.msra.gmra.mrb[44].mxu0 %vm204_vm2, %v2351_v4 }
0x15b3   :  { %3494 = vmatpush3.bf16.xpose.msra.mxu0 %v2458_v0  ;;  %3497 = vmatprep.mubr.msk.bf16.mxu0 %vm3706_vm1, %v3705_v2 }
0x15b4   :  { %3495 = vmatprep.subr.bf16.mxu0 %v3705_v2 }
0x15b6   :  { %v2550_v41 = vpop.f32.mrb[88].mxu1 }
0x15b7   :  { %v2606_v34 = vmul.f32 0.35355338, %v2550_v41  ;;  %v3505_v62 = vpop.f32.mrb[89].mxu1 }
0x15b8   :  { %v2553_v55 = vpop.f32.mrb[90].mxu1 }
0x15b9   :  { %v2608_v56 = vadd.f32 %v2606_v34, %v4295_v54  ;;  %v3506_v5 = vpop.f32.mrb[91].mxu1 }
0x15bb   :  { %v2610_v6 = vsel %vm204_vm2, %v2608_v56, -inf }
0x15bc   :  { %2611 = vmax.xlane.f32.xlu1 %v2610_v6 }
0x15be   :  { %v2600_v8 = vpop.f32.mrb[92].mxu1 }
0x15bf   :  { %v2607_v59 = vmul.f32 0.35355338, %v2600_v8  ;;  %v3511_v3 = vpop.f32.mrb[93].mxu1 }
0x15c0   :  { %v2603_v9 = vpop.f32.mrb[94].mxu1 }
0x15c1   :  { %v2609_v11 = vadd.f32 %v2607_v59, %v4298_v61  ;;  %v3512_v12 = vpop.f32.mrb[95].mxu1 }
0x15c3   :  { %v2613_v51 = vsel %vm204_vm2, %v2609_v11, -inf }
0x15c4   :  { %2614 = vmax.xlane.f32.xlu1 %v2613_v51 }
0x1649   :  { %v2612_v40 = vpop.xlane.xlu1 %2611 }
0x164a   :  { %v2616_v15 = vsub.f32 %v2608_v56, %v2612_v40 }
0x164c   :  { %v2618_v17 = vmul.f32 1.442695, %v2616_v15 }
0x164e   :  { %3657 = vpow2.f32 %v2618_v17 }
0x1651   :  { %v2615_v18 = vpop.xlane.xlu1 %2614 }
0x1652   :  { %v2617_v54 = vsub.f32 %v2609_v11, %v2615_v18 }
0x1654   :  { %v2620_v27 = vmul.f32 1.442695, %v2617_v54 }
0x1656   :  { %3659 = vpow2.f32 %v2620_v27  ;;  %v2850_v27 = vld [vmem:[%s4620_s4 + $0x100] sm:$0xff] }
0x1658   :  { %v3658_v28 = vpop.eup %3657 }
0x1659   :  { %v2622_v19 = vsel %vm204_vm2, %v3658_v28, 0.0 }
0x165a   :  { %2623 = vadd.xlane.f32.xlu1 %v2622_v19 }
0x1660   :  { %v3660_v31 = vpop.eup %3659 }
0x1661   :  { %v2625_v10 = vsel %vm204_vm2, %v3660_v31, 0.0 }
0x1662   :  { %2626 = vadd.xlane.f32.xlu1 %v2625_v10  ;;  %v2852_v10 = vld [vmem:[%s4620_s4 + $0x110] sm:$0xff] }
0x1673   :  { %2452 = vrot.lane.b32.xlu1 %v4364_v16, %s3715_s19  ;;  %v2640_v16 = vsel %vm350_vm3, %v4461_v48, 0 }
0x1685   :  { %v2395_v61 = vpop.f32.mrb[44].mxu0 }
0x1686   :  { %v2449_v45 = vpack.c.bf16 %v2443_v52, %v2395_v61  ;;  %v3485_v57 = vpop.f32.mrb[45].mxu0  ;;  %v2853_v61 = vld [vmem:[%s4620_s4 + $0x118] sm:$0xff] }
0x1687   :  { %v2398_v37 = vpop.f32.mrb[46].mxu0 }
0x1688   :  { %v3486_v43 = vpop.f32.mrb[47].mxu0  ;;  %v2854_v37 = vld [vmem:[%s4620_s4 + $0x120] sm:$0xff] }
0x1689   :  { %v2855_v43 = vld [vmem:[%s4620_s4 + $0x128] sm:$0xff] }
0x16e7   :  { %v2624_v42 = vpop.xlane.xlu1 %2623 }
0x16ef   :  { %v2627_v63 = vpop.xlane.xlu1 %2626 }
0x16f0   :  { %3661 = vrcp.f32 %v2627_v63  ;;  %v2856_v63 = vld [vmem:[%s4620_s4 + $0x130] sm:$0xff] }
0x16f1   :  { %3663 = vrcp.f32 %v2624_v42  ;;  %v2861_v42 = vpack.c.bf16 %v2855_v43, %v2854_v37 }
0x16f3   :  { %v2453_v26 = vpop.permute.xlu1 %2452 }
0x16f4   :  { %v2461_v22 = vsel %vm204_vm2, %v2453_v26, 0  ;;  %v2857_v26 = vld [vmem:[%s4620_s4 + $0x138] sm:$0xff] }
0x16f5   :  { %3496 = vmatpush3.bf16.xpose.msra.mxu0 %v2461_v22  ;;  %v2878_v22 = vsel %vm56_vm0, %v2861_v42, 0 }
0x16f6   :  { %3513 = vmatprep.subr.bf16.mxu0 %v3705_v2 }
0x16fa   :  { %v3662_v39 = vpop.eup %3661 }
0x16fb   :  { %v3664_v13 = vpop.eup %3663  ;;  %v2631_v23 = vmul.f32 %v3662_v39, %v3660_v31  ;;  %v2862_v39 = vpack.c.bf16 %v2857_v26, %v2856_v63 }
0x16fc   :  { %3498 = vmatmul.mubr.msk.bf16.vlgmr.msra.gmra.mrb[48].mxu0 %vm204_vm2, %v2449_v45  ;;  %v2630_v32 = vmul.f32 %v3664_v13, %v3658_v28  ;;  %v2851_v28 = vld [vmem:[%s4620_s4 + $0x108] sm:$0xff]  ;;  %v2860_v45 = vpack.c.bf16 %v2853_v61, %v2852_v10 }
0x16fd   :  { %3514 = vmatpush3.bf16.msra.mxu0 %v2640_v16  ;;  %v2633_v44 = vpack.c.bf16 %v2631_v23, %v2631_v23  ;;  %3515 = vmatprep.mubr.msk.bf16.mxu0 %vm3706_vm1, %v3705_v2  ;;  %v2859_v19 = vpack.c.bf16 %v2851_v28, %v2850_v27  ;;  %v2881_v13 = vsel %vm56_vm0, %v2862_v39, 0  ;;  %v2926_v23 = vld [vmem:[%s4620_s4 + $0x140] sm:$0xff]  ;;  %v2927_v16 = vld [vmem:[%s4620_s4 + $0x148] sm:$0xff] }
0x16fe   :  { %3525 = vmatprep.subr.bf16.mxu0 %v3705_v2  ;;  %v2632_v35 = vpack.c.bf16 %v2630_v32, %v2630_v32  ;;  %v2875_v57 = vsel %vm56_vm0, %v2860_v45, 0  ;;  %v2935_v32 = vpack.c.bf16 %v2927_v16, %v2926_v23  ;;  %v3124_v28 = vld [vmem:[%s4621_s5 + $0xb] ss:$0 sm:$0xff] }
0x16ff   :  { %3522 = vmatmul.mubr.msk.bf16.vlgmr.msra.gmra.mrb[96].mxu1 %vm204_vm2, %v2633_v44  ;;  %v2872_v31 = vsel %vm56_vm0, %v2859_v19, 0  ;;  %v2928_v44 = vld [vmem:[%s4620_s4 + $0x150] sm:$0xff] }
0x1700   :  { %3541 = vmatprep.mubr.msk.bf16.mxu1 %vm3706_vm1, %v3705_v2  ;;  %3534 = vmatpush3.bf16.xpose.msra.mxu1 %v2872_v31 }
0x1701   :  { %3535 = vmatprep.subr.bf16.mxu1 %v3705_v2 }
0x1704   :  { %3516 = vmatmul.mubr.msk.bf16.vlgmr.msra.gmra.mrb[52].mxu0 %vm204_vm2, %v2632_v35  ;;  %v2936_v35 = vpack.c.bf16 %v2929_v60, %v2928_v44 }
0x1705   :  { %3529 = vmatprep.mubr.msk.bf16.mxu0 %vm3706_vm1, %v3705_v2 }
0x1706   :  { %3526 = vmatpush3.bf16.xpose.msra.mxu0 %v2739_v46 }
0x1707   :  { %3527 = vmatprep.subr.bf16.mxu0 %v3705_v2 }
0x1708   :  { %3536 = vmatpush3.bf16.xpose.msra.mxu1 %v2875_v57 }
0x1709   :  { %3537 = vmatprep.subr.bf16.mxu1 %v3705_v2 }
0x170e   :  { %3528 = vmatpush3.bf16.xpose.msra.mxu0 %v2742_v7 }
0x170f   :  { %3545 = vmatprep.subr.bf16.mxu0 %v3705_v2 }
0x1710   :  { %3538 = vmatpush3.bf16.xpose.msra.mxu1 %v2878_v22 }
0x1711   :  { %3539 = vmatprep.subr.bf16.mxu1 %v3705_v2 }
0x1718   :  { %3540 = vmatpush3.bf16.xpose.msra.mxu1 %v2881_v13 }
0x17cf   :  { %v2497_v47 = vpop.f32.mrb[48].mxu0 }
0x17d0   :  { %v2504_v48 = vadd.f32 %v2497_v47, %v4426_v14  ;;  %v3499_v49 = vpop.f32.mrb[49].mxu0 }
0x17d1   :  { %v2500_v50 = vpop.f32.mrb[50].mxu0 }
0x17d2   :  { %v2505_v53 = vadd.f32 %v2500_v50, %v4428_v21  ;;  %v3500_v58 = vpop.f32.mrb[51].mxu0  ;;  %v2724_v24 = vpop.f32.mrb[96].mxu1  ;;  %v3119_v21 = vld [vmem:[%s4621_s5 + $0x7] ss:$0 sm:$0xff] }
0x17d3   :  { %v3523_v25 = vpop.f32.mrb[97].mxu1 }
0x17d4   :  { %v2727_v29 = vpop.f32.mrb[98].mxu1 }
0x17d5   :  { %v3524_v52 = vpop.f32.mrb[99].mxu1 }
0x17d7   :  { %v2676_v30 = vpop.f32.mrb[52].mxu0 }
0x17d8   :  { %v2730_v0 = vpack.c.bf16 %v2724_v24, %v2676_v30  ;;  %v3517_v1 = vpop.f32.mrb[53].mxu0 }
0x17d9   :  { %v2679_v4 = vpop.f32.mrb[54].mxu0 }
0x17da   :  { %v3518_v33 = vpop.f32.mrb[55].mxu0  ;;  %3530 = vmatmul.mubr.msk.bf16.vlgmr.msra.gmra.mrb[56].mxu0 %vm204_vm2, %v2730_v0 }
0x17db   :  { %3553 = vmatprep.mubr.msk.bf16.mxu0 %vm3706_vm1, %v3705_v2  ;;  %3546 = vmatpush3.bf16.msra.mxu0 %v2935_v32  ;;  %v3120_v33 = vld [vmem:[%s4621_s5 + $0xd] ss:$0 sm:$0xff] }
0x17dc   :  { %3547 = vmatprep.subr.bf16.mxu0 %v3705_v2 }
0x17df   :  { %3548 = vmatpush3.bf16.msra.mxu0 %v2936_v35 }
0x17e0   :  { %3549 = vmatprep.subr.bf16.mxu0 %v3705_v2 }
0x18ad   :  { %v2778_v14 = vpop.f32.mrb[56].mxu0 }
0x18ae   :  { %v2785_v41 = vadd.f32 %v2778_v14, %v2504_v48  ;;  %v3531_v34 = vpop.f32.mrb[57].mxu0 }
0x18af   :  { %v2781_v62 = vpop.f32.mrb[58].mxu0 }
0x18b0   :  { %v2792_v55 = vadd.f32 %v3119_v21, %v2785_v41  ;;  %v2786_v56 = vadd.f32 %v2781_v62, %v2505_v53  ;;  %v3532_v5 = vpop.f32.mrb[59].mxu0  ;;  %v3121_v62 = vld [vmem:[%s4621_s5 + $0x10] ss:$0 sm:$0xff] }
0x18b2   :  { %v2793_v6 = vadd.f32 %v3119_v21, %v2786_v56  ;;  %v2794_v8 = vadd.f32 %v2792_v55, %v4247_v20 }
0x18b4   :  { %v2798_v59 = vsel %vm56_vm0, %v2794_v8, 0.0  ;;  %v2795_v3 = vadd.f32 %v2793_v6, %v4249_v38 }
0x18b5   :  { %2799 = vadd.xlane.f32.xlu1 %v2798_v59  ;;  %v2931_v59 = vld [vmem:[%s4620_s4 + $0x168] sm:$0xff] }
0x18b6   :  { %v2801_v9 = vsel %vm56_vm0, %v2795_v3, 0.0 }
0x18b7   :  { %2802 = vadd.xlane.f32.xlu0 %v2801_v9  ;;  %v2932_v9 = vld [vmem:[%s4620_s4 + $0x170] sm:$0xff] }
0x1942   :  { %v2800_v11 = vpop.xlane.xlu1 %2799 }
0x1943   :  { %v2804_v12 = vmul.f32 0.03125, %v2800_v11  ;;  %v2933_v11 = vld [vmem:[%s4620_s4 + $0x178] sm:$0xff] }
0x1944   :  { %v2803_v51 = vpop.xlane.xlu0 %2802 }
0x1945   :  { %v4509_v40 = vsub.f32 %v2794_v8, %v2804_v12  ;;  %v2805_v15 = vmul.f32 0.03125, %v2803_v51  ;;  %v2930_v8 = vld [vmem:[%s4620_s4 + $0x160] sm:$0xff]  ;;  %v2938_v12 = vpack.c.bf16 %v2933_v11, %v2932_v9  ;;  %v3122_v51 = vld [vmem:[%s4621_s5 + $0xa] ss:$0 sm:$0xff] }
0x1947   :  { %v4511_v17 = vsub.f32 %v2795_v3, %v2805_v15  ;;  %v2808_v18 = vmul.f32 %v4509_v40, %v4509_v40  ;;  %v2937_v3 = vpack.c.bf16 %v2931_v59, %v2930_v8 }
0x1949   :  { %v2810_v20 = vsel %vm56_vm0, %v2808_v18, 0.0  ;;  %v2809_v38 = vmul.f32 %v4511_v17, %v4511_v17  ;;  %3550 = vmatpush3.bf16.msra.mxu0 %v2937_v3 }
0x194a   :  { %2811 = vadd.xlane.f32.xlu0 %v2810_v20  ;;  %3551 = vmatprep.subr.bf16.mxu0 %v3705_v2 }
0x194b   :  { %v2813_v54 = vsel %vm56_vm0, %v2809_v38, 0.0 }
0x194c   :  { %2814 = vadd.xlane.f32.xlu1 %v2813_v54 }
0x194d   :  { %3552 = vmatpush3.bf16.msra.mxu0 %v2938_v12 }
0x19d7   :  { %v2812_v46 = vpop.xlane.xlu0 %2811 }
0x19d8   :  { %v2816_v36 = vmul.f32 0.032258064, %v2812_v46 }
0x19d9   :  { %v2815_v7 = vpop.xlane.xlu1 %2814 }
0x19da   :  { %3665 = vrsqrt.f32 %v2816_v36  ;;  %v2817_v47 = vmul.f32 0.032258064, %v2815_v7  ;;  %vm2820_vm10 = vcmp.eq.f32.partialorder %v2816_v36, inf  ;;  %v2823_v50 = vand.u32 2147483648, %v2816_v36 }
0x19db   :  { %vm2822_vm11 = vcmp.eq.f32.partialorder %v2816_v36, 0.0 }
0x19dc   :  { %3667 = vrsqrt.f32 %v2817_v47  ;;  %vm2827_vm12 = vcmp.eq.f32.partialorder %v2817_v47, inf  ;;  %v2830_v52 = vand.u32 2147483648, %v2817_v47  ;;  %vm2829_vm13 = vcmp.eq.f32.partialorder %v2817_v47, 0.0 }
0x19e4   :  { %v3666_v48 = vpop.eup %3665 }
0x19e5   :  { %v2819_v49 = vmul.f32 %v3666_v48, %v2816_v36 }
0x19e6   :  { %v3668_v53 = vpop.eup %3667 }
0x19e7   :  { %v2821_v58 = vsel %vm2820_vm10, %v2816_v36, %v2819_v49  ;;  %v2826_v25 = vmul.f32 %v3668_v53, %v2817_v47 }
0x19e8   :  { %v2824_v24 = vsel %vm2822_vm11, %v2823_v50, %v2821_v58 }
0x19e9   :  { %v2832_v29 = vadd.f32 1e-06, %v2824_v24  ;;  %v2828_v30 = vsel %vm2827_vm12, %v2817_v47, %v2826_v25 }
0x19ea   :  { %v2831_v0 = vsel %vm2829_vm13, %v2830_v52, %v2828_v30 }
0x19eb   :  { %3669 = vrcp.f32 %v2832_v29  ;;  %v2833_v1 = vadd.f32 1e-06, %v2831_v0 }
0x19ed   :  { %3671 = vrcp.f32 %v2833_v1 }
0x19f5   :  { %v3670_v4 = vpop.eup %3669 }
0x19f6   :  { %v2836_v14 = vmul.f32 %v3670_v4, %v4509_v40 }
0x19f7   :  { %v3672_v21 = vpop.eup %3671 }
0x19f8   :  { %v2837_v41 = vmul.f32 %v3672_v21, %v4511_v17  ;;  %v2842_v34 = vmul.f32 %v3120_v33, %v2836_v14  ;;  %v3127_v21 = vld [vmem:[%s4621_s5 + $0x11] ss:$0 sm:$0xff] }
0x19fa   :  { %v2843_v55 = vmul.f32 %v3120_v33, %v2837_v41  ;;  %v2848_v56 = vadd.f32 %v3121_v62, %v2842_v34  ;;  %v3126_v33 = vld [vmem:[%s4621_s5 + $0xe] ss:$0 sm:$0xff] }
0x19fc   :  { %v2849_v5 = vadd.f32 %v3121_v62, %v2843_v55 }
0x19fe   :  { %v2858_v6 = vpack.c.bf16 %v2849_v5, %v2848_v56 }
0x1a00   :  { %3542 = vmatmul.mubr.msk.bf16.vlgmr.msra.gmra.mrb[100].mxu1 %vm56_vm0, %v2858_v6 }
0x1ad3   :  { %v2917_v40 = vpop.f32.mrb[100].mxu1 }
0x1ad4   :  { %v2918_v15 = vadd.f32 %v3122_v51, %v2917_v40  ;;  %v3543_v17 = vpop.f32.mrb[101].mxu1 }
0x1ad5   :  { %v2920_v18 = vpop.f32.mrb[102].mxu1 }
0x1ad6   :  { %v2921_v20 = vadd.f32 %v3122_v51, %v2920_v18  ;;  %v3544_v2 = vpop.f32.mrb[103].mxu1  ;;  %v2924_v38 = vmax.f32 %v2918_v15, 0.0 }
0x1ad8   :  { %v2925_v54 = vmax.f32 %v2921_v20, 0.0 }
0x1ada   :  { %v2934_v27 = vpack.c.bf16 %v2925_v54, %v2924_v38 }
0x1adc   :  { %3554 = vmatmul.mubr.msk.bf16.vlgmr.msra.gmra.mrb[60].mxu0 %vm2944_vm14, %v2934_v27 }
0x1baf   :  { %v2982_v19 = vpop.f32.mrb[60].mxu0 }
0x1bb0   :  { %v2983_v31 = vadd.f32 %v3124_v28, %v2982_v19  ;;  %v3555_v10 = vpop.f32.mrb[61].mxu0 }
0x1bb1   :  { %v2985_v61 = vpop.f32.mrb[62].mxu0 }
0x1bb2   :  { %v2989_v45 = vadd.f32 %v2983_v31, %v2848_v56  ;;  %v2986_v57 = vadd.f32 %v3124_v28, %v2985_v61  ;;  %v3556_v37 = vpop.f32.mrb[63].mxu0 }
0x1bb4   :  { %v2990_v43 = vadd.f32 %v2986_v57, %v2849_v5  ;;  %v2993_v42 = vsel %vm56_vm0, %v2989_v45, 0.0 }
0x1bb5   :  { %2994 = vadd.xlane.f32.xlu0 %v2993_v42 }
0x1bb6   :  { %v2996_v63 = vsel %vm56_vm0, %v2990_v43, 0.0 }
0x1bb7   :  { %2997 = vadd.xlane.f32.xlu1 %v2996_v63 }
0x1c42   :  { %v2995_v26 = vpop.xlane.xlu0 %2994 }
0x1c43   :  { %v2999_v22 = vmul.f32 0.03125, %v2995_v26 }
0x1c44   :  { %v2998_v39 = vpop.xlane.xlu1 %2997 }
0x1c45   :  { %v3001_v13 = vsub.f32 %v2989_v45, %v2999_v22  ;;  %v3000_v23 = vmul.f32 0.03125, %v2998_v39 }
0x1c47   :  { %v3002_v16 = vsub.f32 %v2990_v43, %v3000_v23  ;;  %v3003_v44 = vmul.f32 %v3001_v13, %v3001_v13 }
0x1c49   :  { %v3005_v32 = vsel %vm56_vm0, %v3003_v44, 0.0  ;;  %v3004_v60 = vmul.f32 %v3002_v16, %v3002_v16 }
0x1c4a   :  { %3006 = vadd.xlane.f32.xlu0 %v3005_v32 }
0x1c4b   :  { %v3008_v35 = vsel %vm56_vm0, %v3004_v60, 0.0 }
0x1c4c   :  { %3009 = vadd.xlane.f32.xlu1 %v3008_v35 }
0x1cd7   :  { %v3007_v46 = vpop.xlane.xlu0 %3006 }
0x1cd8   :  { %v3011_v36 = vmul.f32 0.032258064, %v3007_v46 }
0x1cd9   :  { %v3010_v7 = vpop.xlane.xlu1 %3009 }
0x1cda   :  { %3673 = vrsqrt.f32 %v3011_v36  ;;  %v3012_v47 = vmul.f32 0.032258064, %v3010_v7  ;;  %vm3015_vm15 = vcmp.eq.f32.partialorder %v3011_v36, inf  ;;  %v3018_v50 = vand.u32 2147483648, %v3011_v36 }
0x1cdb   :  { %vm3017_vm1 = vcmp.eq.f32.partialorder %v3011_v36, 0.0 }
0x1cdc   :  { %3675 = vrsqrt.f32 %v3012_v47  ;;  %vm3022_vm2 = vcmp.eq.f32.partialorder %v3012_v47, inf  ;;  %v3025_v52 = vand.u32 2147483648, %v3012_v47  ;;  %vm3024_vm3 = vcmp.eq.f32.partialorder %v3012_v47, 0.0 }
0x1ce4   :  { %v3674_v48 = vpop.eup %3673 }
0x1ce5   :  { %v3014_v49 = vmul.f32 %v3674_v48, %v3011_v36 }
0x1ce6   :  { %v3676_v53 = vpop.eup %3675 }
0x1ce7   :  { %v3016_v58 = vsel %vm3015_vm15, %v3011_v36, %v3014_v49  ;;  %v3021_v25 = vmul.f32 %v3676_v53, %v3012_v47 }
0x1ce8   :  { %v3019_v24 = vsel %vm3017_vm1, %v3018_v50, %v3016_v58 }
0x1ce9   :  { %v3027_v29 = vadd.f32 1e-06, %v3019_v24  ;;  %v3023_v30 = vsel %vm3022_vm2, %v3012_v47, %v3021_v25 }
0x1cea   :  { %v3026_v0 = vsel %vm3024_vm3, %v3025_v52, %v3023_v30 }
0x1ceb   :  { %3677 = vrcp.f32 %v3027_v29  ;;  %v3028_v1 = vadd.f32 1e-06, %v3026_v0 }
0x1ced   :  { %3679 = vrcp.f32 %v3028_v1 }
0x1cf5   :  { %v3678_v4 = vpop.eup %3677 }
0x1cf6   :  { %v3031_v14 = vmul.f32 %v3678_v4, %v3001_v13 }
0x1cf7   :  { %v3680_v41 = vpop.eup %3679 }
0x1cf8   :  { %v3037_v34 = vmul.f32 %v3126_v33, %v3031_v14  ;;  %v3032_v62 = vmul.f32 %v3680_v41, %v3002_v16 }
0x1cfa   :  { %v3043_v55 = vadd.f32 %v3127_v21, %v3037_v34  ;;  %v3038_v56 = vmul.f32 %v3126_v33, %v3032_v62 }
0x1cfc   :  { %3045 = vst.msk [vmem:[#allocation2] sm:$0xff] %vm56_vm0, %v3043_v55  ;;  %v3044_v5 = vadd.f32 %v3127_v21, %v3038_v56 }
0x1cfe   :  { %3046 = vst.msk [vmem:[#allocation2 + $0x8] sm:$0xff] %vm56_vm0, %v3044_v5 }
0x1cff   :  { %3692 = shalt.err (!%p3689_p4)
}
0x1d00   :  { %s3693_s2 = scalar_lea.hbm %s4622_s6, 256 }
0x1d01   :  { %p3694_p5 = scmp.ne.s32.totalorder %s4622_s6, %s3693_s2  ;;  %p3697_p6 = scmp.lt.u32.totalorder %s3693_s2, %s4622_s6 }
0x1d03   :  { %p3699_p7 = pnand %p3697_p6, %p3694_p5 }
0x1d05   :  { %3702 = shalt.err (!%p3699_p7)
}
0x1d06   :  { %s3721_s24 = smov 128   ;;  %s3722_s25 = smov 8  }
0x1d07   :  { %3058 = dma.vmem_to_hbm [thread:$0]  %s3053_s15, 256, %s4622_s6, [#allocation3], %s3721_s24, %s3721_s24, %s3722_s25  }
0x1d08   :  { %3703 = dma.done.wait [#allocation3], 256  }
0x1d09   :  { %3704 = vsyncadd [#allocation3], 4294967040 }
0x1d0a   :  { %3062 = vsyncpa [#allocation3], 1 }

</bundles_post_ra>
